<compile_context>
chip_gen: v6e
topology: v6e:2x2x1
jax: 0.10.0
libtpu: 0.0.40
codegen_flags: <defaults>
</compile_context>

<pallas_src>
import functools
import math

import jax
import jax.numpy as jnp
from jax.experimental import pallas as pl
from jax.experimental.pallas import tpu as pltpu


# ---------------------------------------------------------------------------
# Generation-aware configuration
# ---------------------------------------------------------------------------
@functools.lru_cache(maxsize=None)
def _gen_config():
    """VMEM limit and tile-size targets per TPU generation (v5e/v6e vs v7x)."""
    cap = 64 * 1024 * 1024
    try:
        info = pltpu.get_tpu_info()
        cap = int(getattr(info, "vmem_capacity_bytes", None)
                  or getattr(info, "vmem_size_bytes", None) or cap)
    except Exception:
        pass
    if cap >= 96 * 1024 * 1024:      # v5e / v6e: 128 MiB physical VMEM
        return {"vmem_limit": 96 * 1024 * 1024, "tile_n": 2048, "tile_rows": 64}
    return {"vmem_limit": 48 * 1024 * 1024, "tile_n": 1024, "tile_rows": 32}


def _compiler_params(n_axes):
    return pltpu.CompilerParams(
        dimension_semantics=("parallel",) * n_axes,
        vmem_limit_bytes=_gen_config()["vmem_limit"],
    )


def _pick_tile(n, target, multiple):
    """Largest t <= min(n, target) with n % t == 0 and t % multiple == 0."""
    hi = max(1, min(n, target))
    for t in range(hi, 0, -1):
        if n % t == 0 and t % multiple == 0:
            return t
    return n


def _row_tile_target(cfg, row_bytes, scale=10):
    """Bound a row tile so ~scale copies of the block fit in the VMEM budget."""
    return max(1, min(cfg["tile_rows"], cfg["vmem_limit"] // max(1, scale * row_bytes)))


# ---------------------------------------------------------------------------
# In-kernel helpers
# ---------------------------------------------------------------------------
def _shift_cols(x, d):
    """out[:, w, :] = x[:, w + d, :] where in range, else 0  (static shift d)."""
    if d == 0:
        return x
    # TODO(synk): pltpu.roll + iota mask would move these shifts onto the XLU
    # slot; slice+concat is used because it is guaranteed to lower.
    if d > 0:
        return jnp.concatenate([x[:, d:, :], jnp.zeros_like(x[:, :d, :])], axis=1)
    return jnp.concatenate([jnp.zeros_like(x[:, d:, :]), x[:, :d, :]], axis=1)


# ---------------------------------------------------------------------------
# Pallas kernels
# ---------------------------------------------------------------------------
def _pointwise_kernel(x_ref, w_ref, bias_ref, o_ref, *, relu):
    # x_ref: (1, TN, Cin) bf16   w_ref: (Cin, Cout) bf16   bias_ref: (1, Cout) f32
    y = jnp.dot(x_ref[0], w_ref[...], preferred_element_type=jnp.float32)
    y = y + bias_ref[...]
    if relu:
        y = jnp.maximum(y, 0.0)
    o_ref[0] = y.astype(o_ref.dtype)


def _fused_out_kernel(h_ref, wpw_ref, s_ref, wsd_ref, bias_ref, o_ref):
    # pw_linear(space_to_depth(h)) + shortcut 1x1(+bias)+BN + residual, fused.
    # h_ref:   (1, TR, 2, Wo, 2*hidden)  free view of the dw output (2x2 phases
    #          folded into the row-phase axis and the lane dim)
    # wpw_ref: (2, 2*hidden, Cout)       pw_linear weight, rows repacked to match
    # s_ref:   (1, TR, Wo, Cs)           shortcut dw output
    # wsd_ref: (Cs, Cout)                shortcut 1x1 weight (BN folded)
    _, TR, _, Wo, twoh = h_ref.shape
    Cout = o_ref.shape[-1]
    M = TR * Wo
    acc = jnp.dot(s_ref[0].reshape(M, s_ref.shape[-1]), wsd_ref[...],
                  preferred_element_type=jnp.float32)
    for n1 in range(2):
        hn = h_ref[0, :, n1, :, :].reshape(M, twoh)
        acc = acc + jnp.dot(hn, wpw_ref[n1], preferred_element_type=jnp.float32)
    acc = acc + bias_ref[...]
    o_ref[0] = acc.reshape(TR, Wo, Cout).astype(o_ref.dtype)


def _dw_s1_kernel(xt_ref, xb_ref, xd_ref, w_ref, bias_ref, o_ref, *, relu):
    # Depthwise KxK, stride 1, 'same' zero pad done in-kernel (no jnp.pad).
    # xt_ref/xd_ref: (1, pad, W, C) halo rows above/below the body tile xb_ref;
    # at the first/last row tile they hold clamped rows and are masked to zero.
    i = pl.program_id(1)
    nt = pl.num_programs(1)
    K = w_ref.shape[0]
    pad = K // 2
    _, TH, W, C = o_ref.shape
    top = jnp.where(i > 0, xt_ref[0], jnp.zeros_like(xt_ref[0]))
    bot = jnp.where(i < nt - 1, xd_ref[0], jnp.zeros_like(xd_ref[0]))
    window = jnp.concatenate([top, xb_ref[0], bot], axis=0)   # (TH+2*pad, W, C) bf16
    wv = w_ref[...]                                            # (K, K, C) f32
    acc = jnp.zeros((TH, W, C), jnp.float32)
    for kw in range(K):
        sh = _shift_cols(window, kw - pad)                     # K column shifts / tile
        for kh in range(K):
            patch = sh[kh:kh + TH]                             # cheap row slice
            acc = acc + patch.astype(jnp.float32) * wv[kh, kw].reshape(1, 1, C)
    acc = acc + bias_ref[...].reshape(1, 1, C)
    if relu:
        acc = jnp.maximum(acc, 0.0)
    o_ref[0] = acc.astype(o_ref.dtype)


def _dw_s2_kernel(xt_ref, xb_ref, xd_ref, w_ref, bias_ref, o_ref, *, relu):
    # Depthwise KxK, stride 2, pad=K//2.  Inputs are a *free* host-side reshape
    # view (B, H, Wo, 2*C) of the NHWC tensor (column phases on the lane dim),
    # so no host pad / phase-split transpose and no strided loads are needed.
    i = pl.program_id(1)
    nt = pl.num_programs(1)
    K = w_ref.shape[0]
    pad = K // 2
    _, TRo, Wo, C = o_ref.shape
    top = jnp.where(i > 0, xt_ref[0], jnp.zeros_like(xt_ref[0]))
    bot = jnp.where(i < nt - 1, xd_ref[0], jnp.zeros_like(xd_ref[0]))
    window = jnp.concatenate([top, xb_ref[0], bot], axis=0)   # (2*TRo+2*pad, Wo, 2C)
    Rw = window.shape[0]
    wv = w_ref[...]                                            # (K, K, C) f32
    acc = jnp.zeros((TRo, Wo, C), jnp.float32)
    for kw in range(K):
        d = kw - pad
        n2 = d % 2
        dqc = (d - n2) // 2
        ph = _shift_cols(window[:, :, n2 * C:(n2 + 1) * C], dqc)   # (Rw, Wo, C)
        phr = ph.reshape(Rw // 2, 2, Wo, C)                        # row-phase split
        for kh in range(K):
            patch = phr[kh // 2:kh // 2 + TRo, kh % 2]             # (TRo, Wo, C)
            acc = acc + patch.astype(jnp.float32) * wv[kh, kw].reshape(1, 1, C)
    acc = acc + bias_ref[...].reshape(1, 1, C)
    if relu:
        acc = jnp.maximum(acc, 0.0)
    o_ref[0] = acc.astype(o_ref.dtype)


# ---------------------------------------------------------------------------
# Wrappers (pallas_call plumbing)
# ---------------------------------------------------------------------------
def pointwise_conv_bn(x, w, bias, *, relu=False, out_dtype=None):
    """1x1 conv (BN folded into w) + bias (+ReLU).  x: (B, N, Cin) bf16."""
    B, N, Cin = x.shape
    Cout = w.shape[1]
    out_dtype = out_dtype or x.dtype
    cfg = _gen_config()
    TN = _pick_tile(N, cfg["tile_n"], 16)          # bf16 packs 2 rows per sublane
    grid = (B, N // TN)
    return pl.pallas_call(
        functools.partial(_pointwise_kernel, relu=relu),
        out_shape=jax.ShapeDtypeStruct((B, N, Cout), out_dtype),
        grid=grid,
        in_specs=[
            pl.BlockSpec((1, TN, Cin), lambda b, n: (b, n, 0)),
            pl.BlockSpec((Cin, Cout), lambda b, n: (0, 0)),
            pl.BlockSpec((1, Cout), lambda b, n: (0, 0)),
        ],
        out_specs=pl.BlockSpec((1, TN, Cout), lambda b, n: (b, n, 0)),
        compiler_params=_compiler_params(len(grid)),
    )(x, w, bias.reshape(1, Cout).astype(jnp.float32))


def depthwise_conv_bn_s1(x, w, bias, *, relu=True, out_dtype=None):
    """Depthwise KxK, stride 1, 'same' zero pad (in-kernel).  x: (B,H,W,C)."""
    B, H, W, C = x.shape
    K = w.shape[0]
    assert K % 2 == 1 and K >= 3, "odd kernel_size >= 3 expected"
    pad = K // 2
    assert H % pad == 0
    out_dtype = out_dtype or x.dtype
    cfg = _gen_config()
    TH = _pick_tile(H, _row_tile_target(cfg, W * C * 2), pad)
    nbt = TH // pad                                 # body rows per tile, halo units
    last = H // pad - 1
    grid = (B, H // TH)
    return pl.pallas_call(
        functools.partial(_dw_s1_kernel, relu=relu),
        out_shape=jax.ShapeDtypeStruct((B, H, W, C), out_dtype),
        grid=grid,
        in_specs=[
            # pad rows above the tile (clamped at the first tile, masked in-kernel)
            pl.BlockSpec((1, pad, W, C),
                         lambda b, i: (b, jnp.maximum(i * nbt - 1, 0), 0, 0)),
            # body rows
            pl.BlockSpec((1, TH, W, C), lambda b, i: (b, i, 0, 0)),
            # pad rows below the tile (clamped at the last tile, masked in-kernel)
            pl.BlockSpec((1, pad, W, C),
                         lambda b, i: (b, jnp.minimum((i + 1) * nbt, last), 0, 0)),
            pl.BlockSpec((K, K, C), lambda b, i: (0, 0, 0)),
            pl.BlockSpec((1, C), lambda b, i: (0, 0)),
        ],
        out_specs=pl.BlockSpec((1, TH, W, C), lambda b, i: (b, i, 0, 0)),
        compiler_params=_compiler_params(len(grid)),
    )(x, x, x, w, bias.reshape(1, C).astype(jnp.float32))


def depthwise_conv_bn_s2(x, w, bias, *, relu=True, out_dtype=None):
    """Depthwise KxK, stride 2, pad=K//2.  x: (B,H,W,C) with H, W even."""
    B, H, W, C = x.shape
    K = w.shape[0]
    assert K % 2 == 1 and K >= 3, "odd kernel_size >= 3 expected"
    assert H % 2 == 0 and W % 2 == 0
    pad = K // 2
    assert H % pad == 0
    Ho, Wo = H // 2, W // 2
    out_dtype = out_dtype or x.dtype
    xv = x.reshape(B, H, Wo, 2 * C)                 # free column-phase view
    cfg = _gen_config()
    mult = pad // math.gcd(2, pad)                  # keep 2*TRo a multiple of pad
    TRo = _pick_tile(Ho, _row_tile_target(cfg, 2 * W * C * 2), max(1, mult))
    nbt = (2 * TRo) // pad
    last = H // pad - 1
    grid = (B, Ho // TRo)
    return pl.pallas_call(
        functools.partial(_dw_s2_kernel, relu=relu),
        out_shape=jax.ShapeDtypeStruct((B, Ho, Wo, C), out_dtype),
        grid=grid,
        in_specs=[
            pl.BlockSpec((1, pad, Wo, 2 * C),
                         lambda b, i: (b, jnp.maximum(i * nbt - 1, 0), 0, 0)),
            pl.BlockSpec((1, 2 * TRo, Wo, 2 * C), lambda b, i: (b, i, 0, 0)),
            pl.BlockSpec((1, pad, Wo, 2 * C),
                         lambda b, i: (b, jnp.minimum((i + 1) * nbt, last), 0, 0)),
            pl.BlockSpec((K, K, C), lambda b, i: (0, 0, 0)),
            pl.BlockSpec((1, C), lambda b, i: (0, 0)),
        ],
        out_specs=pl.BlockSpec((1, TRo, Wo, C), lambda b, i: (b, i, 0, 0)),
        compiler_params=_compiler_params(len(grid)),
    )(xv, xv, xv, w, bias.reshape(1, C).astype(jnp.float32))


def fused_pw_linear_shortcut(h, s, w_pw, w_sd, bias, *, out_dtype):
    """out = pw_linear(space_to_depth(h)) + shortcut_1x1(s) + bias (fused).

    h: (B, H, W, hidden) dw output; the 2x2 space-to-depth is folded into a free
    reshape view (B, Ho, 2, Wo, 2*hidden) plus two phase matmuls in the kernel.
    """
    B, H, W, hidden = h.shape
    Ho, Wo = H // 2, W // 2
    Cs = s.shape[-1]
    Cout = w_pw.shape[-1]
    hv = h.reshape(B, Ho, 2, Wo, 2 * hidden)        # free view, no data movement
    cfg = _gen_config()
    TR = _pick_tile(Ho, _row_tile_target(cfg, 2 * W * hidden * 2), 1)
    grid = (B, Ho // TR)
    return pl.pallas_call(
        _fused_out_kernel,
        out_shape=jax.ShapeDtypeStruct((B, Ho, Wo, Cout), out_dtype),
        grid=grid,
        in_specs=[
            pl.BlockSpec((1, TR, 2, Wo, 2 * hidden), lambda b, r: (b, r, 0, 0, 0)),
            pl.BlockSpec((2, 2 * hidden, Cout), lambda b, r: (0, 0, 0)),
            pl.BlockSpec((1, TR, Wo, Cs), lambda b, r: (b, r, 0, 0)),
            pl.BlockSpec((Cs, Cout), lambda b, r: (0, 0)),
            pl.BlockSpec((1, Cout), lambda b, r: (0, 0)),
        ],
        out_specs=pl.BlockSpec((1, TR, Wo, Cout), lambda b, r: (b, r, 0, 0)),
        compiler_params=_compiler_params(len(grid)),
    )(hv, w_pw, s, w_sd, bias.reshape(1, Cout).astype(jnp.float32))


# ---------------------------------------------------------------------------
# Parameter init (deterministic, synthetic; BN folded) and CED forward
# ---------------------------------------------------------------------------
def fold_bn(gamma, beta, mean, var, eps=1e-6, conv_bias=None):
    # eps=1e-6 matches get_norm('bn_2d') in the reference module.
    scale = gamma / jnp.sqrt(var + eps)
    bias = beta - mean * scale
    if conv_bias is not None:
        bias = bias + conv_bias * scale
    return scale, bias


def init_ced_params(key, dim_in, dim_out, exp_ratio, kernel_size):
    """Synthetic CED parameters with eval-mode BatchNorm folded into the conv
    weights; matmul weights pre-cast to bf16 for the MXU."""
    hidden = int(dim_in * exp_ratio)
    split = hidden * 4
    ks = jax.random.split(key, 11)

    def bn(k, c):
        k1, k2, k3, k4 = jax.random.split(k, 4)
        gamma = jax.random.uniform(k1, (c,), minval=0.8, maxval=1.2)
        beta = 0.05 * jax.random.normal(k2, (c,))
        mean = 0.05 * jax.random.normal(k3, (c,))
        var = jax.random.uniform(k4, (c,), minval=0.5, maxval=1.5)
        return gamma, beta, mean, var

    p = {}
    # conv_1x1: 1x1 conv (dim_in -> hidden) + BN + ReLU
    w1 = 0.1 * jax.random.normal(ks[0], (dim_in, hidden))
    s1, b1 = fold_bn(*bn(ks[1], hidden))
    p["w1"] = (w1 * s1[None, :]).astype(jnp.bfloat16)
    p["b1"] = b1.astype(jnp.float32)

    # dw_conv: depthwise KxK (hidden) + BN + ReLU
    w_dw = 0.1 * jax.random.normal(ks[2], (kernel_size, kernel_size, hidden))
    s_dw, b_dw = fold_bn(*bn(ks[3], hidden))
    p["w_dw"] = (w_dw * s_dw[None, None, :]).astype(jnp.float32)
    p["b_dw"] = b_dw.astype(jnp.float32)

    # pw_linear: 1x1 conv (split -> dim_out) + BN, no act.  Rows of the PyTorch
    # weight are indexed by the space-to-depth channel (d, n1, n2); repack to
    # [n1][n2*hidden + d] to match the in-kernel phase matmuls (identical output).
    w_pw = 0.1 * jax.random.normal(ks[4], (split, dim_out))
    s_pw, b_pw = fold_bn(*bn(ks[5], dim_out))
    w_pw = (w_pw * s_pw[None, :]).reshape(hidden, 2, 2, dim_out)   # (d, n1, n2, co)
    w_pw = w_pw.transpose(1, 2, 0, 3).reshape(2, 2 * hidden, dim_out)
    p["w_pw"] = w_pw.astype(jnp.bfloat16)

    # conv_down_sample (dim_in != dim_out branch):
    #   depthwise KxK stride-2 + BN + ReLU, then 1x1 (bias=True) + BN, no act
    # TODO(synk): the dim_in == dim_out variant (single dw, no act) is not wired up.
    w_sd_dw = 0.1 * jax.random.normal(ks[6], (kernel_size, kernel_size, dim_in))
    s_sd_dw, b_sd_dw = fold_bn(*bn(ks[7], dim_in))
    p["w_sd_dw"] = (w_sd_dw * s_sd_dw[None, None, :]).astype(jnp.float32)
    p["b_sd_dw"] = b_sd_dw.astype(jnp.float32)

    w_sd_pw = 0.1 * jax.random.normal(ks[8], (dim_in, dim_out))
    sd_pw_conv_bias = 0.1 * jax.random.normal(ks[9], (dim_out,))
    s_sd_pw, b_sd_pw = fold_bn(*bn(ks[10], dim_out), conv_bias=sd_pw_conv_bias)
    p["w_sd_pw"] = (w_sd_pw * s_sd_pw[None, :]).astype(jnp.bfloat16)

    # pw_linear bias and shortcut-1x1(+BN) bias are applied in the fused kernel.
    p["b_out"] = (b_pw + b_sd_pw).astype(jnp.float32)
    return p, hidden, split


def ced_forward(x_nchw, params):
    """CED forward (inference).  x_nchw: (B, Cin, H, W) with even H, W."""
    # NCHW -> NHWC once at the boundary; activations carried as bf16.
    x = jnp.transpose(x_nchw, (0, 2, 3, 1)).astype(jnp.bfloat16)
    B, H, W, Cin = x.shape
    hidden = params["w1"].shape[1]

    # conv_1x1: 1x1 conv + BN + ReLU  (N-tiled bf16 MXU matmul)
    # TODO(synk): could be fused into the dw kernel below (recompute halo rows)
    # to save one more HBM round trip of the (B, H, W, hidden) tensor.
    h = pointwise_conv_bn(x.reshape(B, H * W, Cin), params["w1"], params["b1"],
                          relu=True, out_dtype=jnp.bfloat16)
    h = h.reshape(B, H, W, hidden)

    # dw_conv: depthwise KxK, stride 1, BN + ReLU (halo BlockSpecs, no jnp.pad)
    h = depthwise_conv_bn_s1(h, params["w_dw"], params["b_dw"], relu=True,
                             out_dtype=jnp.bfloat16)

    # Shortcut branch: depthwise stride-2 + BN + ReLU (row-tiled, no phase split)
    s = depthwise_conv_bn_s2(x, params["w_sd_dw"], params["b_sd_dw"], relu=True,
                             out_dtype=jnp.bfloat16)

    # channel_attn = Identity; DropPath = Identity.
    # pw_linear(space-to-depth(h)) + shortcut 1x1(+bias)+BN + residual add,
    # fused into one kernel; the 2x2 rearrange is a free reshape view.
    y = fused_pw_linear_shortcut(h, s, params["w_pw"], params["w_sd_pw"],
                                 params["b_out"], out_dtype=jnp.bfloat16)

    # Back to NCHW to match the PyTorch output convention.
    return jnp.transpose(y, (0, 3, 1, 2)).astype(jnp.float32)


if __name__ == "__main__":
    key = jax.random.PRNGKey(0)
    k_x, k_p = jax.random.split(key)

    B, dim_in, dim_out, H, W = 2, 4, 8, 16, 16
    exp_ratio, kernel_size = 2.0, 3

    x = jax.random.normal(k_x, (B, dim_in, H, W), dtype=jnp.float32)
    params, hidden, split = init_ced_params(k_p, dim_in, dim_out,
                                            exp_ratio, kernel_size)

    fwd = jax.jit(ced_forward)
    out = jax.block_until_ready(fwd(x, params))

    assert out.shape == (B, dim_out, H // 2, W // 2), out.shape
    assert bool(jnp.all(jnp.isfinite(out)))
    print("KERNEL_OK")
</pallas_src>

<mosaic_0001>
module attributes {stable_mosaic.version = 11 : i64} {
  func.func @_dw_s1_kernel(%arg0: i32, %arg1: i32, %arg2: memref<1x1x16x8xbf16, #tpu.memory_space<vmem>>, %arg3: memref<1x16x16x8xbf16, #tpu.memory_space<vmem>>, %arg4: memref<1x1x16x8xbf16, #tpu.memory_space<vmem>>, %arg5: memref<3x3x8xf32, #tpu.memory_space<vmem>>, %arg6: memref<1x8xf32, #tpu.memory_space<vmem>>, %arg7: memref<1x16x16x8xbf16, #tpu.memory_space<vmem>>) attributes {dimension_semantics = [#tpu.dimension_semantics<parallel>, #tpu.dimension_semantics<parallel>], iteration_bounds = array<i64: 2, 1>, scalar_prefetch = 0 : i64, scratch_operands = 0 : i64, tpu.core_type = #tpu.core_type<tc>, window_params = [{transform_indices = @transform_0, window_bounds = array<i64: 1, 1, 16, 8>}, {transform_indices = @transform_1, window_bounds = array<i64: 1, 16, 16, 8>}, {transform_indices = @transform_2, window_bounds = array<i64: 1, 1, 16, 8>}, {pipeline_mode = #tpu.pipeline_mode<synchronous>, transform_indices = @transform_3, window_bounds = array<i64: 3, 3, 8>}, {pipeline_mode = #tpu.pipeline_mode<synchronous>, transform_indices = @transform_4, window_bounds = array<i64: 1, 8>}, {transform_indices = @transform_5, window_bounds = array<i64: 1, 16, 16, 8>}]} {
    %c0_i32 = arith.constant 0 : i32
    %0 = arith.cmpi sgt, %arg1, %c0_i32 : i32
    %c0 = arith.constant 0 : index
    %c0_0 = arith.constant 0 : index
    %c0_1 = arith.constant 0 : index
    %c0_2 = arith.constant 0 : index
    %1 = vector.load %arg2[%c0, %c0_0, %c0_1, %c0_2] : memref<1x1x16x8xbf16, #tpu.memory_space<vmem>>, vector<1x1x16x8xbf16>
    %2 = vector.shape_cast %1 : vector<1x1x16x8xbf16> to vector<1x16x8xbf16>
    %cst = arith.constant 0.000000e+00 : bf16
    %3 = vector.broadcast %cst : bf16 to vector<1x16x8xbf16>
    %4 = arith.select %0, %2, %3 : vector<1x16x8xbf16>
    %c0_i32_3 = arith.constant 0 : i32
    %5 = arith.cmpi slt, %arg1, %c0_i32_3 : i32
    %c0_4 = arith.constant 0 : index
    %c0_5 = arith.constant 0 : index
    %c0_6 = arith.constant 0 : index
    %c0_7 = arith.constant 0 : index
    %6 = vector.load %arg4[%c0_4, %c0_5, %c0_6, %c0_7] : memref<1x1x16x8xbf16, #tpu.memory_space<vmem>>, vector<1x1x16x8xbf16>
    %7 = vector.shape_cast %6 : vector<1x1x16x8xbf16> to vector<1x16x8xbf16>
    %cst_8 = arith.constant 0.000000e+00 : bf16
    %8 = vector.broadcast %cst_8 : bf16 to vector<1x16x8xbf16>
    %9 = arith.select %5, %7, %8 : vector<1x16x8xbf16>
    %c0_9 = arith.constant 0 : index
    %c0_10 = arith.constant 0 : index
    %c0_11 = arith.constant 0 : index
    %c0_12 = arith.constant 0 : index
    %10 = vector.load %arg3[%c0_9, %c0_10, %c0_11, %c0_12] : memref<1x16x16x8xbf16, #tpu.memory_space<vmem>>, vector<1x16x16x8xbf16>
    %11 = vector.shape_cast %10 : vector<1x16x16x8xbf16> to vector<16x16x8xbf16>
    %12 = tpu.concatenate %4, %11, %9 in 0 : vector<1x16x8xbf16>, vector<16x16x8xbf16>, vector<1x16x8xbf16> -> vector<18x16x8xbf16>
    %c0_13 = arith.constant 0 : index
    %c0_14 = arith.constant 0 : index
    %c0_15 = arith.constant 0 : index
    %13 = vector.load %arg5[%c0_13, %c0_14, %c0_15] : memref<3x3x8xf32, #tpu.memory_space<vmem>>, vector<3x3x8xf32>
    %cst_16 = arith.constant 0.000000e+00 : f32
    %14 = vector.broadcast %cst_16 : f32 to vector<16x16x8xf32>
    %cst_17 = arith.constant 0.000000e+00 : bf16
    %15 = vector.broadcast %cst_17 : bf16 to vector<18x1x8xbf16>
    %16 = vector.extract_strided_slice %12 {offsets = [0, 0, 0], sizes = [18, 15, 8], strides = [1, 1, 1]} : vector<18x16x8xbf16> to vector<18x15x8xbf16>
    %17 = tpu.concatenate %15, %16 in 1 : vector<18x1x8xbf16>, vector<18x15x8xbf16> -> vector<18x16x8xbf16>
    %18 = vector.extract_strided_slice %17 {offsets = [0, 0, 0], sizes = [16, 16, 8], strides = [1, 1, 1]} : vector<18x16x8xbf16> to vector<16x16x8xbf16>
    %19 = arith.extf %18 : vector<16x16x8xbf16> to vector<16x16x8xf32>
    %20 = vector.extract_strided_slice %13 {offsets = [0, 0, 0], sizes = [1, 1, 8], strides = [1, 1, 1]} : vector<3x3x8xf32> to vector<1x1x8xf32>
    %21 = vector.shape_cast %20 : vector<1x1x8xf32> to vector<8xf32>
    %22 = vector.shape_cast %21 : vector<8xf32> to vector<1x1x8xf32>
    %23 = vector.broadcast %22 : vector<1x1x8xf32> to vector<16x16x8xf32>
    %24 = arith.mulf %19, %23 : vector<16x16x8xf32>
    %25 = arith.addf %14, %24 : vector<16x16x8xf32>
    %26 = vector.extract_strided_slice %17 {offsets = [1, 0, 0], sizes = [16, 16, 8], strides = [1, 1, 1]} : vector<18x16x8xbf16> to vector<16x16x8xbf16>
    %27 = arith.extf %26 : vector<16x16x8xbf16> to vector<16x16x8xf32>
    %28 = vector.extract_strided_slice %13 {offsets = [1, 0, 0], sizes = [1, 1, 8], strides = [1, 1, 1]} : vector<3x3x8xf32> to vector<1x1x8xf32>
    %29 = vector.shape_cast %28 : vector<1x1x8xf32> to vector<8xf32>
    %30 = vector.shape_cast %29 : vector<8xf32> to vector<1x1x8xf32>
    %31 = vector.broadcast %30 : vector<1x1x8xf32> to vector<16x16x8xf32>
    %32 = arith.mulf %27, %31 : vector<16x16x8xf32>
    %33 = arith.addf %25, %32 : vector<16x16x8xf32>
    %34 = vector.extract_strided_slice %17 {offsets = [2, 0, 0], sizes = [16, 16, 8], strides = [1, 1, 1]} : vector<18x16x8xbf16> to vector<16x16x8xbf16>
    %35 = arith.extf %34 : vector<16x16x8xbf16> to vector<16x16x8xf32>
    %36 = vector.extract_strided_slice %13 {offsets = [2, 0, 0], sizes = [1, 1, 8], strides = [1, 1, 1]} : vector<3x3x8xf32> to vector<1x1x8xf32>
    %37 = vector.shape_cast %36 : vector<1x1x8xf32> to vector<8xf32>
    %38 = vector.shape_cast %37 : vector<8xf32> to vector<1x1x8xf32>
    %39 = vector.broadcast %38 : vector<1x1x8xf32> to vector<16x16x8xf32>
    %40 = arith.mulf %35, %39 : vector<16x16x8xf32>
    %41 = arith.addf %33, %40 : vector<16x16x8xf32>
    %42 = vector.extract_strided_slice %12 {offsets = [0, 0, 0], sizes = [16, 16, 8], strides = [1, 1, 1]} : vector<18x16x8xbf16> to vector<16x16x8xbf16>
    %43 = arith.extf %42 : vector<16x16x8xbf16> to vector<16x16x8xf32>
    %44 = vector.extract_strided_slice %13 {offsets = [0, 1, 0], sizes = [1, 1, 8], strides = [1, 1, 1]} : vector<3x3x8xf32> to vector<1x1x8xf32>
    %45 = vector.shape_cast %44 : vector<1x1x8xf32> to vector<8xf32>
    %46 = vector.shape_cast %45 : vector<8xf32> to vector<1x1x8xf32>
    %47 = vector.broadcast %46 : vector<1x1x8xf32> to vector<16x16x8xf32>
    %48 = arith.mulf %43, %47 : vector<16x16x8xf32>
    %49 = arith.addf %41, %48 : vector<16x16x8xf32>
    %50 = vector.extract_strided_slice %12 {offsets = [1, 0, 0], sizes = [16, 16, 8], strides = [1, 1, 1]} : vector<18x16x8xbf16> to vector<16x16x8xbf16>
    %51 = arith.extf %50 : vector<16x16x8xbf16> to vector<16x16x8xf32>
    %52 = vector.extract_strided_slice %13 {offsets = [1, 1, 0], sizes = [1, 1, 8], strides = [1, 1, 1]} : vector<3x3x8xf32> to vector<1x1x8xf32>
    %53 = vector.shape_cast %52 : vector<1x1x8xf32> to vector<8xf32>
    %54 = vector.shape_cast %53 : vector<8xf32> to vector<1x1x8xf32>
    %55 = vector.broadcast %54 : vector<1x1x8xf32> to vector<16x16x8xf32>
    %56 = arith.mulf %51, %55 : vector<16x16x8xf32>
    %57 = arith.addf %49, %56 : vector<16x16x8xf32>
    %58 = vector.extract_strided_slice %12 {offsets = [2, 0, 0], sizes = [16, 16, 8], strides = [1, 1, 1]} : vector<18x16x8xbf16> to vector<16x16x8xbf16>
    %59 = arith.extf %58 : vector<16x16x8xbf16> to vector<16x16x8xf32>
    %60 = vector.extract_strided_slice %13 {offsets = [2, 1, 0], sizes = [1, 1, 8], strides = [1, 1, 1]} : vector<3x3x8xf32> to vector<1x1x8xf32>
    %61 = vector.shape_cast %60 : vector<1x1x8xf32> to vector<8xf32>
    %62 = vector.shape_cast %61 : vector<8xf32> to vector<1x1x8xf32>
    %63 = vector.broadcast %62 : vector<1x1x8xf32> to vector<16x16x8xf32>
    %64 = arith.mulf %59, %63 : vector<16x16x8xf32>
    %65 = arith.addf %57, %64 : vector<16x16x8xf32>
    %66 = vector.extract_strided_slice %12 {offsets = [0, 1, 0], sizes = [18, 15, 8], strides = [1, 1, 1]} : vector<18x16x8xbf16> to vector<18x15x8xbf16>
    %cst_18 = arith.constant 0.000000e+00 : bf16
    %67 = vector.broadcast %cst_18 : bf16 to vector<18x1x8xbf16>
    %68 = tpu.concatenate %66, %67 in 1 : vector<18x15x8xbf16>, vector<18x1x8xbf16> -> vector<18x16x8xbf16>
    %69 = vector.extract_strided_slice %68 {offsets = [0, 0, 0], sizes = [16, 16, 8], strides = [1, 1, 1]} : vector<18x16x8xbf16> to vector<16x16x8xbf16>
    %70 = arith.extf %69 : vector<16x16x8xbf16> to vector<16x16x8xf32>
    %71 = vector.extract_strided_slice %13 {offsets = [0, 2, 0], sizes = [1, 1, 8], strides = [1, 1, 1]} : vector<3x3x8xf32> to vector<1x1x8xf32>
    %72 = vector.shape_cast %71 : vector<1x1x8xf32> to vector<8xf32>
    %73 = vector.shape_cast %72 : vector<8xf32> to vector<1x1x8xf32>
    %74 = vector.broadcast %73 : vector<1x1x8xf32> to vector<16x16x8xf32>
    %75 = arith.mulf %70, %74 : vector<16x16x8xf32>
    %76 = arith.addf %65, %75 : vector<16x16x8xf32>
    %77 = vector.extract_strided_slice %68 {offsets = [1, 0, 0], sizes = [16, 16, 8], strides = [1, 1, 1]} : vector<18x16x8xbf16> to vector<16x16x8xbf16>
    %78 = arith.extf %77 : vector<16x16x8xbf16> to vector<16x16x8xf32>
    %79 = vector.extract_strided_slice %13 {offsets = [1, 2, 0], sizes = [1, 1, 8], strides = [1, 1, 1]} : vector<3x3x8xf32> to vector<1x1x8xf32>
    %80 = vector.shape_cast %79 : vector<1x1x8xf32> to vector<8xf32>
    %81 = vector.shape_cast %80 : vector<8xf32> to vector<1x1x8xf32>
    %82 = vector.broadcast %81 : vector<1x1x8xf32> to vector<16x16x8xf32>
    %83 = arith.mulf %78, %82 : vector<16x16x8xf32>
    %84 = arith.addf %76, %83 : vector<16x16x8xf32>
    %85 = vector.extract_strided_slice %68 {offsets = [2, 0, 0], sizes = [16, 16, 8], strides = [1, 1, 1]} : vector<18x16x8xbf16> to vector<16x16x8xbf16>
    %86 = arith.extf %85 : vector<16x16x8xbf16> to vector<16x16x8xf32>
    %87 = vector.extract_strided_slice %13 {offsets = [2, 2, 0], sizes = [1, 1, 8], strides = [1, 1, 1]} : vector<3x3x8xf32> to vector<1x1x8xf32>
    %88 = vector.shape_cast %87 : vector<1x1x8xf32> to vector<8xf32>
    %89 = vector.shape_cast %88 : vector<8xf32> to vector<1x1x8xf32>
    %90 = vector.broadcast %89 : vector<1x1x8xf32> to vector<16x16x8xf32>
    %91 = arith.mulf %86, %90 : vector<16x16x8xf32>
    %92 = arith.addf %84, %91 : vector<16x16x8xf32>
    %c0_19 = arith.constant 0 : index
    %c0_20 = arith.constant 0 : index
    %93 = vector.load %arg6[%c0_19, %c0_20] : memref<1x8xf32, #tpu.memory_space<vmem>>, vector<1x8xf32>
    %94 = vector.shape_cast %93 : vector<1x8xf32> to vector<1x1x8xf32>
    %95 = vector.broadcast %94 : vector<1x1x8xf32> to vector<16x16x8xf32>
    %96 = arith.addf %92, %95 : vector<16x16x8xf32>
    %cst_21 = arith.constant 0.000000e+00 : f32
    %97 = vector.broadcast %cst_21 : f32 to vector<16x16x8xf32>
    %98 = arith.maximumf %96, %97 : vector<16x16x8xf32>
    %99 = arith.truncf %98 : vector<16x16x8xf32> to vector<16x16x8xbf16>
    %c0_22 = arith.constant 0 : index
    %c0_23 = arith.constant 0 : index
    %c0_24 = arith.constant 0 : index
    %c0_25 = arith.constant 0 : index
    %100 = vector.load %arg7[%c0_22, %c0_23, %c0_24, %c0_25] : memref<1x16x16x8xbf16, #tpu.memory_space<vmem>>, vector<1x16x16x8xbf16>
    %101 = vector.shape_cast %100 : vector<1x16x16x8xbf16> to vector<16x16x8xbf16>
    %102 = vector.shape_cast %99 : vector<16x16x8xbf16> to vector<1x16x16x8xbf16>
    tpu.vector_store %arg7[%c0_22, %c0_23, %c0_24, %c0_25], %102 {strides = array<i32>} : memref<1x16x16x8xbf16, #tpu.memory_space<vmem>>, vector<1x16x16x8xbf16>,
    return
  }
  func.func @transform_0(%arg0: i32, %arg1: i32) -> (i32, i32, i32, i32) {
    %c16_i32 = arith.constant 16 : i32
    %0 = arith.muli %arg1, %c16_i32 : i32
    %c1_i32 = arith.constant 1 : i32
    %1 = arith.subi %0, %c1_i32 : i32
    %c0_i32 = arith.constant 0 : i32
    %2 = arith.maxsi %1, %c0_i32 : i32
    %c0_i32_0 = arith.constant 0 : i32
    %c0_i32_1 = arith.constant 0 : i32
    %c0_i32_2 = arith.constant 0 : i32
    return %arg0, %2, %c0_i32_0, %c0_i32_1 : i32, i32, i32, i32
  }
  func.func @transform_1(%arg0: i32, %arg1: i32) -> (i32, i32, i32, i32) {
    %c0_i32 = arith.constant 0 : i32
    %c0_i32_0 = arith.constant 0 : i32
    %c0_i32_1 = arith.constant 0 : i32
    return %arg0, %arg1, %c0_i32, %c0_i32_0 : i32, i32, i32, i32
  }
  func.func @transform_2(%arg0: i32, %arg1: i32) -> (i32, i32, i32, i32) {
    %c1_i32 = arith.constant 1 : i32
    %0 = arith.addi %arg1, %c1_i32 : i32
    %c16_i32 = arith.constant 16 : i32
    %1 = arith.muli %0, %c16_i32 : i32
    %c15_i32 = arith.constant 15 : i32
    %2 = arith.minsi %1, %c15_i32 : i32
    %c0_i32 = arith.constant 0 : i32
    %c0_i32_0 = arith.constant 0 : i32
    %c0_i32_1 = arith.constant 0 : i32
    return %arg0, %2, %c0_i32, %c0_i32_0 : i32, i32, i32, i32
  }
  func.func @transform_3(%arg0: i32, %arg1: i32) -> (i32, i32, i32) {
    %c0_i32 = arith.constant 0 : i32
    %c0_i32_0 = arith.constant 0 : i32
    %c0_i32_1 = arith.constant 0 : i32
    %c0_i32_2 = arith.constant 0 : i32
    return %c0_i32, %c0_i32_0, %c0_i32_1 : i32, i32, i32
  }
  func.func @transform_4(%arg0: i32, %arg1: i32) -> (i32, i32) {
    %c0_i32 = arith.constant 0 : i32
    %c0_i32_0 = arith.constant 0 : i32
    %c0_i32_1 = arith.constant 0 : i32
    return %c0_i32, %c0_i32_0 : i32, i32
  }
  func.func @transform_5(%arg0: i32, %arg1: i32) -> (i32, i32, i32, i32) {
    %c0_i32 = arith.constant 0 : i32
    %c0_i32_0 = arith.constant 0 : i32
    %c0_i32_1 = arith.constant 0 : i32
    return %arg0, %arg1, %c0_i32, %c0_i32_0 : i32, i32, i32, i32
  }
}

module attributes {stable_mosaic.version = 11 : i64} {
  func.func @_pointwise_kernel(%arg0: i32, %arg1: i32, %arg2: memref<1x256x4xbf16, #tpu.memory_space<vmem>>, %arg3: memref<4x8xbf16, #tpu.memory_space<vmem>>, %arg4: memref<1x8xf32, #tpu.memory_space<vmem>>, %arg5: memref<1x256x8xbf16, #tpu.memory_space<vmem>>) attributes {dimension_semantics = [#tpu.dimension_semantics<parallel>, #tpu.dimension_semantics<parallel>], iteration_bounds = array<i64: 2, 1>, scalar_prefetch = 0 : i64, scratch_operands = 0 : i64, tpu.core_type = #tpu.core_type<tc>, window_params = [{transform_indices = @transform_0, window_bounds = array<i64: 1, 256, 4>}, {pipeline_mode = #tpu.pipeline_mode<synchronous>, transform_indices = @transform_1, window_bounds = array<i64: 4, 8>}, {pipeline_mode = #tpu.pipeline_mode<synchronous>, transform_indices = @transform_2, window_bounds = array<i64: 1, 8>}, {transform_indices = @transform_3, window_bounds = array<i64: 1, 256, 8>}]} {
    %c0 = arith.constant 0 : index
    %c0_0 = arith.constant 0 : index
    %c0_1 = arith.constant 0 : index
    %0 = vector.load %arg2[%c0, %c0_0, %c0_1] : memref<1x256x4xbf16, #tpu.memory_space<vmem>>, vector<1x256x4xbf16>
    %1 = vector.shape_cast %0 : vector<1x256x4xbf16> to vector<256x4xbf16>
    %c0_2 = arith.constant 0 : index
    %c0_3 = arith.constant 0 : index
    %2 = vector.load %arg3[%c0_2, %c0_3] : memref<4x8xbf16, #tpu.memory_space<vmem>>, vector<4x8xbf16>
    %cst = arith.constant dense<0.000000e+00> : vector<256x8xf32>
    %3 = tpu.matmul %1, %2, %cst {dimension_numbers = #tpu.dot_dimension_numbers<[1], [0], [0], [1], [0, 0, 1, 1], [], []>} : vector<256x4xbf16>, vector<4x8xbf16>, vector<256x8xf32> -> vector<256x8xf32>
    %c0_4 = arith.constant 0 : index
    %c0_5 = arith.constant 0 : index
    %4 = vector.load %arg4[%c0_4, %c0_5] : memref<1x8xf32, #tpu.memory_space<vmem>>, vector<1x8xf32>
    %5 = vector.broadcast %4 : vector<1x8xf32> to vector<256x8xf32>
    %6 = arith.addf %3, %5 : vector<256x8xf32>
    %cst_6 = arith.constant 0.000000e+00 : f32
    %7 = vector.broadcast %cst_6 : f32 to vector<256x8xf32>
    %8 = arith.maximumf %6, %7 : vector<256x8xf32>
    %9 = arith.truncf %8 : vector<256x8xf32> to vector<256x8xbf16>
    %c0_7 = arith.constant 0 : index
    %c0_8 = arith.constant 0 : index
    %c0_9 = arith.constant 0 : index
    %10 = vector.load %arg5[%c0_7, %c0_8, %c0_9] : memref<1x256x8xbf16, #tpu.memory_space<vmem>>, vector<1x256x8xbf16>
    %11 = vector.shape_cast %10 : vector<1x256x8xbf16> to vector<256x8xbf16>
    %12 = vector.shape_cast %9 : vector<256x8xbf16> to vector<1x256x8xbf16>
    tpu.vector_store %arg5[%c0_7, %c0_8, %c0_9], %12 {strides = array<i32>} : memref<1x256x8xbf16, #tpu.memory_space<vmem>>, vector<1x256x8xbf16>,
    return
  }
  func.func @transform_0(%arg0: i32, %arg1: i32) -> (i32, i32, i32) {
    %c0_i32 = arith.constant 0 : i32
    %c0_i32_0 = arith.constant 0 : i32
    return %arg0, %arg1, %c0_i32 : i32, i32, i32
  }
  func.func @transform_1(%arg0: i32, %arg1: i32) -> (i32, i32) {
    %c0_i32 = arith.constant 0 : i32
    %c0_i32_0 = arith.constant 0 : i32
    %c0_i32_1 = arith.constant 0 : i32
    return %c0_i32, %c0_i32_0 : i32, i32
  }
  func.func @transform_2(%arg0: i32, %arg1: i32) -> (i32, i32) {
    %c0_i32 = arith.constant 0 : i32
    %c0_i32_0 = arith.constant 0 : i32
    %c0_i32_1 = arith.constant 0 : i32
    return %c0_i32, %c0_i32_0 : i32, i32
  }
  func.func @transform_3(%arg0: i32, %arg1: i32) -> (i32, i32, i32) {
    %c0_i32 = arith.constant 0 : i32
    %c0_i32_0 = arith.constant 0 : i32
    return %arg0, %arg1, %c0_i32 : i32, i32, i32
  }
}

module attributes {stable_mosaic.version = 11 : i64} {
  func.func @_dw_s2_kernel(%arg0: i32, %arg1: i32, %arg2: memref<1x1x8x8xbf16, #tpu.memory_space<vmem>>, %arg3: memref<1x16x8x8xbf16, #tpu.memory_space<vmem>>, %arg4: memref<1x1x8x8xbf16, #tpu.memory_space<vmem>>, %arg5: memref<3x3x4xf32, #tpu.memory_space<vmem>>, %arg6: memref<1x4xf32, #tpu.memory_space<vmem>>, %arg7: memref<1x8x8x4xbf16, #tpu.memory_space<vmem>>) attributes {dimension_semantics = [#tpu.dimension_semantics<parallel>, #tpu.dimension_semantics<parallel>], iteration_bounds = array<i64: 2, 1>, scalar_prefetch = 0 : i64, scratch_operands = 0 : i64, tpu.core_type = #tpu.core_type<tc>, window_params = [{transform_indices = @transform_0, window_bounds = array<i64: 1, 1, 8, 8>}, {transform_indices = @transform_1, window_bounds = array<i64: 1, 16, 8, 8>}, {transform_indices = @transform_2, window_bounds = array<i64: 1, 1, 8, 8>}, {pipeline_mode = #tpu.pipeline_mode<synchronous>, transform_indices = @transform_3, window_bounds = array<i64: 3, 3, 4>}, {pipeline_mode = #tpu.pipeline_mode<synchronous>, transform_indices = @transform_4, window_bounds = array<i64: 1, 4>}, {transform_indices = @transform_5, window_bounds = array<i64: 1, 8, 8, 4>}]} {
    %c0_i32 = arith.constant 0 : i32
    %0 = arith.cmpi sgt, %arg1, %c0_i32 : i32
    %c0 = arith.constant 0 : index
    %c0_0 = arith.constant 0 : index
    %c0_1 = arith.constant 0 : index
    %c0_2 = arith.constant 0 : index
    %1 = vector.load %arg2[%c0, %c0_0, %c0_1, %c0_2] : memref<1x1x8x8xbf16, #tpu.memory_space<vmem>>, vector<1x1x8x8xbf16>
    %2 = vector.shape_cast %1 : vector<1x1x8x8xbf16> to vector<1x8x8xbf16>
    %cst = arith.constant 0.000000e+00 : bf16
    %3 = vector.broadcast %cst : bf16 to vector<1x8x8xbf16>
    %4 = arith.select %0, %2, %3 : vector<1x8x8xbf16>
    %c0_i32_3 = arith.constant 0 : i32
    %5 = arith.cmpi slt, %arg1, %c0_i32_3 : i32
    %c0_4 = arith.constant 0 : index
    %c0_5 = arith.constant 0 : index
    %c0_6 = arith.constant 0 : index
    %c0_7 = arith.constant 0 : index
    %6 = vector.load %arg4[%c0_4, %c0_5, %c0_6, %c0_7] : memref<1x1x8x8xbf16, #tpu.memory_space<vmem>>, vector<1x1x8x8xbf16>
    %7 = vector.shape_cast %6 : vector<1x1x8x8xbf16> to vector<1x8x8xbf16>
    %cst_8 = arith.constant 0.000000e+00 : bf16
    %8 = vector.broadcast %cst_8 : bf16 to vector<1x8x8xbf16>
    %9 = arith.select %5, %7, %8 : vector<1x8x8xbf16>
    %c0_9 = arith.constant 0 : index
    %c0_10 = arith.constant 0 : index
    %c0_11 = arith.constant 0 : index
    %c0_12 = arith.constant 0 : index
    %10 = vector.load %arg3[%c0_9, %c0_10, %c0_11, %c0_12] : memref<1x16x8x8xbf16, #tpu.memory_space<vmem>>, vector<1x16x8x8xbf16>
    %11 = vector.shape_cast %10 : vector<1x16x8x8xbf16> to vector<16x8x8xbf16>
    %12 = tpu.concatenate %4, %11, %9 in 0 : vector<1x8x8xbf16>, vector<16x8x8xbf16>, vector<1x8x8xbf16> -> vector<18x8x8xbf16>
    %c0_13 = arith.constant 0 : index
    %c0_14 = arith.constant 0 : index
    %c0_15 = arith.constant 0 : index
    %13 = vector.load %arg5[%c0_13, %c0_14, %c0_15] : memref<3x3x4xf32, #tpu.memory_space<vmem>>, vector<3x3x4xf32>
    %cst_16 = arith.constant 0.000000e+00 : f32
    %14 = vector.broadcast %cst_16 : f32 to vector<8x8x4xf32>
    %15 = vector.extract_strided_slice %12 {offsets = [0, 0, 4], sizes = [18, 8, 4], strides = [1, 1, 1]} : vector<18x8x8xbf16> to vector<18x8x4xbf16>
    %cst_17 = arith.constant 0.000000e+00 : bf16
    %16 = vector.broadcast %cst_17 : bf16 to vector<18x1x4xbf16>
    %17 = vector.extract_strided_slice %15 {offsets = [0, 0, 0], sizes = [18, 7, 4], strides = [1, 1, 1]} : vector<18x8x4xbf16> to vector<18x7x4xbf16>
    %18 = tpu.concatenate %16, %17 in 1 : vector<18x1x4xbf16>, vector<18x7x4xbf16> -> vector<18x8x4xbf16>
    %19 = vector.shape_cast %18 : vector<18x8x4xbf16> to vector<9x2x8x4xbf16>
    %20 = vector.extract_strided_slice %19 {offsets = [0, 0, 0, 0], sizes = [8, 1, 8, 4], strides = [1, 1, 1, 1]} : vector<9x2x8x4xbf16> to vector<8x1x8x4xbf16>
    %21 = vector.shape_cast %20 : vector<8x1x8x4xbf16> to vector<8x8x4xbf16>
    %22 = arith.extf %21 : vector<8x8x4xbf16> to vector<8x8x4xf32>
    %23 = vector.extract_strided_slice %13 {offsets = [0, 0, 0], sizes = [1, 1, 4], strides = [1, 1, 1]} : vector<3x3x4xf32> to vector<1x1x4xf32>
    %24 = vector.shape_cast %23 : vector<1x1x4xf32> to vector<4xf32>
    %25 = vector.shape_cast %24 : vector<4xf32> to vector<1x1x4xf32>
    %26 = vector.broadcast %25 : vector<1x1x4xf32> to vector<8x8x4xf32>
    %27 = arith.mulf %22, %26 : vector<8x8x4xf32>
    %28 = arith.addf %14, %27 : vector<8x8x4xf32>
    %29 = vector.extract_strided_slice %19 {offsets = [0, 1, 0, 0], sizes = [8, 1, 8, 4], strides = [1, 1, 1, 1]} : vector<9x2x8x4xbf16> to vector<8x1x8x4xbf16>
    %30 = vector.shape_cast %29 : vector<8x1x8x4xbf16> to vector<8x8x4xbf16>
    %31 = arith.extf %30 : vector<8x8x4xbf16> to vector<8x8x4xf32>
    %32 = vector.extract_strided_slice %13 {offsets = [1, 0, 0], sizes = [1, 1, 4], strides = [1, 1, 1]} : vector<3x3x4xf32> to vector<1x1x4xf32>
    %33 = vector.shape_cast %32 : vector<1x1x4xf32> to vector<4xf32>
    %34 = vector.shape_cast %33 : vector<4xf32> to vector<1x1x4xf32>
    %35 = vector.broadcast %34 : vector<1x1x4xf32> to vector<8x8x4xf32>
    %36 = arith.mulf %31, %35 : vector<8x8x4xf32>
    %37 = arith.addf %28, %36 : vector<8x8x4xf32>
    %38 = vector.extract_strided_slice %19 {offsets = [1, 0, 0, 0], sizes = [8, 1, 8, 4], strides = [1, 1, 1, 1]} : vector<9x2x8x4xbf16> to vector<8x1x8x4xbf16>
    %39 = vector.shape_cast %38 : vector<8x1x8x4xbf16> to vector<8x8x4xbf16>
    %40 = arith.extf %39 : vector<8x8x4xbf16> to vector<8x8x4xf32>
    %41 = vector.extract_strided_slice %13 {offsets = [2, 0, 0], sizes = [1, 1, 4], strides = [1, 1, 1]} : vector<3x3x4xf32> to vector<1x1x4xf32>
    %42 = vector.shape_cast %41 : vector<1x1x4xf32> to vector<4xf32>
    %43 = vector.shape_cast %42 : vector<4xf32> to vector<1x1x4xf32>
    %44 = vector.broadcast %43 : vector<1x1x4xf32> to vector<8x8x4xf32>
    %45 = arith.mulf %40, %44 : vector<8x8x4xf32>
    %46 = arith.addf %37, %45 : vector<8x8x4xf32>
    %47 = vector.extract_strided_slice %12 {offsets = [0, 0, 0], sizes = [18, 8, 4], strides = [1, 1, 1]} : vector<18x8x8xbf16> to vector<18x8x4xbf16>
    %48 = vector.shape_cast %47 : vector<18x8x4xbf16> to vector<9x2x8x4xbf16>
    %49 = vector.extract_strided_slice %48 {offsets = [0, 0, 0, 0], sizes = [8, 1, 8, 4], strides = [1, 1, 1, 1]} : vector<9x2x8x4xbf16> to vector<8x1x8x4xbf16>
    %50 = vector.shape_cast %49 : vector<8x1x8x4xbf16> to vector<8x8x4xbf16>
    %51 = arith.extf %50 : vector<8x8x4xbf16> to vector<8x8x4xf32>
    %52 = vector.extract_strided_slice %13 {offsets = [0, 1, 0], sizes = [1, 1, 4], strides = [1, 1, 1]} : vector<3x3x4xf32> to vector<1x1x4xf32>
    %53 = vector.shape_cast %52 : vector<1x1x4xf32> to vector<4xf32>
    %54 = vector.shape_cast %53 : vector<4xf32> to vector<1x1x4xf32>
    %55 = vector.broadcast %54 : vector<1x1x4xf32> to vector<8x8x4xf32>
    %56 = arith.mulf %51, %55 : vector<8x8x4xf32>
    %57 = arith.addf %46, %56 : vector<8x8x4xf32>
    %58 = vector.extract_strided_slice %48 {offsets = [0, 1, 0, 0], sizes = [8, 1, 8, 4], strides = [1, 1, 1, 1]} : vector<9x2x8x4xbf16> to vector<8x1x8x4xbf16>
    %59 = vector.shape_cast %58 : vector<8x1x8x4xbf16> to vector<8x8x4xbf16>
    %60 = arith.extf %59 : vector<8x8x4xbf16> to vector<8x8x4xf32>
    %61 = vector.extract_strided_slice %13 {offsets = [1, 1, 0], sizes = [1, 1, 4], strides = [1, 1, 1]} : vector<3x3x4xf32> to vector<1x1x4xf32>
    %62 = vector.shape_cast %61 : vector<1x1x4xf32> to vector<4xf32>
    %63 = vector.shape_cast %62 : vector<4xf32> to vector<1x1x4xf32>
    %64 = vector.broadcast %63 : vector<1x1x4xf32> to vector<8x8x4xf32>
    %65 = arith.mulf %60, %64 : vector<8x8x4xf32>
    %66 = arith.addf %57, %65 : vector<8x8x4xf32>
    %67 = vector.extract_strided_slice %48 {offsets = [1, 0, 0, 0], sizes = [8, 1, 8, 4], strides = [1, 1, 1, 1]} : vector<9x2x8x4xbf16> to vector<8x1x8x4xbf16>
    %68 = vector.shape_cast %67 : vector<8x1x8x4xbf16> to vector<8x8x4xbf16>
    %69 = arith.extf %68 : vector<8x8x4xbf16> to vector<8x8x4xf32>
    %70 = vector.extract_strided_slice %13 {offsets = [2, 1, 0], sizes = [1, 1, 4], strides = [1, 1, 1]} : vector<3x3x4xf32> to vector<1x1x4xf32>
    %71 = vector.shape_cast %70 : vector<1x1x4xf32> to vector<4xf32>
    %72 = vector.shape_cast %71 : vector<4xf32> to vector<1x1x4xf32>
    %73 = vector.broadcast %72 : vector<1x1x4xf32> to vector<8x8x4xf32>
    %74 = arith.mulf %69, %73 : vector<8x8x4xf32>
    %75 = arith.addf %66, %74 : vector<8x8x4xf32>
    %76 = vector.extract_strided_slice %12 {offsets = [0, 0, 4], sizes = [18, 8, 4], strides = [1, 1, 1]} : vector<18x8x8xbf16> to vector<18x8x4xbf16>
    %77 = vector.shape_cast %76 : vector<18x8x4xbf16> to vector<9x2x8x4xbf16>
    %78 = vector.extract_strided_slice %77 {offsets = [0, 0, 0, 0], sizes = [8, 1, 8, 4], strides = [1, 1, 1, 1]} : vector<9x2x8x4xbf16> to vector<8x1x8x4xbf16>
    %79 = vector.shape_cast %78 : vector<8x1x8x4xbf16> to vector<8x8x4xbf16>
    %80 = arith.extf %79 : vector<8x8x4xbf16> to vector<8x8x4xf32>
    %81 = vector.extract_strided_slice %13 {offsets = [0, 2, 0], sizes = [1, 1, 4], strides = [1, 1, 1]} : vector<3x3x4xf32> to vector<1x1x4xf32>
    %82 = vector.shape_cast %81 : vector<1x1x4xf32> to vector<4xf32>
    %83 = vector.shape_cast %82 : vector<4xf32> to vector<1x1x4xf32>
    %84 = vector.broadcast %83 : vector<1x1x4xf32> to vector<8x8x4xf32>
    %85 = arith.mulf %80, %84 : vector<8x8x4xf32>
    %86 = arith.addf %75, %85 : vector<8x8x4xf32>
    %87 = vector.extract_strided_slice %77 {offsets = [0, 1, 0, 0], sizes = [8, 1, 8, 4], strides = [1, 1, 1, 1]} : vector<9x2x8x4xbf16> to vector<8x1x8x4xbf16>
    %88 = vector.shape_cast %87 : vector<8x1x8x4xbf16> to vector<8x8x4xbf16>
    %89 = arith.extf %88 : vector<8x8x4xbf16> to vector<8x8x4xf32>
    %90 = vector.extract_strided_slice %13 {offsets = [1, 2, 0], sizes = [1, 1, 4], strides = [1, 1, 1]} : vector<3x3x4xf32> to vector<1x1x4xf32>
    %91 = vector.shape_cast %90 : vector<1x1x4xf32> to vector<4xf32>
    %92 = vector.shape_cast %91 : vector<4xf32> to vector<1x1x4xf32>
    %93 = vector.broadcast %92 : vector<1x1x4xf32> to vector<8x8x4xf32>
    %94 = arith.mulf %89, %93 : vector<8x8x4xf32>
    %95 = arith.addf %86, %94 : vector<8x8x4xf32>
    %96 = vector.extract_strided_slice %77 {offsets = [1, 0, 0, 0], sizes = [8, 1, 8, 4], strides = [1, 1, 1, 1]} : vector<9x2x8x4xbf16> to vector<8x1x8x4xbf16>
    %97 = vector.shape_cast %96 : vector<8x1x8x4xbf16> to vector<8x8x4xbf16>
    %98 = arith.extf %97 : vector<8x8x4xbf16> to vector<8x8x4xf32>
    %99 = vector.extract_strided_slice %13 {offsets = [2, 2, 0], sizes = [1, 1, 4], strides = [1, 1, 1]} : vector<3x3x4xf32> to vector<1x1x4xf32>
    %100 = vector.shape_cast %99 : vector<1x1x4xf32> to vector<4xf32>
    %101 = vector.shape_cast %100 : vector<4xf32> to vector<1x1x4xf32>
    %102 = vector.broadcast %101 : vector<1x1x4xf32> to vector<8x8x4xf32>
    %103 = arith.mulf %98, %102 : vector<8x8x4xf32>
    %104 = arith.addf %95, %103 : vector<8x8x4xf32>
    %c0_18 = arith.constant 0 : index
    %c0_19 = arith.constant 0 : index
    %105 = vector.load %arg6[%c0_18, %c0_19] : memref<1x4xf32, #tpu.memory_space<vmem>>, vector<1x4xf32>
    %106 = vector.shape_cast %105 : vector<1x4xf32> to vector<1x1x4xf32>
    %107 = vector.broadcast %106 : vector<1x1x4xf32> to vector<8x8x4xf32>
    %108 = arith.addf %104, %107 : vector<8x8x4xf32>
    %cst_20 = arith.constant 0.000000e+00 : f32
    %109 = vector.broadcast %cst_20 : f32 to vector<8x8x4xf32>
    %110 = arith.maximumf %108, %109 : vector<8x8x4xf32>
    %111 = arith.truncf %110 : vector<8x8x4xf32> to vector<8x8x4xbf16>
    %c0_21 = arith.constant 0 : index
    %c0_22 = arith.constant 0 : index
    %c0_23 = arith.constant 0 : index
    %c0_24 = arith.constant 0 : index
    %112 = vector.load %arg7[%c0_21, %c0_22, %c0_23, %c0_24] : memref<1x8x8x4xbf16, #tpu.memory_space<vmem>>, vector<1x8x8x4xbf16>
    %113 = vector.shape_cast %112 : vector<1x8x8x4xbf16> to vector<8x8x4xbf16>
    %114 = vector.shape_cast %111 : vector<8x8x4xbf16> to vector<1x8x8x4xbf16>
    tpu.vector_store %arg7[%c0_21, %c0_22, %c0_23, %c0_24], %114 {strides = array<i32>} : memref<1x8x8x4xbf16, #tpu.memory_space<vmem>>, vector<1x8x8x4xbf16>,
    return
  }
  func.func @transform_0(%arg0: i32, %arg1: i32) -> (i32, i32, i32, i32) {
    %c16_i32 = arith.constant 16 : i32
    %0 = arith.muli %arg1, %c16_i32 : i32
    %c1_i32 = arith.constant 1 : i32
    %1 = arith.subi %0, %c1_i32 : i32
    %c0_i32 = arith.constant 0 : i32
    %2 = arith.maxsi %1, %c0_i32 : i32
    %c0_i32_0 = arith.constant 0 : i32
    %c0_i32_1 = arith.constant 0 : i32
    %c0_i32_2 = arith.constant 0 : i32
    return %arg0, %2, %c0_i32_0, %c0_i32_1 : i32, i32, i32, i32
  }
  func.func @transform_1(%arg0: i32, %arg1: i32) -> (i32, i32, i32, i32) {
    %c0_i32 = arith.constant 0 : i32
    %c0_i32_0 = arith.constant 0 : i32
    %c0_i32_1 = arith.constant 0 : i32
    return %arg0, %arg1, %c0_i32, %c0_i32_0 : i32, i32, i32, i32
  }
  func.func @transform_2(%arg0: i32, %arg1: i32) -> (i32, i32, i32, i32) {
    %c1_i32 = arith.constant 1 : i32
    %0 = arith.addi %arg1, %c1_i32 : i32
    %c16_i32 = arith.constant 16 : i32
    %1 = arith.muli %0, %c16_i32 : i32
    %c15_i32 = arith.constant 15 : i32
    %2 = arith.minsi %1, %c15_i32 : i32
    %c0_i32 = arith.constant 0 : i32
    %c0_i32_0 = arith.constant 0 : i32
    %c0_i32_1 = arith.constant 0 : i32
    return %arg0, %2, %c0_i32, %c0_i32_0 : i32, i32, i32, i32
  }
  func.func @transform_3(%arg0: i32, %arg1: i32) -> (i32, i32, i32) {
    %c0_i32 = arith.constant 0 : i32
    %c0_i32_0 = arith.constant 0 : i32
    %c0_i32_1 = arith.constant 0 : i32
    %c0_i32_2 = arith.constant 0 : i32
    return %c0_i32, %c0_i32_0, %c0_i32_1 : i32, i32, i32
  }
  func.func @transform_4(%arg0: i32, %arg1: i32) -> (i32, i32) {
    %c0_i32 = arith.constant 0 : i32
    %c0_i32_0 = arith.constant 0 : i32
    %c0_i32_1 = arith.constant 0 : i32
    return %c0_i32, %c0_i32_0 : i32, i32
  }
  func.func @transform_5(%arg0: i32, %arg1: i32) -> (i32, i32, i32, i32) {
    %c0_i32 = arith.constant 0 : i32
    %c0_i32_0 = arith.constant 0 : i32
    %c0_i32_1 = arith.constant 0 : i32
    return %arg0, %arg1, %c0_i32, %c0_i32_0 : i32, i32, i32, i32
  }
}

module attributes {stable_mosaic.version = 11 : i64} {
  func.func @_fused_out_kernel(%arg0: i32, %arg1: i32, %arg2: memref<1x8x2x8x16xbf16, #tpu.memory_space<vmem>>, %arg3: memref<2x16x8xbf16, #tpu.memory_space<vmem>>, %arg4: memref<1x8x8x4xbf16, #tpu.memory_space<vmem>>, %arg5: memref<4x8xbf16, #tpu.memory_space<vmem>>, %arg6: memref<1x8xf32, #tpu.memory_space<vmem>>, %arg7: memref<1x8x8x8xbf16, #tpu.memory_space<vmem>>) attributes {dimension_semantics = [#tpu.dimension_semantics<parallel>, #tpu.dimension_semantics<parallel>], iteration_bounds = array<i64: 2, 1>, scalar_prefetch = 0 : i64, scratch_operands = 0 : i64, tpu.core_type = #tpu.core_type<tc>, window_params = [{transform_indices = @transform_0, window_bounds = array<i64: 1, 8, 2, 8, 16>}, {pipeline_mode = #tpu.pipeline_mode<synchronous>, transform_indices = @transform_1, window_bounds = array<i64: 2, 16, 8>}, {transform_indices = @transform_2, window_bounds = array<i64: 1, 8, 8, 4>}, {pipeline_mode = #tpu.pipeline_mode<synchronous>, transform_indices = @transform_3, window_bounds = array<i64: 4, 8>}, {pipeline_mode = #tpu.pipeline_mode<synchronous>, transform_indices = @transform_4, window_bounds = array<i64: 1, 8>}, {transform_indices = @transform_5, window_bounds = array<i64: 1, 8, 8, 8>}]} {
    %c0 = arith.constant 0 : index
    %c0_0 = arith.constant 0 : index
    %c0_1 = arith.constant 0 : index
    %c0_2 = arith.constant 0 : index
    %0 = vector.load %arg4[%c0, %c0_0, %c0_1, %c0_2] : memref<1x8x8x4xbf16, #tpu.memory_space<vmem>>, vector<1x8x8x4xbf16>
    %1 = vector.shape_cast %0 : vector<1x8x8x4xbf16> to vector<8x8x4xbf16>
    %2 = vector.shape_cast %1 : vector<8x8x4xbf16> to vector<64x4xbf16>
    %c0_3 = arith.constant 0 : index
    %c0_4 = arith.constant 0 : index
    %3 = vector.load %arg5[%c0_3, %c0_4] : memref<4x8xbf16, #tpu.memory_space<vmem>>, vector<4x8xbf16>
    %cst = arith.constant dense<0.000000e+00> : vector<64x8xf32>
    %4 = tpu.matmul %2, %3, %cst {dimension_numbers = #tpu.dot_dimension_numbers<[1], [0], [0], [1], [0, 0, 1, 1], [], []>} : vector<64x4xbf16>, vector<4x8xbf16>, vector<64x8xf32> -> vector<64x8xf32>
    %c0_5 = arith.constant 0 : index
    %c0_6 = arith.constant 0 : index
    %c0_7 = arith.constant 0 : index
    %c0_8 = arith.constant 0 : index
    %c0_9 = arith.constant 0 : index
    %5 = vector.load %arg2[%c0_5, %c0_6, %c0_7, %c0_8, %c0_9] : memref<1x8x2x8x16xbf16, #tpu.memory_space<vmem>>, vector<1x8x1x8x16xbf16>
    %6 = vector.shape_cast %5 : vector<1x8x1x8x16xbf16> to vector<8x8x16xbf16>
    %7 = vector.shape_cast %6 : vector<8x8x16xbf16> to vector<64x16xbf16>
    %c0_10 = arith.constant 0 : index
    %c0_11 = arith.constant 0 : index
    %c0_12 = arith.constant 0 : index
    %8 = vector.load %arg3[%c0_10, %c0_11, %c0_12] : memref<2x16x8xbf16, #tpu.memory_space<vmem>>, vector<1x16x8xbf16>
    %9 = vector.shape_cast %8 : vector<1x16x8xbf16> to vector<16x8xbf16>
    %cst_13 = arith.constant dense<0.000000e+00> : vector<64x8xf32>
    %10 = tpu.matmul %7, %9, %cst_13 {dimension_numbers = #tpu.dot_dimension_numbers<[1], [0], [0], [1], [0, 0, 1, 1], [], []>} : vector<64x16xbf16>, vector<16x8xbf16>, vector<64x8xf32> -> vector<64x8xf32>
    %11 = arith.addf %4, %10 : vector<64x8xf32>
    %c0_14 = arith.constant 0 : index
    %c0_15 = arith.constant 0 : index
    %c1 = arith.constant 1 : index
    %c0_16 = arith.constant 0 : index
    %c0_17 = arith.constant 0 : index
    %12 = vector.load %arg2[%c0_14, %c0_15, %c1, %c0_16, %c0_17] : memref<1x8x2x8x16xbf16, #tpu.memory_space<vmem>>, vector<1x8x1x8x16xbf16>
    %13 = vector.shape_cast %12 : vector<1x8x1x8x16xbf16> to vector<8x8x16xbf16>
    %14 = vector.shape_cast %13 : vector<8x8x16xbf16> to vector<64x16xbf16>
    %c1_18 = arith.constant 1 : index
    %c0_19 = arith.constant 0 : index
    %c0_20 = arith.constant 0 : index
    %15 = vector.load %arg3[%c1_18, %c0_19, %c0_20] : memref<2x16x8xbf16, #tpu.memory_space<vmem>>, vector<1x16x8xbf16>
    %16 = vector.shape_cast %15 : vector<1x16x8xbf16> to vector<16x8xbf16>
    %cst_21 = arith.constant dense<0.000000e+00> : vector<64x8xf32>
    %17 = tpu.matmul %14, %16, %cst_21 {dimension_numbers = #tpu.dot_dimension_numbers<[1], [0], [0], [1], [0, 0, 1, 1], [], []>} : vector<64x16xbf16>, vector<16x8xbf16>, vector<64x8xf32> -> vector<64x8xf32>
    %18 = arith.addf %11, %17 : vector<64x8xf32>
    %c0_22 = arith.constant 0 : index
    %c0_23 = arith.constant 0 : index
    %19 = vector.load %arg6[%c0_22, %c0_23] : memref<1x8xf32, #tpu.memory_space<vmem>>, vector<1x8xf32>
    %20 = vector.broadcast %19 : vector<1x8xf32> to vector<64x8xf32>
    %21 = arith.addf %18, %20 : vector<64x8xf32>
    %22 = vector.shape_cast %21 : vector<64x8xf32> to vector<8x8x8xf32>
    %23 = arith.truncf %22 : vector<8x8x8xf32> to vector<8x8x8xbf16>
    %c0_24 = arith.constant 0 : index
    %c0_25 = arith.constant 0 : index
    %c0_26 = arith.constant 0 : index
    %c0_27 = arith.constant 0 : index
    %24 = vector.load %arg7[%c0_24, %c0_25, %c0_26, %c0_27] : memref<1x8x8x8xbf16, #tpu.memory_space<vmem>>, vector<1x8x8x8xbf16>
    %25 = vector.shape_cast %24 : vector<1x8x8x8xbf16> to vector<8x8x8xbf16>
    %26 = vector.shape_cast %23 : vector<8x8x8xbf16> to vector<1x8x8x8xbf16>
    tpu.vector_store %arg7[%c0_24, %c0_25, %c0_26, %c0_27], %26 {strides = array<i32>} : memref<1x8x8x8xbf16, #tpu.memory_space<vmem>>, vector<1x8x8x8xbf16>,
    return
  }
  func.func @transform_0(%arg0: i32, %arg1: i32) -> (i32, i32, i32, i32, i32) {
    %c0_i32 = arith.constant 0 : i32
    %c0_i32_0 = arith.constant 0 : i32
    %c0_i32_1 = arith.constant 0 : i32
    %c0_i32_2 = arith.constant 0 : i32
    return %arg0, %arg1, %c0_i32, %c0_i32_0, %c0_i32_1 : i32, i32, i32, i32, i32
  }
  func.func @transform_1(%arg0: i32, %arg1: i32) -> (i32, i32, i32) {
    %c0_i32 = arith.constant 0 : i32
    %c0_i32_0 = arith.constant 0 : i32
    %c0_i32_1 = arith.constant 0 : i32
    %c0_i32_2 = arith.constant 0 : i32
    return %c0_i32, %c0_i32_0, %c0_i32_1 : i32, i32, i32
  }
  func.func @transform_2(%arg0: i32, %arg1: i32) -> (i32, i32, i32, i32) {
    %c0_i32 = arith.constant 0 : i32
    %c0_i32_0 = arith.constant 0 : i32
    %c0_i32_1 = arith.constant 0 : i32
    return %arg0, %arg1, %c0_i32, %c0_i32_0 : i32, i32, i32, i32
  }
  func.func @transform_3(%arg0: i32, %arg1: i32) -> (i32, i32) {
    %c0_i32 = arith.constant 0 : i32
    %c0_i32_0 = arith.constant 0 : i32
    %c0_i32_1 = arith.constant 0 : i32
    return %c0_i32, %c0_i32_0 : i32, i32
  }
  func.func @transform_4(%arg0: i32, %arg1: i32) -> (i32, i32) {
    %c0_i32 = arith.constant 0 : i32
    %c0_i32_0 = arith.constant 0 : i32
    %c0_i32_1 = arith.constant 0 : i32
    return %c0_i32, %c0_i32_0 : i32, i32
  }
  func.func @transform_5(%arg0: i32, %arg1: i32) -> (i32, i32, i32, i32) {
    %c0_i32 = arith.constant 0 : i32
    %c0_i32_0 = arith.constant 0 : i32
    %c0_i32_1 = arith.constant 0 : i32
    return %arg0, %arg1, %c0_i32, %c0_i32_0 : i32, i32, i32, i32
  }
}

</mosaic_0001>

<bundles_post_ra>
// kernel: ced_forward.4
= control target key start
LH: loop header
LB: loop body
LE: loop exit
PB: predicated region body
PF: predicated region fallthrough
CT: control target
= control target key end

     0   :  { %s1074_s12 = smov 0   ;;  %s1076_s13 = smov 0   ;;  %s1254_s0 = inlined_call_operand.vmem [shape: bf16[2,256,4], index: 0, kind: input, shape index: {}]   ;;  %s1255_s1 = inlined_call_operand.vmem [shape: bf16[4,8], index: 1, kind: input, shape index: {}]   ;;  %s1256_s2 = inlined_call_operand.vmem [shape: f32[1,8], index: 2, kind: input, shape index: {}]   ;;  %s1257_s3 = inlined_call_operand.vmem [shape: bf16[2,256,8], index: 3, kind: output, shape index: {}]  }
   0x1   :  { %s1078_s14 = smov 0  }
   0x2 LB: > { %s25_s15 = sadd.s32 1, %s1048_s13  ;;  %p829_p0 = scmp.ge.s32.totalorder %s1052_s14, 1  ;;  %s1052_s14 = sphi %s1078_s14, %s13_s14   ;;  %s1048_s13 = sphi %s1076_s13, %s1259_s13   ;;  %s1044_s12 = sphi %s1074_s12, %s1258_s12  }
   0x3   : > { %p27_p1 = scmp.ge.s32.totalorder %s25_s15, 2  ;;  %p158_p2 = scmp.lt.s32.totalorder %s1052_s14, 3 }
   0x5   : > { %s1261_s15 = smov (%p27_p1, %s25_s15), 0  ;;  %p159_p3 = pnand %p829_p0, %p158_p2 }
   0x6   : > { %p191_p4 = scmp.lt.s32.totalorder (!%p159_p3), %s1044_s12, 1 }
   0x7   : > { %162 = sbr.rel (%p159_p3) target bundleno = 248 (0xf8), region = 32 }
   0xc   : > { %v243_v0 = vld [vmem:[%s1255_s1] sm:$0x3]  ;;  %vm380_vm0 = vcmask 1041408   ;;  %s1263_s12 = smov (!%p191_p4, %s1044_s12), 1  ;;  %vm331_vm1 = vcmask 31744   ;;  %vm705_vm2 = vcmask 60416  }
   0xd   : > { %988 = vmatprep.subr.msk.bf16.mxu0 %vm380_vm0, %v243_v0  ;;  %989 = vmatprep.subr.msk.bf16.mxu1 %vm380_vm0, %v243_v0  ;;  %v382_v1 = vsel %vm380_vm0, %v243_v0, 0  ;;  %s901_s18 = sshll.u32 %s1263_s12, 7  ;;  %v1140_v18 = vld [vmem:[%s1256_s2] ss:$0 sm:$0xff] }
   0xe   : > { %953 = vmatpush3.bf16.msra.mxu0 %v382_v1  ;;  %987 = vmatpush3.bf16.msra.mxu1 %v382_v1  ;;  %s1103_s21 = scalar_lea.vmem %s1254_s0, %s901_s18  ;;  %s1150_s26 = scalar_lea.vmem %s1257_s3, %s901_s18 }
   0xf   : > { %v1014_v2 = vld [vmem:[%s1103_s21] sm:$0xff]   ;;  %v1016_v4 = vld [vmem:[%s1103_s21 + $0x8] sm:$0xff]   ;;  %v1018_v6 = vld [vmem:[%s1103_s21 + $0x10] sm:$0xff]  }
  0x10   : > { %v1015_v3 = vld [vmem:[%s1103_s21 + $0x40] sm:$0xff]   ;;  %954 = vmatprep.mubr.msk.bf16.mxu0 %vm331_vm1, %v1014_v2  ;;  %v1017_v5 = vld [vmem:[%s1103_s21 + $0x48] sm:$0xff]   ;;  %v1019_v7 = vld [vmem:[%s1103_s21 + $0x50] sm:$0xff]  }
  0x11   : > { %970 = vmatprep.mubr.msk.bf16.mxu1 %vm331_vm1, %v1015_v3  ;;  %955 = vmatmul.mubr.msk.bf16.vlgmr.msra.gmra.mxu0 %vm331_vm1, %v1016_v4  ;;  %v1020_v8 = vld [vmem:[%s1103_s21 + $0x18] sm:$0xff]   ;;  %v1022_v10 = vld [vmem:[%s1103_s21 + $0x20] sm:$0xff]   ;;  %v1024_v12 = vld [vmem:[%s1103_s21 + $0x28] sm:$0xff]  }
  0x12   : > { %971 = vmatmul.mubr.msk.bf16.vlgmr.msra.gmra.mxu1 %vm331_vm1, %v1017_v5  ;;  %958 = vmatprep.mubr.msk.bf16.mxu0 %vm331_vm1, %v1018_v6  ;;  %v1021_v9 = vld [vmem:[%s1103_s21 + $0x58] sm:$0xff]   ;;  %v1023_v11 = vld [vmem:[%s1103_s21 + $0x60] sm:$0xff]   ;;  %v1025_v13 = vld [vmem:[%s1103_s21 + $0x68] sm:$0xff]  }
  0x13   : > { %974 = vmatprep.mubr.msk.bf16.mxu1 %vm331_vm1, %v1019_v7  ;;  %v1026_v14 = vld [vmem:[%s1103_s21 + $0x30] sm:$0xff]   ;;  %v1028_v16 = vld [vmem:[%s1103_s21 + $0x38] sm:$0xff]  }
  0x14   : > { %v1027_v15 = vld [vmem:[%s1103_s21 + $0x70] sm:$0xff]   ;;  %v1029_v17 = vld [vmem:[%s1103_s21 + $0x78] sm:$0xff]  }
  0x19   : > { %959 = vmatmul.mubr.msk.bf16.gmra.mxu0 %vm331_vm1, %v1020_v8 }
  0x1a   : > { %975 = vmatmul.mubr.msk.bf16.gmra.mxu1 %vm331_vm1, %v1021_v9  ;;  %962 = vmatprep.mubr.msk.bf16.mxu0 %vm331_vm1, %v1022_v10 }
  0x1b   : > { %978 = vmatprep.mubr.msk.bf16.mxu1 %vm331_vm1, %v1023_v11 }
  0x21   : > { %963 = vmatmul.mubr.msk.bf16.gmra.mxu0 %vm331_vm1, %v1024_v12 }
  0x22   : > { %979 = vmatmul.mubr.msk.bf16.gmra.mxu1 %vm331_vm1, %v1025_v13  ;;  %966 = vmatprep.mubr.msk.bf16.mxu0 %vm331_vm1, %v1026_v14 }
  0x23   : > { %982 = vmatprep.mubr.msk.bf16.mxu1 %vm331_vm1, %v1027_v15 }
  0x29   : > { %967 = vmatmul.mubr.msk.bf16.gmra.mxu0 %vm331_vm1, %v1028_v16 }
  0x2a   : > { %983 = vmatmul.mubr.msk.bf16.gmra.mxu1 %vm331_vm1, %v1029_v17 }
  0xd1   : > { %v956_v19 = vpop.f32.mrf.mxu0 }
  0xd2   : > { %v427_v20 = vadd.f32 %v956_v19, %v1140_v18  ;;  %v972_v21 = vpop.f32.mrf.mxu1 }
  0xd3   : > { %v491_v22 = vadd.f32 %v972_v21, %v1140_v18  ;;  %v418_v23 = vpop.f32.mrf.mxu0 }
  0xd4   : > { %v547_v24 = vmax.f32 %v427_v20, 0.0  ;;  %v419_v25 = vadd.f32 %v1140_v18, %v418_v23  ;;  %v482_v26 = vpop.f32.mrf.mxu1 }
  0xd5   : > { %v563_v27 = vmax.f32 %v491_v22, 0.0  ;;  %v483_v28 = vadd.f32 %v1140_v18, %v482_v26  ;;  %v957_v29 = vpop.f32.mrf.mxu0 }
  0xd6   : > { %v905_v30 = vpack.c.bf16 %v547_v24, %v547_v24  ;;  %v545_v31 = vmax.f32 %v419_v25, 0.0  ;;  %v430_v32 = vadd.f32 %v957_v29, %v1140_v18  ;;  %v973_v33 = vpop.f32.mrf.mxu1 }
  0xd7   : > { %v921_v34 = vpack.c.bf16 %v563_v27, %v563_v27  ;;  %v561_v35 = vmax.f32 %v483_v28, 0.0  ;;  %v494_v36 = vadd.f32 %v973_v33, %v1140_v18  ;;  %v421_v37 = vpop.f32.mrf.mxu0 }
  0xd8   : > { %708 = vst.msk [vmem:[%s1150_s26 + $0x8] sm:$0xf] %vm705_vm2, %v905_v30  ;;  %v903_v38 = vpack.c.bf16 %v545_v31, %v545_v31  ;;  %v548_v39 = vmax.f32 %v430_v32, 0.0  ;;  %v422_v40 = vadd.f32 %v1140_v18, %v421_v37  ;;  %v485_v41 = vpop.f32.mrf.mxu1 }
  0xd9   : > { %724 = vst.msk [vmem:[%s1150_s26 + $0x48] sm:$0xf] %vm705_vm2, %v921_v34  ;;  %v919_v42 = vpack.c.bf16 %v561_v35, %v561_v35  ;;  %v564_v43 = vmax.f32 %v494_v36, 0.0  ;;  %v486_v44 = vadd.f32 %v1140_v18, %v485_v41  ;;  %v960_v45 = vpop.f32.mrf.mxu0 }
  0xda   : > { %706 = vst.msk [vmem:[%s1150_s26] sm:$0xf] %vm705_vm2, %v903_v38  ;;  %v906_v46 = vpack.c.bf16 %v548_v39, %v548_v39  ;;  %v546_v47 = vmax.f32 %v422_v40, 0.0  ;;  %v443_v48 = vadd.f32 %v960_v45, %v1140_v18  ;;  %v976_v49 = vpop.f32.mrf.mxu1 }
  0xdb   : > { %722 = vst.msk [vmem:[%s1150_s26 + $0x40] sm:$0xf] %vm705_vm2, %v919_v42  ;;  %v922_v50 = vpack.c.bf16 %v564_v43, %v564_v43  ;;  %v562_v51 = vmax.f32 %v486_v44, 0.0  ;;  %v507_v52 = vadd.f32 %v976_v49, %v1140_v18  ;;  %v434_v53 = vpop.f32.mrf.mxu0 }
  0xdc   : > { %709 = vst.msk [vmem:[%s1150_s26 + $0xc] sm:$0xf] %vm705_vm2, %v906_v46  ;;  %v904_v54 = vpack.c.bf16 %v546_v47, %v546_v47  ;;  %v551_v55 = vmax.f32 %v443_v48, 0.0  ;;  %v435_v56 = vadd.f32 %v1140_v18, %v434_v53  ;;  %v498_v57 = vpop.f32.mrf.mxu1 }
  0xdd   : > { %725 = vst.msk [vmem:[%s1150_s26 + $0x4c] sm:$0xf] %vm705_vm2, %v922_v50  ;;  %v920_v58 = vpack.c.bf16 %v562_v51, %v562_v51  ;;  %v567_v59 = vmax.f32 %v507_v52, 0.0  ;;  %v499_v60 = vadd.f32 %v1140_v18, %v498_v57  ;;  %v961_v61 = vpop.f32.mrf.mxu0 }
  0xde   : > { %707 = vst.msk [vmem:[%s1150_s26 + $0x4] sm:$0xf] %vm705_vm2, %v904_v54  ;;  %v909_v62 = vpack.c.bf16 %v551_v55, %v551_v55  ;;  %v549_v63 = vmax.f32 %v435_v56, 0.0  ;;  %v446_v0 = vadd.f32 %v961_v61, %v1140_v18  ;;  %v977_v1 = vpop.f32.mrf.mxu1 }
  0xdf   : > { %723 = vst.msk [vmem:[%s1150_s26 + $0x44] sm:$0xf] %vm705_vm2, %v920_v58  ;;  %v925_v2 = vpack.c.bf16 %v567_v59, %v567_v59  ;;  %v565_v3 = vmax.f32 %v499_v60, 0.0  ;;  %v510_v4 = vadd.f32 %v977_v1, %v1140_v18  ;;  %v437_v5 = vpop.f32.mrf.mxu0 }
  0xe0   : > { %712 = vst.msk [vmem:[%s1150_s26 + $0x18] sm:$0xf] %vm705_vm2, %v909_v62  ;;  %v907_v6 = vpack.c.bf16 %v549_v63, %v549_v63  ;;  %v552_v7 = vmax.f32 %v446_v0, 0.0  ;;  %v438_v8 = vadd.f32 %v1140_v18, %v437_v5  ;;  %v501_v9 = vpop.f32.mrf.mxu1 }
  0xe1   : > { %728 = vst.msk [vmem:[%s1150_s26 + $0x58] sm:$0xf] %vm705_vm2, %v925_v2  ;;  %v923_v10 = vpack.c.bf16 %v565_v3, %v565_v3  ;;  %v568_v11 = vmax.f32 %v510_v4, 0.0  ;;  %v502_v12 = vadd.f32 %v1140_v18, %v501_v9  ;;  %v964_v13 = vpop.f32.mrf.mxu0 }
  0xe2   : > { %710 = vst.msk [vmem:[%s1150_s26 + $0x10] sm:$0xf] %vm705_vm2, %v907_v6  ;;  %v910_v14 = vpack.c.bf16 %v552_v7, %v552_v7  ;;  %v550_v15 = vmax.f32 %v438_v8, 0.0  ;;  %v459_v16 = vadd.f32 %v964_v13, %v1140_v18  ;;  %v980_v17 = vpop.f32.mrf.mxu1 }
  0xe3   : > { %726 = vst.msk [vmem:[%s1150_s26 + $0x50] sm:$0xf] %vm705_vm2, %v923_v10  ;;  %v926_v19 = vpack.c.bf16 %v568_v11, %v568_v11  ;;  %v566_v20 = vmax.f32 %v502_v12, 0.0  ;;  %v523_v21 = vadd.f32 %v980_v17, %v1140_v18  ;;  %v450_v22 = vpop.f32.mrf.mxu0 }
  0xe4   : > { %713 = vst.msk [vmem:[%s1150_s26 + $0x1c] sm:$0xf] %vm705_vm2, %v910_v14  ;;  %v908_v23 = vpack.c.bf16 %v550_v15, %v550_v15  ;;  %v555_v24 = vmax.f32 %v459_v16, 0.0  ;;  %v451_v25 = vadd.f32 %v1140_v18, %v450_v22  ;;  %v514_v26 = vpop.f32.mrf.mxu1 }
  0xe5   : > { %729 = vst.msk [vmem:[%s1150_s26 + $0x5c] sm:$0xf] %vm705_vm2, %v926_v19  ;;  %v924_v27 = vpack.c.bf16 %v566_v20, %v566_v20  ;;  %v571_v28 = vmax.f32 %v523_v21, 0.0  ;;  %v515_v29 = vadd.f32 %v1140_v18, %v514_v26  ;;  %v965_v30 = vpop.f32.mrf.mxu0 }
  0xe6   : > { %711 = vst.msk [vmem:[%s1150_s26 + $0x14] sm:$0xf] %vm705_vm2, %v908_v23  ;;  %v913_v31 = vpack.c.bf16 %v555_v24, %v555_v24  ;;  %v553_v32 = vmax.f32 %v451_v25, 0.0  ;;  %v462_v33 = vadd.f32 %v965_v30, %v1140_v18  ;;  %v981_v34 = vpop.f32.mrf.mxu1 }
  0xe7   : > { %727 = vst.msk [vmem:[%s1150_s26 + $0x54] sm:$0xf] %vm705_vm2, %v924_v27  ;;  %v929_v35 = vpack.c.bf16 %v571_v28, %v571_v28  ;;  %v569_v36 = vmax.f32 %v515_v29, 0.0  ;;  %v526_v37 = vadd.f32 %v981_v34, %v1140_v18  ;;  %v453_v38 = vpop.f32.mrf.mxu0 }
  0xe8   : > { %716 = vst.msk [vmem:[%s1150_s26 + $0x28] sm:$0xf] %vm705_vm2, %v913_v31  ;;  %v911_v39 = vpack.c.bf16 %v553_v32, %v553_v32  ;;  %v556_v40 = vmax.f32 %v462_v33, 0.0  ;;  %v454_v41 = vadd.f32 %v1140_v18, %v453_v38  ;;  %v517_v42 = vpop.f32.mrf.mxu1 }
  0xe9   : > { %732 = vst.msk [vmem:[%s1150_s26 + $0x68] sm:$0xf] %vm705_vm2, %v929_v35  ;;  %v927_v43 = vpack.c.bf16 %v569_v36, %v569_v36  ;;  %v572_v44 = vmax.f32 %v526_v37, 0.0  ;;  %v518_v45 = vadd.f32 %v1140_v18, %v517_v42  ;;  %v968_v46 = vpop.f32.mrf.mxu0 }
  0xea   : > { %714 = vst.msk [vmem:[%s1150_s26 + $0x20] sm:$0xf] %vm705_vm2, %v911_v39  ;;  %v914_v47 = vpack.c.bf16 %v556_v40, %v556_v40  ;;  %v554_v48 = vmax.f32 %v454_v41, 0.0  ;;  %v475_v49 = vadd.f32 %v968_v46, %v1140_v18  ;;  %v984_v50 = vpop.f32.mrf.mxu1 }
  0xeb   : > { %730 = vst.msk [vmem:[%s1150_s26 + $0x60] sm:$0xf] %vm705_vm2, %v927_v43  ;;  %v930_v51 = vpack.c.bf16 %v572_v44, %v572_v44  ;;  %v570_v52 = vmax.f32 %v518_v45, 0.0  ;;  %v539_v53 = vadd.f32 %v984_v50, %v1140_v18  ;;  %v466_v54 = vpop.f32.mrf.mxu0 }
  0xec   : > { %717 = vst.msk [vmem:[%s1150_s26 + $0x2c] sm:$0xf] %vm705_vm2, %v914_v47  ;;  %v912_v55 = vpack.c.bf16 %v554_v48, %v554_v48  ;;  %v559_v56 = vmax.f32 %v475_v49, 0.0  ;;  %v467_v57 = vadd.f32 %v1140_v18, %v466_v54  ;;  %v530_v58 = vpop.f32.mrf.mxu1 }
  0xed   : > { %733 = vst.msk [vmem:[%s1150_s26 + $0x6c] sm:$0xf] %vm705_vm2, %v930_v51  ;;  %v928_v59 = vpack.c.bf16 %v570_v52, %v570_v52  ;;  %v575_v60 = vmax.f32 %v539_v53, 0.0  ;;  %v531_v61 = vadd.f32 %v1140_v18, %v530_v58  ;;  %v969_v62 = vpop.f32.mrf.mxu0 }
  0xee   : > { %715 = vst.msk [vmem:[%s1150_s26 + $0x24] sm:$0xf] %vm705_vm2, %v912_v55  ;;  %v917_v63 = vpack.c.bf16 %v559_v56, %v559_v56  ;;  %v557_v0 = vmax.f32 %v467_v57, 0.0  ;;  %v478_v1 = vadd.f32 %v969_v62, %v1140_v18  ;;  %v985_v2 = vpop.f32.mrf.mxu1 }
  0xef   : > { %731 = vst.msk [vmem:[%s1150_s26 + $0x64] sm:$0xf] %vm705_vm2, %v928_v59  ;;  %v933_v3 = vpack.c.bf16 %v575_v60, %v575_v60  ;;  %v573_v4 = vmax.f32 %v531_v61, 0.0  ;;  %v542_v5 = vadd.f32 %v985_v2, %v1140_v18  ;;  %v469_v6 = vpop.f32.mrf.mxu0 }
  0xf0   : > { %720 = vst.msk [vmem:[%s1150_s26 + $0x38] sm:$0xf] %vm705_vm2, %v917_v63  ;;  %v915_v7 = vpack.c.bf16 %v557_v0, %v557_v0  ;;  %v560_v8 = vmax.f32 %v478_v1, 0.0  ;;  %v470_v9 = vadd.f32 %v1140_v18, %v469_v6  ;;  %v533_v10 = vpop.f32.mrf.mxu1 }
  0xf1   : > { %736 = vst.msk [vmem:[%s1150_s26 + $0x78] sm:$0xf] %vm705_vm2, %v933_v3  ;;  %v931_v11 = vpack.c.bf16 %v573_v4, %v573_v4  ;;  %v576_v12 = vmax.f32 %v542_v5, 0.0  ;;  %v534_v13 = vadd.f32 %v1140_v18, %v533_v10 }
  0xf2   : > { %718 = vst.msk [vmem:[%s1150_s26 + $0x30] sm:$0xf] %vm705_vm2, %v915_v7  ;;  %v918_v14 = vpack.c.bf16 %v560_v8, %v560_v8  ;;  %v558_v15 = vmax.f32 %v470_v9, 0.0 }
  0xf3   : > { %734 = vst.msk [vmem:[%s1150_s26 + $0x70] sm:$0xf] %vm705_vm2, %v931_v11  ;;  %v934_v16 = vpack.c.bf16 %v576_v12, %v576_v12  ;;  %v574_v17 = vmax.f32 %v534_v13, 0.0 }
  0xf4   : > { %721 = vst.msk [vmem:[%s1150_s26 + $0x3c] sm:$0xf] %vm705_vm2, %v918_v14  ;;  %v916_v19 = vpack.c.bf16 %v558_v15, %v558_v15 }
  0xf5   : > { %737 = vst.msk [vmem:[%s1150_s26 + $0x7c] sm:$0xf] %vm705_vm2, %v934_v16  ;;  %v932_v20 = vpack.c.bf16 %v574_v17, %v574_v17 }
  0xf6   : > { %719 = vst.msk [vmem:[%s1150_s26 + $0x34] sm:$0xf] %vm705_vm2, %v916_v19 }
  0xf7   : > { %735 = vst.msk [vmem:[%s1150_s26 + $0x74] sm:$0xf] %vm705_vm2, %v932_v20 }
  0xf8 PF: > { %s13_s14 = sadd.s32 1, %s1052_s14   ;;  %s1258_s12 = smov %s1048_s13 }
  0xf9   : > { %p10_p5 = scmp.ge.s32.totalorder %s13_s14, 4   ;;  %s1259_s13 = smov %s1261_s15 }
  0xfb   :  { %12 = sbr.rel (!%p10_p5) target bundleno = 2 (0x2), region = 62 }

// kernel: ced_forward.5
= control target key start
LH: loop header
LB: loop body
LE: loop exit
PB: predicated region body
PF: predicated region fallthrough
CT: control target
= control target key end

     0   :  { %s2081_s18 = smov 0   ;;  %s2083_s19 = smov 0   ;;  %s3125_s0 = inlined_call_operand.vmem [shape: bf16[2,16,16,8], index: 0, kind: input, shape index: {}, may-alias: {0,1,2}]   ;;  %s3126_s1 = inlined_call_operand.vmem [shape: bf16[2,16,16,8], index: 1, kind: input, shape index: {}, may-alias: {0,1,2}]   ;;  %s3127_s2 = inlined_call_operand.vmem [shape: bf16[2,16,16,8], index: 2, kind: input, shape index: {}, may-alias: {0,1,2}]   ;;  %s3128_s3 = inlined_call_operand.vmem [shape: f32[3,3,8], index: 3, kind: input, shape index: {}]   ;;  %s3129_s4 = inlined_call_operand.vmem [shape: f32[1,8], index: 4, kind: input, shape index: {}]   ;;  %s3130_s5 = inlined_call_operand.vmem [shape: bf16[2,16,16,8], index: 5, kind: output, shape index: {}]  }
   0x1   :  { %s2085_s0 = smov 0  }
   0x2 LB: > { %s27_s2 = sadd.s32 1, %s2044_s19  ;;  %p1869_p0 = scmp.ge.s32.totalorder %s2048_s0, 1  ;;  %s2048_s0 = sphi %s2085_s0, %s15_s0   ;;  %s2044_s19 = sphi %s2083_s19, %s3136_s19   ;;  %s2040_s18 = sphi %s2081_s18, %s3135_s18  }
   0x3   : > { %p29_p1 = scmp.ge.s32.totalorder %s27_s2, 2  ;;  %p273_p2 = scmp.lt.s32.totalorder %s2048_s0, 3 }
   0x5   : > { %s3138_s2 = smov (%p29_p1, %s27_s2), 0  ;;  %p274_p3 = pnand %p1869_p0, %p273_p2 }
   0x6   : > { %p355_p4 = scmp.lt.s32.totalorder (!%p274_p3), %s2040_s18, 1 }
   0x7   : > { %277 = sbr.rel (%p274_p3) target bundleno = 250 (0xfa), region = 40 }
   0xc   : > { %v732_v0 = vlaneseq  ;;  %v2050_v1 = vmov 0   ;;  %s3140_s18 = smov (!%p355_p4, %s2040_s18), 1  ;;  %v442_v4 = vld [vmem:[%s3128_s3] sm:$0x7]  ;;  %vm679_vm0 = vcmask 1040384   ;;  %vm1234_vm2 = vcmask 1047552  }
   0xd   : > { %v1878_v2 = vcombine.low %v2050_v1, %v2050_v1  ;;  %s1932_s22 = sshll.u32 %s3140_s18, 7  ;;  %vm680_vm1 = vsmask.f32 256  ;;  %v443_v9 = vld [vmem:[%s3128_s3 + $0x4] sm:$0x7]  ;;  %v2124_v14 = vunpack.c.l.bf16 %v2050_v1  ;;  %vm1694_vm6 = vcmask 60416  }
   0xe   : > { %v733_v3 = vshrl.u32 %v732_v0, 7  ;;  %s2110_s25 = scalar_lea.vmem %s3126_s1, %s1932_s22  ;;  %v444_v10 = vld [vmem:[%s3128_s3 + $0x8] sm:$0x7]  ;;  %vm1235_vm3 = vsmask.f32 7424  ;;  %vm2127_vm4 = vmand %vm679_vm0, %vm680_vm1  ;;  %s2293_s9 = scalar_lea.vmem %s3130_s5, %s1932_s22 }
   0xf   : > { %v536_v5 = vshrl.u32 %v1878_v2, 16  ;;  %v539_v6 = vshll.u32 %v1878_v2, 16  ;;  %v2119_v12 = vld [vmem:[%s2110_s25] sm:$0xff]   ;;  %v2122_v13 = vld [vmem:[%s2110_s25 + $0x8] sm:$0xff]   ;;  %vm2153_vm5 = vmand %vm1234_vm2, %vm1235_vm3 }
  0x10   : > { %v734_v7 = vsub.s32 0, %v733_v3  ;;  %v974_v8 = vsub.s32 1, %v733_v3  ;;  %v1289_v18 = vsub.s32 2, %v733_v3  ;;  %v543_v23 = vshrl.u32 %v2119_v12, 16  ;;  %v414_v0 = vld [vmem:[%s2110_s25 + $0x10] sm:$0xff]  }
  0x11   : > { %v538_v11 = vrot.slane %v536_v5, 7  ;;  %v1180_v15 = vrot.slane %v539_v6, 1  ;;  %v546_v24 = vshll.u32 %v2119_v12, 16  ;;  %v550_v25 = vshrl.u32 %v2122_v13, 16 }
  0x12   : > { %v2131_v19 = vrot.slane %v442_v4, %v734_v7  ;;  %v2133_v20 = vrot.slane %v443_v9, %v734_v7  ;;  %v2135_v21 = vrot.slane %v444_v10, %v734_v7  ;;  %v2137_v22 = vrot.slane %v442_v4, %v974_v8 }
  0x13   : > { %v541_v16 = vor.u32 %v539_v6, %v538_v11  ;;  %v553_v26 = vshll.u32 %v2122_v13, 16  ;;  %v2147_v28 = vrot.slane %v443_v9, %v974_v8  ;;  %v2149_v29 = vrot.slane %v444_v10, %v974_v8 }
  0x14   : > { %v1181_v30 = vor.u32 %v1180_v15, %v536_v5  ;;  %v545_v32 = vrot.slane %v543_v23, 7  ;;  %v552_v33 = vrot.slane %v550_v25, 7  ;;  %v1182_v35 = vrot.slane %v546_v24, 1 }
  0x15   : > { %v2145_v27 = vsel %vm2127_vm4, 0, %v541_v16  ;;  %v942_v36 = vunpack.c.l.bf16 %v2119_v12  ;;  %v2160_v37 = vunpack.c.l.bf16 %v2122_v13  ;;  %v976_v38 = vmul.f32 %v2137_v22, %v2124_v14 }
  0x16   : > { %v700_v34 = vunpack.c.l.bf16 %v2145_v27  ;;  %v1184_v39 = vrot.slane %v553_v26, 1  ;;  %v548_v40 = vor.u32 %v546_v24, %v545_v32  ;;  %v555_v41 = vor.u32 %v553_v26, %v552_v33 }
  0x17   : > { %v1183_v42 = vor.u32 %v1182_v35, %v543_v23  ;;  %v2166_v43 = vsel %vm2153_vm5, %v1181_v30, 0  ;;  %v1046_v44 = vmul.f32 %v2147_v28, %v942_v36  ;;  %v1116_v45 = vmul.f32 %v2149_v29, %v2160_v37 }
  0x18   : > { %v1185_v46 = vor.u32 %v1184_v39, %v550_v25  ;;  %v701_v47 = vunpack.c.h.bf16 %v2145_v27  ;;  %v683_v48 = vsel %vm2127_vm4, 0, %v548_v40  ;;  %v684_v49 = vsel %vm2127_vm4, 0, %v555_v41 }
  0x19   : > { %v736_v50 = vmul.f32 %v2131_v19, %v700_v34  ;;  %v2179_v51 = vrot.slane %v442_v4, %v1289_v18  ;;  %v702_v52 = vunpack.c.l.bf16 %v683_v48  ;;  %v2181_v53 = vunpack.c.l.bf16 %v684_v49 }
  0x1a   : > { %v2185_v54 = vsel %vm2153_vm5, %v1183_v42, 0  ;;  %v1255_v55 = vunpack.c.l.bf16 %v2166_v43  ;;  %v1239_v56 = vsel %vm2153_vm5, %v1185_v46, 0  ;;  %v2190_v57 = vrot.slane %v443_v9, %v1289_v18 }
  0x1b   : > { %v703_v58 = vunpack.c.h.bf16 %v683_v48  ;;  %v2192_v59 = vunpack.c.h.bf16 %v684_v49  ;;  %v806_v60 = vmul.f32 %v2133_v20, %v702_v52  ;;  %v876_v61 = vmul.f32 %v2135_v21, %v2181_v53 }
  0x1c   : > { %v2197_v62 = vrot.slane %v444_v10, %v1289_v18  ;;  %v737_v63 = vmul.f32 %v2131_v19, %v701_v47  ;;  %v1257_v1 = vunpack.c.l.bf16 %v2185_v54  ;;  %v943_v4 = vunpack.c.h.bf16 %v2119_v12 }
  0x1d   : > { %v807_v2 = vmul.f32 %v2133_v20, %v703_v58  ;;  %v877_v3 = vmul.f32 %v2135_v21, %v2192_v59  ;;  %v838_v5 = vadd.f32 %v806_v60, %v736_v50  ;;  %v2208_v6 = vunpack.c.l.bf16 %v1239_v56 }
  0x1e   : > { %v1291_v7 = vmul.f32 %v2179_v51, %v1255_v55  ;;  %v1256_v8 = vunpack.c.h.bf16 %v2166_v43  ;;  %v1361_v9 = vmul.f32 %v2190_v57, %v1257_v1  ;;  %v2216_v11 = vunpack.c.h.bf16 %v2122_v13 }
  0x1f   : > { %v839_v10 = vadd.f32 %v807_v2, %v737_v63  ;;  %v908_v15 = vadd.f32 %v876_v61, %v838_v5  ;;  %v1431_v16 = vmul.f32 %v2197_v62, %v2208_v6  ;;  %v1047_v12 = vmul.f32 %v2147_v28, %v943_v4 }
  0x20   : > { %v1258_v18 = vunpack.c.h.bf16 %v2185_v54  ;;  %v1117_v24 = vmul.f32 %v2149_v29, %v2216_v11  ;;  %v557_v25 = vshrl.u32 %v414_v0, 16  ;;  %v560_v26 = vshll.u32 %v414_v0, 16 }
  0x21   : > { %v909_v23 = vadd.f32 %v877_v3, %v839_v10  ;;  %v1008_v30 = vadd.f32 %v976_v38, %v908_v15  ;;  %v2224_v32 = vunpack.c.h.bf16 %v1239_v56  ;;  %v1292_v13 = vmul.f32 %v2179_v51, %v1256_v8 }
  0x22   : > { %v738_v33 = vmul.f32 %v2131_v19, %v702_v52  ;;  %v559_v39 = vrot.slane %v557_v25, 7  ;;  %v808_v40 = vmul.f32 %v2133_v20, %v2181_v53  ;;  %v1186_v41 = vrot.slane %v560_v26, 1 }
  0x23   : > { %v1009_v35 = vadd.f32 %v976_v38, %v909_v23  ;;  %v1078_v42 = vadd.f32 %v1046_v44, %v1008_v30  ;;  %v1362_v46 = vmul.f32 %v2190_v57, %v1258_v18  ;;  %v1432_v48 = vmul.f32 %v2197_v62, %v2224_v32 }
  0x24   : > { %v2235_v49 = vunpack.c.l.bf16 %v414_v0  ;;  %v562_v54 = vor.u32 %v560_v26, %v559_v39  ;;  %v978_v56 = vmul.f32 %v2137_v22, %v942_v36  ;;  %v1187_v60 = vor.u32 %v1186_v41, %v557_v25  ;;  %v2257_v25 = vld [vmem:[%s2110_s25 + $0x18] sm:$0xff]  }
  0x25   : > { %v1079_v50 = vadd.f32 %v1047_v12, %v1009_v35  ;;  %v1148_v52 = vadd.f32 %v1116_v45, %v1078_v42  ;;  %v1048_v38 = vmul.f32 %v2147_v28, %v2160_v37  ;;  %v739_v61 = vmul.f32 %v2131_v19, %v703_v58 }
  0x26   : > { %v809_v44 = vmul.f32 %v2133_v20, %v2192_v59  ;;  %v685_v2 = vsel %vm2127_vm4, 0, %v562_v54  ;;  %v840_v3 = vadd.f32 %v808_v40, %v738_v33  ;;  %v1118_v5 = vmul.f32 %v2149_v29, %v2235_v49 }
  0x27   : > { %v1149_v63 = vadd.f32 %v1117_v24, %v1079_v50  ;;  %v1323_v36 = vadd.f32 %v1291_v7, %v1148_v52  ;;  %v2247_v10 = vunpack.c.l.bf16 %v685_v2  ;;  %v1240_v45 = vsel %vm2153_vm5, %v1187_v60, 0 }
  0x28   : > { %v2251_v15 = vunpack.c.h.bf16 %v685_v2  ;;  %v1293_v12 = vmul.f32 %v2179_v51, %v1257_v1  ;;  %v1363_v23 = vmul.f32 %v2190_v57, %v2208_v6  ;;  %v841_v24 = vadd.f32 %v809_v44, %v739_v61 }
  0x29   : > { %v1324_v58 = vadd.f32 %v1292_v13, %v1149_v63  ;;  %v1393_v26 = vadd.f32 %v1361_v9, %v1323_v36  ;;  %v878_v7 = vmul.f32 %v2135_v21, %v2247_v10  ;;  %v979_v33 = vmul.f32 %v2137_v22, %v943_v4  ;;  %v2267_v13 = vld [vmem:[%s3129_s4] ss:$0 sm:$0xff] }
  0x2a   : > { %v879_v30 = vmul.f32 %v2135_v21, %v2251_v15  ;;  %v2269_v35 = vunpack.c.l.bf16 %v1240_v45  ;;  %v2271_v39 = vunpack.c.h.bf16 %v414_v0  ;;  %v1049_v9 = vmul.f32 %v2147_v28, %v2216_v11 }
  0x2b   : > { %v1394_v1 = vadd.f32 %v1362_v46, %v1324_v58  ;;  %v1463_v40 = vadd.f32 %v1431_v16, %v1393_v26  ;;  %v910_v41 = vadd.f32 %v878_v7, %v840_v3  ;;  %v2277_v54 = vunpack.c.h.bf16 %v1240_v45 }
  0x2c   : > { %v911_v42 = vadd.f32 %v879_v30, %v841_v24  ;;  %v1119_v4 = vmul.f32 %v2149_v29, %v2271_v39  ;;  %v1294_v60 = vmul.f32 %v2179_v51, %v1258_v18  ;;  %v564_v61 = vshrl.u32 %v2257_v25, 16 }
  0x2d   : > { %v1464_v50 = vadd.f32 %v1432_v48, %v1394_v1  ;;  %v1502_v46 = vadd.f32 %v2267_v13, %v1463_v40  ;;  %v1010_v52 = vadd.f32 %v978_v56, %v910_v41  ;;  %v567_v16 = vshll.u32 %v2257_v25, 16 }
  0x2e   : > { %v1011_v0 = vadd.f32 %v979_v33, %v911_v42  ;;  %v740_v48 = vmul.f32 %v2131_v19, %v2181_v53  ;;  %v810_v63 = vmul.f32 %v2133_v20, %v2247_v10  ;;  %v566_v18 = vrot.slane %v564_v61, 7 }
  0x2f   : > { %v1503_v44 = vadd.f32 %v2267_v13, %v1464_v50  ;;  %v1534_v2 = vmax.f32 %v1502_v46, 0.0  ;;  %v1080_v3 = vadd.f32 %v1048_v38, %v1010_v52  ;;  %v1433_v45 = vmul.f32 %v2197_v62, %v2269_v35 }
  0x30   : > { %v1081_v36 = vadd.f32 %v1049_v9, %v1011_v0  ;;  %v1364_v53 = vmul.f32 %v2190_v57, %v2224_v32  ;;  %v1434_v38 = vmul.f32 %v2197_v62, %v2277_v54  ;;  %v569_v7 = vor.u32 %v567_v16, %v566_v18 }
  0x31   : > { %v1535_v56 = vmax.f32 %v1503_v44, 0.0  ;;  %v1936_v58 = vpack.c.bf16 %v1534_v2, %v1534_v2  ;;  %v1150_v24 = vadd.f32 %v1118_v5, %v1080_v3  ;;  %v842_v33 = vadd.f32 %v810_v63, %v740_v48 }
  0x32   : > { %v1151_v26 = vadd.f32 %v1119_v4, %v1081_v36  ;;  %v2302_v1 = vunpack.c.l.bf16 %v2257_v25  ;;  %v1188_v9 = vrot.slane %v567_v16, 1  ;;  %v686_v42 = vsel %vm2127_vm4, 0, %v569_v7 }
  0x33   : > { %v1937_v30 = vpack.c.bf16 %v1535_v56, %v1535_v56  ;;  %1695 = vst.msk [vmem:[%s2293_s9] sm:$0xf] %vm1694_vm6, %v1936_v58  ;;  %v1325_v40 = vadd.f32 %v1293_v12, %v1150_v24  ;;  %v741_v50 = vmul.f32 %v2131_v19, %v2192_v59  ;;  %v2312_v5 = vunpack.c.l.bf16 %v686_v42 }
  0x34   : > { %v1326_v41 = vadd.f32 %v1294_v60, %v1151_v26  ;;  %v1189_v4 = vor.u32 %v1188_v9, %v564_v61  ;;  %v2314_v46 = vunpack.c.h.bf16 %v686_v42  ;;  %v811_v52 = vmul.f32 %v2133_v20, %v2251_v15 }
  0x35   : > { %1696 = vst.msk [vmem:[%s2293_s9 + $0x4] sm:$0xf] %vm1694_vm6, %v1937_v30  ;;  %v1395_v0 = vadd.f32 %v1363_v23, %v1325_v40  ;;  %v980_v60 = vmul.f32 %v2137_v22, %v2160_v37  ;;  %v1050_v44 = vmul.f32 %v2147_v28, %v2235_v49  ;;  %v880_v59 = vmul.f32 %v2135_v21, %v2312_v5 }
  0x36   : > { %v1396_v12 = vadd.f32 %v1364_v53, %v1326_v41  ;;  %v843_v16 = vadd.f32 %v811_v52, %v741_v50  ;;  %v881_v61 = vmul.f32 %v2135_v21, %v2314_v46  ;;  %v981_v48 = vmul.f32 %v2137_v22, %v2216_v11  ;;  %v418_v53 = vld [vmem:[%s2110_s25 + $0x20] sm:$0xff]  }
  0x37   : > { %v1465_v63 = vadd.f32 %v1433_v45, %v1395_v0  ;;  %v1120_v2 = vmul.f32 %v2149_v29, %v2302_v1  ;;  %v1241_v37 = vsel %vm2153_vm5, %v1189_v4, 0  ;;  %v912_v3 = vadd.f32 %v880_v59, %v842_v33 }
  0x38   : > { %v1466_v23 = vadd.f32 %v1434_v38, %v1396_v12  ;;  %v913_v36 = vadd.f32 %v881_v61, %v843_v16  ;;  %v2333_v18 = vunpack.c.h.bf16 %v2257_v25  ;;  %v1051_v56 = vmul.f32 %v2147_v28, %v2271_v39 }
  0x39   : > { %v1504_v58 = vadd.f32 %v2267_v13, %v1465_v63  ;;  %v1295_v45 = vmul.f32 %v2179_v51, %v2208_v6  ;;  %v1365_v38 = vmul.f32 %v2190_v57, %v2269_v35  ;;  %v1012_v24 = vadd.f32 %v980_v60, %v912_v3 }
  0x3a   : > { %v1505_v11 = vadd.f32 %v2267_v13, %v1466_v23  ;;  %v2344_v26 = vunpack.c.l.bf16 %v1241_v37  ;;  %v1013_v7 = vadd.f32 %v981_v48, %v913_v36  ;;  %v1121_v25 = vmul.f32 %v2149_v29, %v2333_v18 }
  0x3b   : > { %v1536_v30 = vmax.f32 %v1504_v58, 0.0  ;;  %v2348_v9 = vunpack.c.h.bf16 %v1241_v37  ;;  %v1082_v40 = vadd.f32 %v1050_v44, %v1012_v24  ;;  %v1296_v6 = vmul.f32 %v2179_v51, %v2224_v32 }
  0x3c   : > { %v1537_v33 = vmax.f32 %v1505_v11, 0.0  ;;  %v1083_v41 = vadd.f32 %v1051_v56, %v1013_v7  ;;  %v1366_v42 = vmul.f32 %v2190_v57, %v2277_v54  ;;  %v571_v52 = vshrl.u32 %v418_v53, 16 }
  0x3d   : > { %v1938_v50 = vpack.c.bf16 %v1536_v30, %v1536_v30  ;;  %v574_v0 = vshll.u32 %v418_v53, 16  ;;  %v1152_v12 = vadd.f32 %v1120_v2, %v1082_v40  ;;  %v742_v59 = vmul.f32 %v2131_v19, %v2247_v10 }
  0x3e   : > { %v1939_v4 = vpack.c.bf16 %v1537_v33, %v1537_v33  ;;  %v1153_v60 = vadd.f32 %v1121_v25, %v1083_v41  ;;  %v812_v16 = vmul.f32 %v2133_v20, %v2312_v5  ;;  %v1435_v32 = vmul.f32 %v2197_v62, %v2344_v26 }
  0x3f   : > { %1697 = vst.msk [vmem:[%s2293_s9 + $0x8] sm:$0xf] %vm1694_vm6, %v1938_v50  ;;  %v573_v44 = vrot.slane %v571_v52, 7  ;;  %v1190_v61 = vrot.slane %v574_v0, 1  ;;  %v1327_v48 = vadd.f32 %v1295_v45, %v1152_v12  ;;  %v1436_v23 = vmul.f32 %v2197_v62, %v2348_v9 }
  0x40   : > { %1698 = vst.msk [vmem:[%s2293_s9 + $0xc] sm:$0xf] %vm1694_vm6, %v1939_v4  ;;  %v1328_v63 = vadd.f32 %v1296_v6, %v1153_v60  ;;  %v2366_v2 = vunpack.c.l.bf16 %v418_v53  ;;  %v743_v3 = vmul.f32 %v2131_v19, %v2251_v15  ;;  %v813_v36 = vmul.f32 %v2133_v20, %v2314_v46 }
  0x41   : > { %v576_v10 = vor.u32 %v574_v0, %v573_v44  ;;  %v1191_v37 = vor.u32 %v1190_v61, %v571_v52  ;;  %v1397_v56 = vadd.f32 %v1365_v38, %v1327_v48  ;;  %v844_v11 = vadd.f32 %v812_v16, %v742_v59 }
  0x42   : > { %v1398_v58 = vadd.f32 %v1366_v42, %v1328_v63  ;;  %v982_v45 = vmul.f32 %v2137_v22, %v2235_v49  ;;  %v1052_v7 = vmul.f32 %v2147_v28, %v2302_v1  ;;  %v1122_v25 = vmul.f32 %v2149_v29, %v2366_v2  ;;  %v420_v49 = vld [vmem:[%s2110_s25 + $0x28] sm:$0xff]  }
  0x43   : > { %v687_v24 = vsel %vm2127_vm4, 0, %v576_v10  ;;  %v1297_v15 = vmul.f32 %v2179_v51, %v2269_v35  ;;  %v1467_v30 = vadd.f32 %v1435_v32, %v1397_v56  ;;  %v1242_v40 = vsel %vm2153_vm5, %v1191_v37, 0 }
  0x44   : > { %v1468_v33 = vadd.f32 %v1436_v23, %v1398_v58  ;;  %v2382_v38 = vunpack.c.l.bf16 %v687_v24  ;;  %v1367_v41 = vmul.f32 %v2190_v57, %v2344_v26  ;;  %v2389_v6 = vunpack.c.h.bf16 %v687_v24 }
  0x45   : > { %v845_v42 = vadd.f32 %v813_v36, %v743_v3  ;;  %v2391_v50 = vunpack.c.h.bf16 %v418_v53  ;;  %v1506_v4 = vadd.f32 %v2267_v13, %v1467_v30  ;;  %v983_v0 = vmul.f32 %v2137_v22, %v2271_v39 }
  0x46   : > { %v1507_v35 = vadd.f32 %v2267_v13, %v1468_v33  ;;  %v882_v52 = vmul.f32 %v2135_v21, %v2382_v38  ;;  %v2399_v12 = vunpack.c.l.bf16 %v1242_v40  ;;  %v883_v60 = vmul.f32 %v2135_v21, %v2389_v6 }
  0x47   : > { %v1053_v59 = vmul.f32 %v2147_v28, %v2333_v18  ;;  %v1538_v53 = vmax.f32 %v1506_v4, 0.0  ;;  %v1123_v44 = vmul.f32 %v2149_v29, %v2391_v50  ;;  %v2407_v48 = vunpack.c.h.bf16 %v1242_v40 }
  0x48   : > { %v1539_v16 = vmax.f32 %v1507_v35, 0.0  ;;  %v914_v32 = vadd.f32 %v882_v52, %v844_v11  ;;  %v915_v61 = vadd.f32 %v883_v60, %v845_v42  ;;  %v578_v39 = vshrl.u32 %v420_v49, 16 }
  0x49   : > { %v581_v63 = vshll.u32 %v420_v49, 16  ;;  %v1940_v23 = vpack.c.bf16 %v1538_v53, %v1538_v53  ;;  %v1298_v3 = vmul.f32 %v2179_v51, %v2277_v54  ;;  %v744_v58 = vmul.f32 %v2131_v19, %v2312_v5 }
  0x4a   : > { %v1941_v10 = vpack.c.bf16 %v1539_v16, %v1539_v16  ;;  %v1014_v37 = vadd.f32 %v982_v45, %v914_v32  ;;  %v1015_v36 = vadd.f32 %v983_v0, %v915_v61  ;;  %v580_v56 = vrot.slane %v578_v39, 7 }
  0x4b   : > { %v814_v11 = vmul.f32 %v2133_v20, %v2382_v38  ;;  %1699 = vst.msk [vmem:[%s2293_s9 + $0x10] sm:$0xf] %vm1694_vm6, %v1940_v23  ;;  %v1437_v30 = vmul.f32 %v2197_v62, %v2399_v12  ;;  %v1368_v45 = vmul.f32 %v2190_v57, %v2348_v9  ;;  %v1192_v54 = vrot.slane %v581_v63, 1 }
  0x4c   : > { %1700 = vst.msk [vmem:[%s2293_s9 + $0x14] sm:$0xf] %vm1694_vm6, %v1941_v10  ;;  %v1084_v24 = vadd.f32 %v1052_v7, %v1014_v37  ;;  %v1085_v33 = vadd.f32 %v1053_v59, %v1015_v36  ;;  %v1438_v40 = vmul.f32 %v2197_v62, %v2407_v48  ;;  %v583_v5 = vor.u32 %v581_v63, %v580_v56  ;;  %v2452_v37 = vld [vmem:[%s2110_s25 + $0x30] sm:$0xff]  }
  0x4d   : > { %v2425_v42 = vunpack.c.l.bf16 %v420_v49  ;;  %v1193_v35 = vor.u32 %v1192_v54, %v578_v39  ;;  %v745_v52 = vmul.f32 %v2131_v19, %v2314_v46  ;;  %v815_v7 = vmul.f32 %v2133_v20, %v2389_v6 }
  0x4e   : > { %v1154_v4 = vadd.f32 %v1122_v25, %v1084_v24  ;;  %v1155_v0 = vadd.f32 %v1123_v44, %v1085_v33  ;;  %v688_v60 = vsel %vm2127_vm4, 0, %v583_v5  ;;  %v846_v59 = vadd.f32 %v814_v11, %v744_v58 }
  0x4f   : > { %v984_v53 = vmul.f32 %v2137_v22, %v2302_v1  ;;  %v2435_v32 = vunpack.c.l.bf16 %v688_v60  ;;  %v1243_v25 = vsel %vm2153_vm5, %v1193_v35, 0  ;;  %v2439_v61 = vunpack.c.h.bf16 %v688_v60 }
  0x50   : > { %v1329_v16 = vadd.f32 %v1297_v15, %v1154_v4  ;;  %v1330_v46 = vadd.f32 %v1298_v3, %v1155_v0  ;;  %v1054_v44 = vmul.f32 %v2147_v28, %v2366_v2  ;;  %v1124_v39 = vmul.f32 %v2149_v29, %v2425_v42 }
  0x51   : > { %v847_v63 = vadd.f32 %v815_v7, %v745_v52  ;;  %v884_v1 = vmul.f32 %v2135_v21, %v2435_v32  ;;  %v885_v15 = vmul.f32 %v2135_v21, %v2439_v61  ;;  %v985_v10 = vmul.f32 %v2137_v22, %v2333_v18 }
  0x52   : > { %v1399_v23 = vadd.f32 %v1367_v41, %v1329_v16  ;;  %v1400_v3 = vadd.f32 %v1368_v45, %v1330_v46  ;;  %v2454_v36 = vunpack.c.l.bf16 %v1243_v25  ;;  %v1299_v56 = vmul.f32 %v2179_v51, %v2344_v26 }
  0x53   : > { %v2458_v58 = vunpack.c.h.bf16 %v420_v49  ;;  %v916_v11 = vadd.f32 %v884_v1, %v846_v59  ;;  %v917_v24 = vadd.f32 %v885_v15, %v847_v63  ;;  %v1055_v54 = vmul.f32 %v2147_v28, %v2391_v50 }
  0x54   : > { %v1469_v41 = vadd.f32 %v1437_v30, %v1399_v23  ;;  %v1470_v33 = vadd.f32 %v1438_v40, %v1400_v3  ;;  %v1369_v18 = vmul.f32 %v2190_v57, %v2399_v12  ;;  %v1439_v26 = vmul.f32 %v2197_v62, %v2454_v36 }
  0x55   : > { %v1125_v45 = vmul.f32 %v2149_v29, %v2458_v58  ;;  %v1016_v4 = vadd.f32 %v984_v53, %v916_v11  ;;  %v1017_v49 = vadd.f32 %v985_v10, %v917_v24  ;;  %v2470_v35 = vunpack.c.h.bf16 %v1243_v25 }
  0x56   : > { %v1508_v5 = vadd.f32 %v2267_v13, %v1469_v41  ;;  %v1509_v30 = vadd.f32 %v2267_v13, %v1470_v33  ;;  %v585_v52 = vshrl.u32 %v2452_v37, 16  ;;  %v588_v40 = vshll.u32 %v2452_v37, 16 }
  0x57   : > { %v1086_v0 = vadd.f32 %v1054_v44, %v1016_v4  ;;  %v1087_v60 = vadd.f32 %v1055_v54, %v1017_v49  ;;  %v1300_v59 = vmul.f32 %v2179_v51, %v2348_v9  ;;  %v746_v46 = vmul.f32 %v2131_v19, %v2382_v38 }
  0x58   : > { %v1540_v7 = vmax.f32 %v1508_v5, 0.0  ;;  %v1541_v53 = vmax.f32 %v1509_v30, 0.0  ;;  %v587_v16 = vrot.slane %v585_v52, 7  ;;  %v816_v25 = vmul.f32 %v2133_v20, %v2435_v32 }
  0x59   : > { %v1156_v23 = vadd.f32 %v1124_v39, %v1086_v0  ;;  %v1157_v1 = vadd.f32 %v1125_v45, %v1087_v60  ;;  %v1370_v15 = vmul.f32 %v2190_v57, %v2407_v48  ;;  %v1440_v10 = vmul.f32 %v2197_v62, %v2470_v35 }
  0x5a   : > { %v1942_v63 = vpack.c.bf16 %v1540_v7, %v1540_v7  ;;  %v1943_v44 = vpack.c.bf16 %v1541_v53, %v1541_v53  ;;  %v590_v9 = vor.u32 %v588_v40, %v587_v16  ;;  %v1194_v3 = vrot.slane %v588_v40, 1 }
  0x5b   : > { %v1331_v41 = vadd.f32 %v1299_v56, %v1156_v23  ;;  %v1332_v11 = vadd.f32 %v1300_v59, %v1157_v1  ;;  %v2487_v38 = vunpack.c.l.bf16 %v2452_v37  ;;  %v747_v39 = vmul.f32 %v2131_v19, %v2389_v6  ;;  %v424_v59 = vld [vmem:[%s2110_s25 + $0x38] sm:$0xff]  }
  0x5c   : > { %1701 = vst.msk [vmem:[%s2293_s9 + $0x18] sm:$0xf] %vm1694_vm6, %v1942_v63  ;;  %1702 = vst.msk [vmem:[%s2293_s9 + $0x1c] sm:$0xf] %vm1694_vm6, %v1943_v44  ;;  %v689_v24 = vsel %vm2127_vm4, 0, %v590_v9  ;;  %v848_v54 = vadd.f32 %v816_v25, %v746_v46  ;;  %v1195_v33 = vor.u32 %v1194_v3, %v585_v52  ;;  %v817_v45 = vmul.f32 %v2133_v20, %v2439_v61 }
  0x5d   : > { %v1401_v5 = vadd.f32 %v1369_v18, %v1331_v41  ;;  %v1402_v56 = vadd.f32 %v1370_v15, %v1332_v11  ;;  %v2497_v4 = vunpack.c.l.bf16 %v689_v24  ;;  %v986_v49 = vmul.f32 %v2137_v22, %v2366_v2 }
  0x5e   : > { %v1056_v6 = vmul.f32 %v2147_v28, %v2425_v42  ;;  %v1126_v30 = vmul.f32 %v2149_v29, %v2487_v38  ;;  %v2505_v40 = vunpack.c.h.bf16 %v689_v24  ;;  %v849_v7 = vadd.f32 %v817_v45, %v747_v39 }
  0x5f   : > { %v1471_v52 = vadd.f32 %v1439_v26, %v1401_v5  ;;  %v1472_v0 = vadd.f32 %v1440_v10, %v1402_v56  ;;  %v886_v18 = vmul.f32 %v2135_v21, %v2497_v4  ;;  %v1244_v60 = vsel %vm2153_vm5, %v1195_v33, 0 }
  0x60   : > { %v1301_v2 = vmul.f32 %v2179_v51, %v2399_v12  ;;  %v1371_v53 = vmul.f32 %v2190_v57, %v2454_v36  ;;  %v887_v16 = vmul.f32 %v2135_v21, %v2505_v40  ;;  %v987_v26 = vmul.f32 %v2137_v22, %v2391_v50 }
  0x61   : > { %v1510_v46 = vadd.f32 %v2267_v13, %v1471_v52  ;;  %v1511_v25 = vadd.f32 %v2267_v13, %v1472_v0  ;;  %v918_v63 = vadd.f32 %v886_v18, %v848_v54  ;;  %v2523_v23 = vunpack.c.h.bf16 %v2452_v37 }
  0x62   : > { %v2525_v1 = vunpack.c.l.bf16 %v1244_v60  ;;  %v919_v12 = vadd.f32 %v887_v16, %v849_v7  ;;  %v1057_v15 = vmul.f32 %v2147_v28, %v2458_v58  ;;  %v2531_v41 = vunpack.c.h.bf16 %v1244_v60 }
  0x63   : > { %v1542_v44 = vmax.f32 %v1510_v46, 0.0  ;;  %v1543_v10 = vmax.f32 %v1511_v25, 0.0  ;;  %v1018_v9 = vadd.f32 %v986_v49, %v918_v63  ;;  %v1127_v50 = vmul.f32 %v2149_v29, %v2523_v23 }
  0x64   : > { %v1019_v3 = vadd.f32 %v987_v26, %v919_v12  ;;  %v592_v11 = vshrl.u32 %v424_v59, 16  ;;  %v595_v37 = vshll.u32 %v424_v59, 16  ;;  %v1302_v33 = vmul.f32 %v2179_v51, %v2407_v48 }
  0x65   : > { %v1944_v39 = vpack.c.bf16 %v1542_v44, %v1542_v44  ;;  %v1945_v24 = vpack.c.bf16 %v1543_v10, %v1543_v10  ;;  %v1088_v54 = vadd.f32 %v1056_v6, %v1018_v9  ;;  %v748_v56 = vmul.f32 %v2131_v19, %v2435_v32 }
  0x66   : > { %v1089_v45 = vadd.f32 %v1057_v15, %v1019_v3  ;;  %v594_v5 = vrot.slane %v592_v11, 7  ;;  %v818_v49 = vmul.f32 %v2133_v20, %v2497_v4  ;;  %v1441_v52 = vmul.f32 %v2197_v62, %v2525_v1 }
  0x67   : > { %1703 = vst.msk [vmem:[%s2293_s9 + $0x20] sm:$0xf] %vm1694_vm6, %v1944_v39  ;;  %1704 = vst.msk [vmem:[%s2293_s9 + $0x24] sm:$0xf] %vm1694_vm6, %v1945_v24  ;;  %v1158_v7 = vadd.f32 %v1126_v30, %v1088_v54  ;;  %v1372_v6 = vmul.f32 %v2190_v57, %v2470_v35  ;;  %v1196_v48 = vrot.slane %v595_v37, 1  ;;  %v1442_v18 = vmul.f32 %v2197_v62, %v2531_v41  ;;  %v426_v24 = vld [vmem:[%s2110_s25 + $0x40] sm:$0xff]  }
  0x68   : > { %v1159_v0 = vadd.f32 %v1127_v50, %v1089_v45  ;;  %v597_v32 = vor.u32 %v595_v37, %v594_v5  ;;  %v2549_v60 = vunpack.c.l.bf16 %v424_v59  ;;  %v749_v46 = vmul.f32 %v2131_v19, %v2439_v61 }
  0x69   : > { %v1333_v16 = vadd.f32 %v1301_v2, %v1158_v7  ;;  %v1197_v26 = vor.u32 %v1196_v48, %v592_v11  ;;  %v819_v30 = vmul.f32 %v2133_v20, %v2505_v40  ;;  %v850_v12 = vadd.f32 %v818_v49, %v748_v56 }
  0x6a   : > { %v1334_v25 = vadd.f32 %v1302_v33, %v1159_v0  ;;  %v690_v63 = vsel %vm2127_vm4, 0, %v597_v32  ;;  %v988_v15 = vmul.f32 %v2137_v22, %v2425_v42  ;;  %v1058_v50 = vmul.f32 %v2147_v28, %v2487_v38 }
  0x6b   : > { %v1403_v44 = vadd.f32 %v1371_v53, %v1333_v16  ;;  %v2559_v10 = vunpack.c.l.bf16 %v690_v63  ;;  %v1245_v2 = vsel %vm2153_vm5, %v1197_v26, 0  ;;  %v2563_v9 = vunpack.c.h.bf16 %v690_v63 }
  0x6c   : > { %v1404_v61 = vadd.f32 %v1372_v6, %v1334_v25  ;;  %v1128_v3 = vmul.f32 %v2149_v29, %v2549_v60  ;;  %v851_v11 = vadd.f32 %v819_v30, %v749_v46  ;;  %v989_v39 = vmul.f32 %v2137_v22, %v2458_v58 }
  0x6d   : > { %v1473_v37 = vadd.f32 %v1441_v52, %v1403_v44  ;;  %v888_v42 = vmul.f32 %v2135_v21, %v2559_v10  ;;  %v889_v53 = vmul.f32 %v2135_v21, %v2563_v9  ;;  %v2576_v33 = vunpack.c.l.bf16 %v1245_v2 }
  0x6e   : > { %v1474_v54 = vadd.f32 %v1442_v18, %v1404_v61  ;;  %v1303_v45 = vmul.f32 %v2179_v51, %v2454_v36  ;;  %v2580_v5 = vunpack.c.h.bf16 %v424_v59  ;;  %v1059_v52 = vmul.f32 %v2147_v28, %v2523_v23 }
  0x6f   : > { %v1512_v56 = vadd.f32 %v2267_v13, %v1473_v37  ;;  %v920_v49 = vadd.f32 %v888_v42, %v850_v12  ;;  %v921_v7 = vadd.f32 %v889_v53, %v851_v11  ;;  %v1373_v58 = vmul.f32 %v2190_v57, %v2525_v1 }
  0x70   : > { %v1513_v6 = vadd.f32 %v2267_v13, %v1474_v54  ;;  %v1129_v48 = vmul.f32 %v2149_v29, %v2580_v5  ;;  %v1443_v59 = vmul.f32 %v2197_v62, %v2576_v33  ;;  %v2592_v16 = vunpack.c.h.bf16 %v1245_v2 }
  0x71   : > { %v1544_v0 = vmax.f32 %v1512_v56, 0.0  ;;  %v1020_v36 = vadd.f32 %v988_v15, %v920_v49  ;;  %v1021_v18 = vadd.f32 %v989_v39, %v921_v7  ;;  %v599_v26 = vshrl.u32 %v426_v24, 16 }
  0x72   : > { %v1545_v32 = vmax.f32 %v1513_v6, 0.0  ;;  %v602_v46 = vshll.u32 %v426_v24, 16  ;;  %v1304_v12 = vmul.f32 %v2179_v51, %v2470_v35  ;;  %v750_v15 = vmul.f32 %v2131_v19, %v2497_v4 }
  0x73   : > { %v1946_v30 = vpack.c.bf16 %v1544_v0, %v1544_v0  ;;  %v1090_v25 = vadd.f32 %v1058_v50, %v1020_v36  ;;  %v1091_v63 = vadd.f32 %v1059_v52, %v1021_v18  ;;  %v601_v61 = vrot.slane %v599_v26, 7 }
  0x74   : > { %v1947_v44 = vpack.c.bf16 %v1545_v32, %v1545_v32  ;;  %v820_v11 = vmul.f32 %v2133_v20, %v2559_v10  ;;  %v1374_v42 = vmul.f32 %v2190_v57, %v2531_v41  ;;  %v1198_v50 = vrot.slane %v602_v46, 1 }
  0x75   : > { %1705 = vst.msk [vmem:[%s2293_s9 + $0x28] sm:$0xf] %vm1694_vm6, %v1946_v30  ;;  %v1160_v2 = vadd.f32 %v1128_v3, %v1090_v25  ;;  %v1161_v37 = vadd.f32 %v1129_v48, %v1091_v63  ;;  %v1444_v35 = vmul.f32 %v2197_v62, %v2592_v16  ;;  %v604_v53 = vor.u32 %v602_v46, %v601_v61  ;;  %v428_v63 = vld [vmem:[%s2110_s25 + $0x48] sm:$0xff]  }
  0x76   : > { %1706 = vst.msk [vmem:[%s2293_s9 + $0x2c] sm:$0xf] %vm1694_vm6, %v1947_v44  ;;  %v2608_v39 = vunpack.c.l.bf16 %v426_v24  ;;  %v751_v4 = vmul.f32 %v2131_v19, %v2505_v40  ;;  %v1199_v49 = vor.u32 %v1198_v50, %v599_v26  ;;  %v821_v3 = vmul.f32 %v2133_v20, %v2563_v9 }
  0x77   : > { %v1335_v54 = vadd.f32 %v1303_v45, %v1160_v2  ;;  %v1336_v56 = vadd.f32 %v1304_v12, %v1161_v37  ;;  %v691_v7 = vsel %vm2127_vm4, 0, %v604_v53  ;;  %v852_v52 = vadd.f32 %v820_v11, %v750_v15 }
  0x78   : > { %v990_v6 = vmul.f32 %v2137_v22, %v2487_v38  ;;  %v1060_v48 = vmul.f32 %v2147_v28, %v2549_v60  ;;  %v2620_v40 = vunpack.c.l.bf16 %v691_v7  ;;  %v1130_v45 = vmul.f32 %v2149_v29, %v2608_v39 }
  0x79   : > { %v1405_v0 = vadd.f32 %v1373_v58, %v1335_v54  ;;  %v1406_v36 = vadd.f32 %v1374_v42, %v1336_v56  ;;  %v1246_v18 = vsel %vm2153_vm5, %v1199_v49, 0  ;;  %v1305_v32 = vmul.f32 %v2179_v51, %v2525_v1 }
  0x7a   : > { %v2628_v26 = vunpack.c.h.bf16 %v691_v7  ;;  %v853_v46 = vadd.f32 %v821_v3, %v751_v4  ;;  %v890_v58 = vmul.f32 %v2135_v21, %v2620_v40  ;;  %v1375_v25 = vmul.f32 %v2190_v57, %v2576_v33 }
  0x7b   : > { %v1475_v38 = vadd.f32 %v1443_v59, %v1405_v0  ;;  %v1476_v30 = vadd.f32 %v1444_v35, %v1406_v36  ;;  %v2637_v44 = vunpack.c.h.bf16 %v426_v24  ;;  %v991_v1 = vmul.f32 %v2137_v22, %v2523_v23 }
  0x7c   : > { %v891_v12 = vmul.f32 %v2135_v21, %v2628_v26  ;;  %v1061_v61 = vmul.f32 %v2147_v28, %v2580_v5  ;;  %v922_v11 = vadd.f32 %v890_v58, %v852_v52  ;;  %v2645_v2 = vunpack.c.l.bf16 %v1246_v18 }
  0x7d   : > { %v1514_v59 = vadd.f32 %v2267_v13, %v1475_v38  ;;  %v1515_v15 = vadd.f32 %v2267_v13, %v1476_v30  ;;  %v1131_v42 = vmul.f32 %v2149_v29, %v2637_v44  ;;  %v2649_v50 = vunpack.c.h.bf16 %v1246_v18 }
  0x7e   : > { %v923_v37 = vadd.f32 %v891_v12, %v853_v46  ;;  %v1022_v23 = vadd.f32 %v990_v6, %v922_v11  ;;  %v1445_v53 = vmul.f32 %v2197_v62, %v2645_v2  ;;  %v606_v54 = vshrl.u32 %v428_v63, 16 }
  0x7f   : > { %v1546_v24 = vmax.f32 %v1514_v59, 0.0  ;;  %v1547_v35 = vmax.f32 %v1515_v15, 0.0  ;;  %v609_v56 = vshll.u32 %v428_v63, 16  ;;  %v752_v49 = vmul.f32 %v2131_v19, %v2559_v10 }
  0x80   : > { %v1023_v4 = vadd.f32 %v991_v1, %v923_v37  ;;  %v1092_v52 = vadd.f32 %v1060_v48, %v1022_v23  ;;  %v822_v0 = vmul.f32 %v2133_v20, %v2620_v40  ;;  %v1306_v18 = vmul.f32 %v2179_v51, %v2531_v41 }
  0x81   : > { %v1948_v3 = vpack.c.bf16 %v1546_v24, %v1546_v24  ;;  %v1949_v7 = vpack.c.bf16 %v1547_v35, %v1547_v35  ;;  %v1376_v6 = vmul.f32 %v2190_v57, %v2592_v16  ;;  %v608_v46 = vrot.slane %v606_v54, 7 }
  0x82   : > { %v1093_v36 = vadd.f32 %v1061_v61, %v1023_v4  ;;  %v1162_v38 = vadd.f32 %v1130_v45, %v1092_v52  ;;  %v1446_v10 = vmul.f32 %v2197_v62, %v2649_v50  ;;  %v2667_v48 = vunpack.c.l.bf16 %v428_v63 }
  0x83   : > { %1707 = vst.msk [vmem:[%s2293_s9 + $0x30] sm:$0xf] %vm1694_vm6, %v1948_v3  ;;  %1708 = vst.msk [vmem:[%s2293_s9 + $0x34] sm:$0xf] %vm1694_vm6, %v1949_v7  ;;  %v1200_v30 = vrot.slane %v609_v56, 1  ;;  %v611_v12 = vor.u32 %v609_v56, %v608_v46  ;;  %v753_v41 = vmul.f32 %v2131_v19, %v2563_v9  ;;  %v823_v1 = vmul.f32 %v2133_v20, %v2628_v26 }
  0x84   : > { %v1163_v58 = vadd.f32 %v1131_v42, %v1093_v36  ;;  %v1337_v61 = vadd.f32 %v1305_v32, %v1162_v38  ;;  %v854_v59 = vadd.f32 %v822_v0, %v752_v49  ;;  %v992_v45 = vmul.f32 %v2137_v22, %v2549_v60  ;;  %v430_v49 = vld [vmem:[%s2110_s25 + $0x50] sm:$0xff]  }
  0x85   : > { %v1201_v15 = vor.u32 %v1200_v30, %v606_v54  ;;  %v692_v37 = vsel %vm2127_vm4, 0, %v611_v12  ;;  %v1062_v42 = vmul.f32 %v2147_v28, %v2608_v39  ;;  %v855_v24 = vadd.f32 %v823_v1, %v753_v41 }
  0x86   : > { %v1338_v11 = vadd.f32 %v1306_v18, %v1163_v58  ;;  %v1407_v35 = vadd.f32 %v1375_v25, %v1337_v61  ;;  %v2679_v9 = vunpack.c.l.bf16 %v692_v37  ;;  %v2683_v23 = vunpack.c.h.bf16 %v692_v37 }
  0x87   : > { %v1247_v32 = vsel %vm2153_vm5, %v1201_v15, 0  ;;  %v1132_v60 = vmul.f32 %v2149_v29, %v2667_v48  ;;  %v1307_v54 = vmul.f32 %v2179_v51, %v2576_v33  ;;  %v1377_v56 = vmul.f32 %v2190_v57, %v2645_v2 }
  0x88   : > { %v1408_v4 = vadd.f32 %v1376_v6, %v1338_v11  ;;  %v1477_v3 = vadd.f32 %v1445_v53, %v1407_v35  ;;  %v892_v25 = vmul.f32 %v2135_v21, %v2679_v9  ;;  %v893_v7 = vmul.f32 %v2135_v21, %v2683_v23 }
  0x89   : > { %v993_v52 = vmul.f32 %v2137_v22, %v2580_v5  ;;  %v2698_v36 = vunpack.c.l.bf16 %v1247_v32  ;;  %v2700_v18 = vunpack.c.h.bf16 %v428_v63  ;;  %v1063_v33 = vmul.f32 %v2147_v28, %v2637_v44 }
  0x8a   : > { %v1478_v0 = vadd.f32 %v1446_v10, %v1408_v4  ;;  %v1516_v6 = vadd.f32 %v2267_v13, %v1477_v3  ;;  %v924_v53 = vadd.f32 %v892_v25, %v854_v59  ;;  %v925_v46 = vadd.f32 %v893_v7, %v855_v24 }
  0x8b   : > { %v1133_v30 = vmul.f32 %v2149_v29, %v2700_v18  ;;  %v2708_v58 = vunpack.c.h.bf16 %v1247_v32  ;;  %v1308_v5 = vmul.f32 %v2179_v51, %v2592_v16  ;;  %v613_v41 = vshrl.u32 %v430_v49, 16 }
  0x8c   : > { %v1517_v38 = vadd.f32 %v2267_v13, %v1478_v0  ;;  %v1548_v10 = vmax.f32 %v1516_v6, 0.0  ;;  %v1024_v63 = vadd.f32 %v992_v45, %v924_v53  ;;  %v1025_v12 = vadd.f32 %v993_v52, %v925_v46 }
  0x8d   : > { %v616_v61 = vshll.u32 %v430_v49, 16  ;;  %v754_v59 = vmul.f32 %v2131_v19, %v2620_v40  ;;  %v824_v15 = vmul.f32 %v2133_v20, %v2679_v9  ;;  %v615_v35 = vrot.slane %v613_v41, 7 }
  0x8e   : > { %v1549_v1 = vmax.f32 %v1517_v38, 0.0  ;;  %v1950_v11 = vpack.c.bf16 %v1548_v10, %v1548_v10  ;;  %v1094_v37 = vadd.f32 %v1062_v42, %v1024_v63  ;;  %v1095_v24 = vadd.f32 %v1063_v33, %v1025_v12 }
  0x8f   : > { %v1447_v16 = vmul.f32 %v2197_v62, %v2698_v36  ;;  %v1378_v45 = vmul.f32 %v2190_v57, %v2649_v50  ;;  %v1202_v4 = vrot.slane %v616_v61, 1  ;;  %v1448_v40 = vmul.f32 %v2197_v62, %v2708_v58 }
  0x90   : > { %v1951_v32 = vpack.c.bf16 %v1549_v1, %v1549_v1  ;;  %1709 = vst.msk [vmem:[%s2293_s9 + $0x38] sm:$0xf] %vm1694_vm6, %v1950_v11  ;;  %v1164_v3 = vadd.f32 %v1132_v60, %v1094_v37  ;;  %v1165_v25 = vadd.f32 %v1133_v30, %v1095_v24  ;;  %v618_v7 = vor.u32 %v616_v61, %v615_v35 }
  0x91   : > { %v856_v42 = vadd.f32 %v824_v15, %v754_v59  ;;  %v2726_v52 = vunpack.c.l.bf16 %v430_v49  ;;  %v755_v0 = vmul.f32 %v2131_v19, %v2628_v26  ;;  %v825_v33 = vmul.f32 %v2133_v20, %v2683_v23 }
  0x92   : > { %1710 = vst.msk [vmem:[%s2293_s9 + $0x3c] sm:$0xf] %vm1694_vm6, %v1951_v32  ;;  %v1339_v6 = vadd.f32 %v1307_v54, %v1164_v3  ;;  %v1340_v53 = vadd.f32 %v1308_v5, %v1165_v25  ;;  %v693_v60 = vsel %vm2127_vm4, 0, %v618_v7  ;;  %v994_v46 = vmul.f32 %v2137_v22, %v2608_v39 }
  0x93   : > { %v2736_v38 = vunpack.c.l.bf16 %v693_v60  ;;  %v1203_v30 = vor.u32 %v1202_v4, %v613_v41  ;;  %v2738_v10 = vunpack.c.h.bf16 %v693_v60  ;;  %v857_v63 = vadd.f32 %v825_v33, %v755_v0 }
  0x94   : > { %v1409_v12 = vadd.f32 %v1377_v56, %v1339_v6  ;;  %v1410_v26 = vadd.f32 %v1378_v45, %v1340_v53  ;;  %v1064_v1 = vmul.f32 %v2147_v28, %v2667_v48  ;;  %v1134_v54 = vmul.f32 %v2149_v29, %v2726_v52  ;;  %v432_v56 = vld [vmem:[%s2110_s25 + $0x58] sm:$0xff]  }
  0x95   : > { %v894_v5 = vmul.f32 %v2135_v21, %v2736_v38  ;;  %v1309_v39 = vmul.f32 %v2179_v51, %v2645_v2  ;;  %v895_v41 = vmul.f32 %v2135_v21, %v2738_v10  ;;  %v995_v61 = vmul.f32 %v2137_v22, %v2637_v44 }
  0x96   : > { %v1479_v59 = vadd.f32 %v1447_v16, %v1409_v12  ;;  %v1480_v15 = vadd.f32 %v1448_v40, %v1410_v26  ;;  %v1379_v11 = vmul.f32 %v2190_v57, %v2698_v36  ;;  %v2755_v37 = vunpack.c.h.bf16 %v430_v49 }
  0x97   : > { %v926_v24 = vadd.f32 %v894_v5, %v856_v42  ;;  %v1248_v35 = vsel %vm2153_vm5, %v1203_v30, 0  ;;  %v927_v32 = vadd.f32 %v895_v41, %v857_v63  ;;  %v1065_v2 = vmul.f32 %v2147_v28, %v2700_v18 }
  0x98   : > { %v1518_v45 = vadd.f32 %v2267_v13, %v1479_v59  ;;  %v1519_v44 = vadd.f32 %v2267_v13, %v1480_v15  ;;  %v1135_v16 = vmul.f32 %v2149_v29, %v2755_v37  ;;  %v756_v49 = vmul.f32 %v2131_v19, %v2679_v9 }
  0x99   : > { %v1026_v4 = vadd.f32 %v994_v46, %v926_v24  ;;  %v1027_v3 = vadd.f32 %v995_v61, %v927_v32  ;;  %v826_v25 = vmul.f32 %v2133_v20, %v2736_v38  ;;  %v620_v42 = vshrl.u32 %v432_v56, 16 }
  0x9a   : > { %v1550_v40 = vmax.f32 %v1518_v45, 0.0  ;;  %v1551_v7 = vmax.f32 %v1519_v44, 0.0  ;;  %v623_v0 = vshll.u32 %v432_v56, 16  ;;  %v2769_v6 = vunpack.c.l.bf16 %v1248_v35 }
  0x9b   : > { %v1096_v33 = vadd.f32 %v1064_v1, %v1026_v4  ;;  %v1097_v13 = vadd.f32 %v1065_v2, %v1027_v3  ;;  %v1310_v53 = vmul.f32 %v2179_v51, %v2649_v50  ;;  %v2773_v30 = vunpack.c.h.bf16 %v1248_v35 }
  0x9c   : > { %v1952_v60 = vpack.c.bf16 %v1550_v40, %v1550_v40  ;;  %v1953_v46 = vpack.c.bf16 %v1551_v7, %v1551_v7  ;;  %v622_v9 = vrot.slane %v620_v42, 7  ;;  %v1449_v12 = vmul.f32 %v2197_v62, %v2769_v6 }
  0x9d   : > { %v1166_v63 = vadd.f32 %v1134_v54, %v1096_v33  ;;  %v1167_v26 = vadd.f32 %v1135_v16, %v1097_v13  ;;  %v1380_v5 = vmul.f32 %v2190_v57, %v2708_v58  ;;  %v1450_v50 = vmul.f32 %v2197_v62, %v2773_v30 }
  0x9e   : > { %1711 = vst.msk [vmem:[%s2293_s9 + $0x40] sm:$0xf] %vm1694_vm6, %v1952_v60  ;;  %1712 = vst.msk [vmem:[%s2293_s9 + $0x44] sm:$0xf] %vm1694_vm6, %v1953_v46  ;;  %v625_v1 = vor.u32 %v623_v0, %v622_v9  ;;  %v858_v41 = vadd.f32 %v826_v25, %v756_v49  ;;  %v1204_v61 = vrot.slane %v623_v0, 1  ;;  %v757_v54 = vmul.f32 %v2131_v19, %v2683_v23 }
  0x9f   : > { %v1341_v59 = vadd.f32 %v1309_v39, %v1166_v63  ;;  %v1342_v15 = vadd.f32 %v1310_v53, %v1167_v26  ;;  %v827_v24 = vmul.f32 %v2133_v20, %v2738_v10  ;;  %v2791_v32 = vunpack.c.l.bf16 %v432_v56  ;;  %v2821_v53 = vld [vmem:[%s3129_s4] ss:$0 sm:$0xff] }
  0xa0   : > { %v694_v35 = vsel %vm2127_vm4, 0, %v625_v1  ;;  %v996_v2 = vmul.f32 %v2137_v22, %v2667_v48  ;;  %v1205_v45 = vor.u32 %v1204_v61, %v620_v42  ;;  %v1066_v23 = vmul.f32 %v2147_v28, %v2726_v52  ;;  %v434_v42 = vld [vmem:[%s2110_s25 + $0x60] sm:$0xff]  }
  0xa1   : > { %v1411_v44 = vadd.f32 %v1379_v11, %v1341_v59  ;;  %v1412_v16 = vadd.f32 %v1380_v5, %v1342_v15  ;;  %v2795_v39 = vunpack.c.l.bf16 %v694_v35  ;;  %v1136_v4 = vmul.f32 %v2149_v29, %v2791_v32 }
  0xa2   : > { %v1311_v3 = vmul.f32 %v2179_v51, %v2698_v36  ;;  %v2803_v49 = vunpack.c.h.bf16 %v694_v35  ;;  %v859_v25 = vadd.f32 %v827_v24, %v757_v54  ;;  %v1249_v11 = vsel %vm2153_vm5, %v1205_v45, 0 }
  0xa3   : > { %v1481_v40 = vadd.f32 %v1449_v12, %v1411_v44  ;;  %v1482_v7 = vadd.f32 %v1450_v50, %v1412_v16  ;;  %v896_v48 = vmul.f32 %v2135_v21, %v2795_v39  ;;  %v1381_v0 = vmul.f32 %v2190_v57, %v2769_v6 }
  0xa4   : > { %v897_v33 = vmul.f32 %v2135_v21, %v2803_v49  ;;  %v2814_v13 = vunpack.c.h.bf16 %v432_v56  ;;  %v997_v36 = vmul.f32 %v2137_v22, %v2700_v18  ;;  %v1067_v63 = vmul.f32 %v2147_v28, %v2755_v37 }
  0xa5   : > { %v1520_v60 = vadd.f32 %v2821_v53, %v1481_v40  ;;  %v1521_v46 = vadd.f32 %v2821_v53, %v1482_v7  ;;  %v928_v9 = vadd.f32 %v896_v48, %v858_v41  ;;  %v2827_v12 = vunpack.c.l.bf16 %v1249_v11 }
  0xa6   : > { %v929_v56 = vadd.f32 %v897_v33, %v859_v25  ;;  %v1137_v26 = vmul.f32 %v2149_v29, %v2814_v13  ;;  %v2831_v1 = vunpack.c.h.bf16 %v1249_v11  ;;  %v627_v59 = vshrl.u32 %v434_v42, 16 }
  0xa7   : > { %v1552_v18 = vmax.f32 %v1520_v60, 0.0  ;;  %v1553_v5 = vmax.f32 %v1521_v46, 0.0  ;;  %v1028_v50 = vadd.f32 %v996_v2, %v928_v9  ;;  %v630_v15 = vshll.u32 %v434_v42, 16 }
  0xa8   : > { %v1029_v61 = vadd.f32 %v997_v36, %v929_v56  ;;  %v758_v41 = vmul.f32 %v2131_v19, %v2736_v38  ;;  %v828_v45 = vmul.f32 %v2133_v20, %v2795_v39  ;;  %v1312_v16 = vmul.f32 %v2179_v51, %v2708_v58 }
  0xa9   : > { %v1954_v54 = vpack.c.bf16 %v1552_v18, %v1552_v18  ;;  %v1955_v24 = vpack.c.bf16 %v1553_v5, %v1553_v5  ;;  %v1098_v35 = vadd.f32 %v1066_v23, %v1028_v50  ;;  %v1382_v2 = vmul.f32 %v2190_v57, %v2773_v30 }
  0xaa   : > { %v1099_v44 = vadd.f32 %v1067_v63, %v1029_v61  ;;  %v629_v25 = vrot.slane %v627_v59, 7  ;;  %v1451_v38 = vmul.f32 %v2197_v62, %v2827_v12  ;;  %v1452_v23 = vmul.f32 %v2197_v62, %v2831_v1 }
  0xab   : > { %1713 = vst.msk [vmem:[%s2293_s9 + $0x48] sm:$0xf] %vm1694_vm6, %v1954_v54  ;;  %1714 = vst.msk [vmem:[%s2293_s9 + $0x4c] sm:$0xf] %vm1694_vm6, %v1955_v24  ;;  %v1168_v40 = vadd.f32 %v1136_v4, %v1098_v35  ;;  %v1206_v7 = vrot.slane %v630_v15, 1  ;;  %v2849_v33 = vunpack.c.l.bf16 %v434_v42  ;;  %v759_v58 = vmul.f32 %v2131_v19, %v2738_v10  ;;  %v436_v24 = vld [vmem:[%s2110_s25 + $0x68] sm:$0xff]  }
  0xac   : > { %v1169_v48 = vadd.f32 %v1137_v26, %v1099_v44  ;;  %v632_v11 = vor.u32 %v630_v15, %v629_v25  ;;  %v860_v60 = vadd.f32 %v828_v45, %v758_v41  ;;  %v829_v4 = vmul.f32 %v2133_v20, %v2803_v49 }
  0xad   : > { %v1343_v36 = vadd.f32 %v1311_v3, %v1168_v40  ;;  %v1207_v46 = vor.u32 %v1206_v7, %v627_v59  ;;  %v998_v56 = vmul.f32 %v2137_v22, %v2726_v52  ;;  %v1068_v26 = vmul.f32 %v2147_v28, %v2791_v32 }
  0xae   : > { %v1344_v9 = vadd.f32 %v1312_v16, %v1169_v48  ;;  %v695_v63 = vsel %vm2127_vm4, 0, %v632_v11  ;;  %v1138_v10 = vmul.f32 %v2149_v29, %v2849_v33  ;;  %v1313_v59 = vmul.f32 %v2179_v51, %v2769_v6 }
  0xaf   : > { %v1413_v18 = vadd.f32 %v1381_v0, %v1343_v36  ;;  %v2861_v5 = vunpack.c.l.bf16 %v695_v63  ;;  %v2865_v3 = vunpack.c.h.bf16 %v695_v63  ;;  %v1250_v61 = vsel %vm2153_vm5, %v1207_v46, 0 }
  0xb0   : > { %v1414_v50 = vadd.f32 %v1382_v2, %v1344_v9  ;;  %v861_v15 = vadd.f32 %v829_v4, %v759_v58  ;;  %v999_v54 = vmul.f32 %v2137_v22, %v2755_v37  ;;  %v1383_v45 = vmul.f32 %v2190_v57, %v2827_v12 }
  0xb1   : > { %v1483_v52 = vadd.f32 %v1451_v38, %v1413_v18  ;;  %v898_v41 = vmul.f32 %v2135_v21, %v2861_v5  ;;  %v899_v0 = vmul.f32 %v2135_v21, %v2865_v3  ;;  %v2880_v44 = vunpack.c.h.bf16 %v434_v42 }
  0xb2   : > { %v1484_v35 = vadd.f32 %v1452_v23, %v1414_v50  ;;  %v1069_v6 = vmul.f32 %v2147_v28, %v2814_v13  ;;  %v2885_v25 = vunpack.c.l.bf16 %v1250_v61  ;;  %v2890_v23 = vunpack.c.h.bf16 %v1250_v61 }
  0xb3   : > { %v1522_v16 = vadd.f32 %v2821_v53, %v1483_v52  ;;  %v930_v2 = vadd.f32 %v898_v41, %v860_v60  ;;  %v931_v40 = vadd.f32 %v899_v0, %v861_v15  ;;  %v1139_v37 = vmul.f32 %v2149_v29, %v2880_v44 }
  0xb4   : > { %v1523_v38 = vadd.f32 %v2821_v53, %v1484_v35  ;;  %v1314_v11 = vmul.f32 %v2179_v51, %v2773_v30  ;;  %v634_v36 = vshrl.u32 %v436_v24, 16  ;;  %v637_v60 = vshll.u32 %v436_v24, 16 }
  0xb5   : > { %v1554_v7 = vmax.f32 %v1522_v16, 0.0  ;;  %v1030_v42 = vadd.f32 %v998_v56, %v930_v2  ;;  %v1031_v48 = vadd.f32 %v999_v54, %v931_v40  ;;  %v760_v46 = vmul.f32 %v2131_v19, %v2795_v39 }
  0xb6   : > { %v1555_v58 = vmax.f32 %v1523_v38, 0.0  ;;  %v830_v18 = vmul.f32 %v2133_v20, %v2861_v5  ;;  %v1453_v56 = vmul.f32 %v2197_v62, %v2885_v25  ;;  %v1384_v30 = vmul.f32 %v2190_v57, %v2831_v1 }
  0xb7   : > { %v1956_v4 = vpack.c.bf16 %v1554_v7, %v1554_v7  ;;  %v1100_v9 = vadd.f32 %v1068_v26, %v1030_v42  ;;  %v1101_v63 = vadd.f32 %v1069_v6, %v1031_v48  ;;  %v636_v61 = vrot.slane %v634_v36, 7 }
  0xb8   : > { %v1957_v50 = vpack.c.bf16 %v1555_v58, %v1555_v58  ;;  %v1454_v39 = vmul.f32 %v2197_v62, %v2890_v23  ;;  %v1208_v26 = vrot.slane %v637_v60, 1  ;;  %v2908_v0 = vunpack.c.l.bf16 %v436_v24 }
  0xb9   : > { %1715 = vst.msk [vmem:[%s2293_s9 + $0x50] sm:$0xf] %vm1694_vm6, %v1956_v4  ;;  %v1170_v15 = vadd.f32 %v1138_v10, %v1100_v9  ;;  %v1171_v52 = vadd.f32 %v1139_v37, %v1101_v63  ;;  %v639_v41 = vor.u32 %v637_v60, %v636_v61  ;;  %v761_v54 = vmul.f32 %v2131_v19, %v2803_v49  ;;  %v438_v60 = vld [vmem:[%s2110_s25 + $0x70] sm:$0xff]  }
  0xba   : > { %1716 = vst.msk [vmem:[%s2293_s9 + $0x54] sm:$0xf] %vm1694_vm6, %v1957_v50  ;;  %v831_v35 = vmul.f32 %v2133_v20, %v2865_v3  ;;  %v862_v10 = vadd.f32 %v830_v18, %v760_v46  ;;  %v1209_v2 = vor.u32 %v1208_v26, %v634_v36  ;;  %v1000_v38 = vmul.f32 %v2137_v22, %v2791_v32 }
  0xbb   : > { %v1345_v6 = vadd.f32 %v1313_v59, %v1170_v15  ;;  %v1346_v16 = vadd.f32 %v1314_v11, %v1171_v52  ;;  %v696_v40 = vsel %vm2127_vm4, 0, %v639_v41  ;;  %v1070_v37 = vmul.f32 %v2147_v28, %v2849_v33 }
  0xbc   : > { %v1140_v49 = vmul.f32 %v2149_v29, %v2908_v0  ;;  %v2922_v48 = vunpack.c.l.bf16 %v696_v40  ;;  %v1251_v59 = vsel %vm2153_vm5, %v1209_v2, 0  ;;  %v1315_v11 = vmul.f32 %v2179_v51, %v2827_v12 }
  0xbd   : > { %v1415_v7 = vadd.f32 %v1383_v45, %v1345_v6  ;;  %v1416_v42 = vadd.f32 %v1384_v30, %v1346_v16  ;;  %v1385_v58 = vmul.f32 %v2190_v57, %v2885_v25  ;;  %v2930_v32 = vunpack.c.h.bf16 %v696_v40 }
  0xbe   : > { %v863_v36 = vadd.f32 %v831_v35, %v761_v54  ;;  %v900_v45 = vmul.f32 %v2135_v21, %v2922_v48  ;;  %v2935_v9 = vunpack.c.h.bf16 %v436_v24  ;;  %v2937_v63 = vunpack.c.l.bf16 %v1251_v59 }
  0xbf   : > { %v1485_v46 = vadd.f32 %v1453_v56, %v1415_v7  ;;  %v1486_v4 = vadd.f32 %v1454_v39, %v1416_v42  ;;  %v901_v18 = vmul.f32 %v2135_v21, %v2930_v32  ;;  %v1001_v12 = vmul.f32 %v2137_v22, %v2814_v13 }
  0xc0   : > { %v1071_v50 = vmul.f32 %v2147_v28, %v2880_v44  ;;  %v932_v61 = vadd.f32 %v900_v45, %v862_v10  ;;  %v1141_v24 = vmul.f32 %v2149_v29, %v2935_v9  ;;  %v2949_v52 = vunpack.c.h.bf16 %v1251_v59 }
  0xc1   : > { %v1524_v30 = vadd.f32 %v2821_v53, %v1485_v46  ;;  %v1525_v56 = vadd.f32 %v2821_v53, %v1486_v4  ;;  %v933_v15 = vadd.f32 %v901_v18, %v863_v36  ;;  %v1316_v39 = vmul.f32 %v2179_v51, %v2831_v1 }
  0xc2   : > { %v1032_v41 = vadd.f32 %v1000_v38, %v932_v61  ;;  %v641_v54 = vshrl.u32 %v438_v60, 16  ;;  %v644_v6 = vshll.u32 %v438_v60, 16  ;;  %v762_v16 = vmul.f32 %v2131_v19, %v2861_v5 }
  0xc3   : > { %v1556_v26 = vmax.f32 %v1524_v30, 0.0  ;;  %v1557_v13 = vmax.f32 %v1525_v56, 0.0  ;;  %v1033_v35 = vadd.f32 %v1001_v12, %v933_v15  ;;  %v832_v10 = vmul.f32 %v2133_v20, %v2922_v48 }
  0xc4   : > { %v1102_v7 = vadd.f32 %v1070_v37, %v1032_v41  ;;  %v643_v42 = vrot.slane %v641_v54, 7  ;;  %v1455_v1 = vmul.f32 %v2197_v62, %v2937_v63  ;;  %v1386_v38 = vmul.f32 %v2190_v57, %v2890_v23 }
  0xc5   : > { %v1958_v2 = vpack.c.bf16 %v1556_v26, %v1556_v26  ;;  %v1959_v40 = vpack.c.bf16 %v1557_v13, %v1557_v13  ;;  %v1103_v59 = vadd.f32 %v1071_v50, %v1033_v35  ;;  %v1210_v36 = vrot.slane %v644_v6, 1 }
  0xc6   : > { %v1172_v5 = vadd.f32 %v1140_v49, %v1102_v7  ;;  %v1456_v46 = vmul.f32 %v2197_v62, %v2949_v52  ;;  %v646_v4 = vor.u32 %v644_v6, %v643_v42  ;;  %v2967_v45 = vunpack.c.l.bf16 %v438_v60 }
  0xc7   : > { %1717 = vst.msk [vmem:[%s2293_s9 + $0x58] sm:$0xf] %vm1694_vm6, %v1958_v2  ;;  %1718 = vst.msk [vmem:[%s2293_s9 + $0x5c] sm:$0xf] %vm1694_vm6, %v1959_v40  ;;  %v1173_v37 = vadd.f32 %v1141_v24, %v1103_v59  ;;  %v1211_v18 = vor.u32 %v1210_v36, %v641_v54  ;;  %v763_v12 = vmul.f32 %v2131_v19, %v2865_v3 }
  0xc8   : > { %v833_v50 = vmul.f32 %v2133_v20, %v2930_v32  ;;  %v1347_v30 = vadd.f32 %v1315_v11, %v1172_v5  ;;  %v697_v56 = vsel %vm2127_vm4, 0, %v646_v4  ;;  %v864_v49 = vadd.f32 %v832_v10, %v762_v16  ;;  %v2994_v16 = vld [vmem:[%s2110_s25 + $0x78] sm:$0xff]  }
  0xc9   : > { %v1002_v61 = vmul.f32 %v2137_v22, %v2849_v33  ;;  %v1348_v15 = vadd.f32 %v1316_v39, %v1173_v37  ;;  %v2977_v26 = vunpack.c.l.bf16 %v697_v56  ;;  %v1072_v24 = vmul.f32 %v2147_v28, %v2908_v0 }
  0xca   : > { %v2981_v13 = vunpack.c.h.bf16 %v697_v56  ;;  %v1417_v3 = vadd.f32 %v1385_v58, %v1347_v30  ;;  %v1142_v11 = vmul.f32 %v2149_v29, %v2967_v45  ;;  %v865_v41 = vadd.f32 %v833_v50, %v763_v12 }
  0xcb   : > { %v1003_v54 = vmul.f32 %v2137_v22, %v2880_v44  ;;  %v1418_v35 = vadd.f32 %v1386_v38, %v1348_v15  ;;  %v902_v33 = vmul.f32 %v2135_v21, %v2977_v26  ;;  %v1252_v39 = vsel %vm2153_vm5, %v1211_v18, 0 }
  0xcc   : > { %v903_v6 = vmul.f32 %v2135_v21, %v2981_v13  ;;  %v1487_v58 = vadd.f32 %v1455_v1, %v1417_v3  ;;  %v1317_v10 = vmul.f32 %v2179_v51, %v2885_v25  ;;  %v1387_v2 = vmul.f32 %v2190_v57, %v2937_v63 }
  0xcd   : > { %v3000_v44 = vunpack.c.h.bf16 %v438_v60  ;;  %v1488_v40 = vadd.f32 %v1456_v46, %v1418_v35  ;;  %v934_v7 = vadd.f32 %v902_v33, %v864_v49  ;;  %v1073_v59 = vmul.f32 %v2147_v28, %v2935_v9 }
  0xce   : > { %v935_v42 = vadd.f32 %v903_v6, %v865_v41  ;;  %v1526_v38 = vadd.f32 %v2821_v53, %v1487_v58  ;;  %v3005_v36 = vunpack.c.l.bf16 %v1252_v39  ;;  %v3010_v37 = vunpack.c.h.bf16 %v1252_v39 }
  0xcf   : > { %v1143_v1 = vmul.f32 %v2149_v29, %v3000_v44  ;;  %v1527_v25 = vadd.f32 %v2821_v53, %v1488_v40  ;;  %v1034_v5 = vadd.f32 %v1002_v61, %v934_v7  ;;  %v1318_v46 = vmul.f32 %v2179_v51, %v2890_v23 }
  0xd0   : > { %v1035_v4 = vadd.f32 %v1003_v54, %v935_v42  ;;  %v1558_v60 = vmax.f32 %v1526_v38, 0.0  ;;  %v648_v18 = vshrl.u32 %v2994_v16, 16  ;;  %v651_v12 = vshll.u32 %v2994_v16, 16 }
  0xd1   : > { %v1559_v50 = vmax.f32 %v1527_v25, 0.0  ;;  %v1104_v30 = vadd.f32 %v1072_v24, %v1034_v5  ;;  %v1388_v49 = vmul.f32 %v2190_v57, %v2949_v52  ;;  %v764_v3 = vmul.f32 %v2131_v19, %v2922_v48 }
  0xd2   : > { %v1105_v56 = vadd.f32 %v1073_v59, %v1035_v4  ;;  %v1960_v61 = vpack.c.bf16 %v1558_v60, %v1558_v60  ;;  %v650_v15 = vrot.slane %v648_v18, 7  ;;  %v834_v41 = vmul.f32 %v2133_v20, %v2977_v26 }
  0xd3   : > { %v1961_v23 = vpack.c.bf16 %v1559_v50, %v1559_v50  ;;  %v1174_v54 = vadd.f32 %v1142_v11, %v1104_v30  ;;  %v1212_v33 = vrot.slane %v651_v12, 1  ;;  %v1457_v24 = vmul.f32 %v2197_v62, %v3005_v36 }
  0xd4   : > { %v1175_v35 = vadd.f32 %v1143_v1, %v1105_v56  ;;  %1719 = vst.msk [vmem:[%s2293_s9 + $0x60] sm:$0xf] %vm1694_vm6, %v1960_v61  ;;  %v1458_v39 = vmul.f32 %v2197_v62, %v3010_v37  ;;  %v653_v6 = vor.u32 %v651_v12, %v650_v15  ;;  %v1004_v58 = vmul.f32 %v2137_v22, %v2908_v0 }
  0xd5   : > { %1720 = vst.msk [vmem:[%s2293_s9 + $0x64] sm:$0xf] %vm1694_vm6, %v1961_v23  ;;  %v1349_v48 = vadd.f32 %v1317_v10, %v1174_v54  ;;  %v1213_v7 = vor.u32 %v1212_v33, %v648_v18  ;;  %v765_v11 = vmul.f32 %v2131_v19, %v2930_v32  ;;  %v866_v59 = vadd.f32 %v834_v41, %v764_v3 }
  0xd6   : > { %v1350_v40 = vadd.f32 %v1318_v46, %v1175_v35  ;;  %v698_v42 = vsel %vm2127_vm4, 0, %v653_v6  ;;  %v1040_v38 = vunpack.c.l.bf16 %v2994_v16  ;;  %v835_v1 = vmul.f32 %v2133_v20, %v2981_v13 }
  0xd7   : > { %v1419_v25 = vadd.f32 %v1387_v2, %v1349_v48  ;;  %v800_v0 = vunpack.c.l.bf16 %v698_v42  ;;  %v1074_v10 = vmul.f32 %v2147_v28, %v2967_v45  ;;  %v3044_v32 = vsel %vm2153_vm5, %v1213_v7, 0 }
  0xd8   : > { %v1420_v5 = vadd.f32 %v1388_v49, %v1350_v40  ;;  %v1144_v4 = vmul.f32 %v2149_v29, %v1040_v38  ;;  %v801_v17 = vunpack.c.h.bf16 %v698_v42  ;;  %v867_v60 = vadd.f32 %v835_v1, %v765_v11 }
  0xd9   : > { %v1489_v46 = vadd.f32 %v1457_v24, %v1419_v25  ;;  %v904_v12 = vmul.f32 %v2135_v21, %v800_v0  ;;  %v1319_v2 = vmul.f32 %v2179_v51, %v2937_v63  ;;  %v1389_v50 = vmul.f32 %v2190_v57, %v3005_v36 }
  0xda   : > { %v1490_v18 = vadd.f32 %v1458_v39, %v1420_v5  ;;  %v905_v30 = vmul.f32 %v2135_v21, %v801_v17  ;;  %v1005_v56 = vmul.f32 %v2137_v22, %v2935_v9  ;;  %v1041_v31 = vunpack.c.h.bf16 %v2994_v16 }
  0xdb   : > { %v1528_v49 = vadd.f32 %v2821_v53, %v1489_v46  ;;  %v936_v15 = vadd.f32 %v904_v12, %v866_v59  ;;  %v1355_v3 = vunpack.c.l.bf16 %v3044_v32  ;;  %v1075_v63 = vmul.f32 %v2147_v28, %v3000_v44 }
  0xdc   : > { %v1529_v61 = vadd.f32 %v2821_v53, %v1490_v18  ;;  %v937_v41 = vadd.f32 %v905_v30, %v867_v60  ;;  %v766_v23 = vmul.f32 %v2131_v19, %v2977_v26  ;;  %v836_v54 = vmul.f32 %v2133_v20, %v800_v0 }
  0xdd   : > { %v1560_v35 = vmax.f32 %v1528_v49, 0.0  ;;  %v1036_v16 = vadd.f32 %v1004_v58, %v936_v15  ;;  %v906_v33 = vmul.f32 %v2135_v21, %v700_v34  ;;  %v1145_v39 = vmul.f32 %v2149_v29, %v1041_v31 }
  0xde   : > { %v1561_v9 = vmax.f32 %v1529_v61, 0.0  ;;  %v1037_v24 = vadd.f32 %v1005_v56, %v937_v41  ;;  %v868_v6 = vadd.f32 %v836_v54, %v766_v23  ;;  %v1006_v48 = vmul.f32 %v2137_v22, %v2967_v45 }
  0xdf   : > { %v1962_v40 = vpack.c.bf16 %v1560_v35, %v1560_v35  ;;  %v1106_v7 = vadd.f32 %v1074_v10, %v1036_v16  ;;  %v1320_v11 = vmul.f32 %v2179_v51, %v2949_v52  ;;  %v1356_v58 = vunpack.c.h.bf16 %v3044_v32 }
  0xe0   : > { %v1963_v26 = vpack.c.bf16 %v1561_v9, %v1561_v9  ;;  %v1107_v42 = vadd.f32 %v1075_v63, %v1037_v24  ;;  %v938_v59 = vadd.f32 %v906_v33, %v868_v6  ;;  %v1076_v1 = vmul.f32 %v2147_v28, %v1040_v38 }
  0xe1   : > { %1721 = vst.msk [vmem:[%s2293_s9 + $0x68] sm:$0xf] %vm1694_vm6, %v1962_v40  ;;  %v1176_v34 = vadd.f32 %v1144_v4, %v1106_v7  ;;  %v1390_v45 = vmul.f32 %v2190_v57, %v3010_v37  ;;  %v767_v25 = vmul.f32 %v2131_v19, %v2981_v13  ;;  %v837_v5 = vmul.f32 %v2133_v20, %v801_v17 }
  0xe2   : > { %1722 = vst.msk [vmem:[%s2293_s9 + $0x6c] sm:$0xf] %vm1694_vm6, %v1963_v26  ;;  %v1177_v52 = vadd.f32 %v1145_v39, %v1107_v42  ;;  %v1038_v0 = vadd.f32 %v1006_v48, %v938_v59  ;;  %v1146_v10 = vmul.f32 %v2149_v29, %v2124_v14  ;;  %v907_v38 = vmul.f32 %v2135_v21, %v701_v47 }
  0xe3   : > { %v1351_v32 = vadd.f32 %v1319_v2, %v1176_v34  ;;  %v1459_v4 = vmul.f32 %v2197_v62, %v1355_v3  ;;  %v869_v60 = vadd.f32 %v837_v5, %v767_v25  ;;  %v1007_v46 = vmul.f32 %v2137_v22, %v3000_v44 }
  0xe4   : > { %v1352_v18 = vadd.f32 %v1320_v11, %v1177_v52  ;;  %v1460_v19 = vmul.f32 %v2197_v62, %v1356_v58  ;;  %v1108_v20 = vadd.f32 %v1076_v1, %v1038_v0  ;;  %v1321_v13 = vmul.f32 %v2179_v51, %v3005_v36 }
  0xe5   : > { %v1421_v17 = vadd.f32 %v1389_v50, %v1351_v32  ;;  %v939_v14 = vadd.f32 %v907_v38, %v869_v60  ;;  %v1077_v27 = vmul.f32 %v2147_v28, %v1041_v31  ;;  %v1391_v47 = vmul.f32 %v2190_v57, %v1355_v3 }
  0xe6   : > { %v1422_v29 = vadd.f32 %v1390_v45, %v1352_v18  ;;  %v1178_v21 = vadd.f32 %v1146_v10, %v1108_v20  ;;  %v1461_v22 = vmul.f32 %v2197_v62, %v1255_v55  ;;  %v1322_v28 = vmul.f32 %v2179_v51, %v3010_v37 }
  0xe7   : > { %v1491_v12 = vadd.f32 %v1459_v4, %v1421_v17  ;;  %v1039_v2 = vadd.f32 %v1007_v46, %v939_v14  ;;  %v1392_v15 = vmul.f32 %v2190_v57, %v1356_v58  ;;  %v1462_v23 = vmul.f32 %v2197_v62, %v1256_v8 }
  0xe8   : > { %v1492_v30 = vadd.f32 %v1460_v19, %v1422_v29  ;;  %v1353_v56 = vadd.f32 %v1321_v13, %v1178_v21 }
  0xe9   : > { %v1530_v44 = vadd.f32 %v2821_v53, %v1491_v12  ;;  %v1109_v36 = vadd.f32 %v1077_v27, %v1039_v2 }
  0xea   : > { %v1531_v50 = vadd.f32 %v2821_v53, %v1492_v30  ;;  %v1423_v31 = vadd.f32 %v1391_v47, %v1353_v56 }
  0xeb   : > { %v1562_v49 = vmax.f32 %v1530_v44, 0.0  ;;  %v1179_v61 = vadd.f32 %v1146_v10, %v1109_v36 }
  0xec   : > { %v1563_v3 = vmax.f32 %v1531_v50, 0.0  ;;  %v1493_v41 = vadd.f32 %v1461_v22, %v1423_v31 }
  0xed   : > { %v1964_v55 = vpack.c.bf16 %v1562_v49, %v1562_v49  ;;  %v1354_v63 = vadd.f32 %v1322_v28, %v1179_v61 }
  0xee   : > { %v1965_v54 = vpack.c.bf16 %v1563_v3, %v1563_v3  ;;  %v1532_v51 = vadd.f32 %v2821_v53, %v1493_v41 }
  0xef   : > { %1723 = vst.msk [vmem:[%s2293_s9 + $0x70] sm:$0xf] %vm1694_vm6, %v1964_v55  ;;  %v1424_v37 = vadd.f32 %v1392_v15, %v1354_v63 }
  0xf0   : > { %1724 = vst.msk [vmem:[%s2293_s9 + $0x74] sm:$0xf] %vm1694_vm6, %v1965_v54  ;;  %v1564_v35 = vmax.f32 %v1532_v51, 0.0 }
  0xf1   : > { %v1494_v9 = vadd.f32 %v1462_v23, %v1424_v37 }
  0xf2   : > { %v1966_v57 = vpack.c.bf16 %v1564_v35, %v1564_v35 }
  0xf3   : > { %v1533_v16 = vadd.f32 %v2821_v53, %v1494_v9 }
  0xf4   : > { %1725 = vst.msk [vmem:[%s2293_s9 + $0x78] sm:$0xf] %vm1694_vm6, %v1966_v57 }
  0xf5   : > { %v1565_v33 = vmax.f32 %v1533_v16, 0.0 }
  0xf7   : > { %v1967_v24 = vpack.c.bf16 %v1565_v33, %v1565_v33 }
  0xf9   : > { %1726 = vst.msk [vmem:[%s2293_s9 + $0x7c] sm:$0xf] %vm1694_vm6, %v1967_v24 }
  0xfa PF: > { %s15_s0 = sadd.s32 1, %s2048_s0   ;;  %s3135_s18 = smov %s2044_s19 }
  0xfb   : > { %p12_p5 = scmp.ge.s32.totalorder %s15_s0, 4   ;;  %s3136_s19 = smov %s3138_s2 }
  0xfd   :  { %14 = sbr.rel (!%p12_p5) target bundleno = 2 (0x2), region = 76 }

// kernel: ced_forward.7
= control target key start
LH: loop header
LB: loop body
LE: loop exit
PB: predicated region body
PF: predicated region fallthrough
CT: control target
= control target key end

     0   :  { %s985_s18 = smov 0   ;;  %s987_s19 = smov 0   ;;  %s1071_s0 = inlined_call_operand.vmem [shape: bf16[2,8,2,8,16], index: 0, kind: input, shape index: {}]   ;;  %s1072_s1 = inlined_call_operand.vmem [shape: bf16[2,16,8], index: 1, kind: input, shape index: {}]   ;;  %s1073_s2 = inlined_call_operand.vmem [shape: bf16[2,8,8,4], index: 2, kind: input, shape index: {}]   ;;  %s1074_s3 = inlined_call_operand.vmem [shape: bf16[4,8], index: 3, kind: input, shape index: {}]   ;;  %s1075_s4 = inlined_call_operand.vmem [shape: f32[1,8], index: 4, kind: input, shape index: {}]   ;;  %s1076_s5 = inlined_call_operand.vmem [shape: bf16[2,8,8,8], index: 5, kind: output, shape index: {}]  }
   0x1   :  { %s989_s20 = smov 0  }
   0x2 LB: > { %s27_s21 = sadd.s32 1, %s949_s19  ;;  %p796_p0 = scmp.ge.s32.totalorder %s953_s20, 1  ;;  %s953_s20 = sphi %s989_s20, %s15_s20   ;;  %s949_s19 = sphi %s987_s19, %s1078_s19   ;;  %s945_s18 = sphi %s985_s18, %s1077_s18  }
   0x3   : > { %p29_p1 = scmp.ge.s32.totalorder %s27_s21, 2  ;;  %p226_p2 = scmp.lt.s32.totalorder %s953_s20, 3 }
   0x5   : > { %s1080_s21 = smov (%p29_p1, %s27_s21), 0  ;;  %p227_p3 = pnand %p796_p0, %p226_p2 }
   0x6   : > { %p273_p4 = scmp.lt.s32.totalorder (!%p227_p3), %s945_s18, 1 }
   0x7   : > { %230 = sbr.rel (%p227_p3) target bundleno = 242 (0xf2), region = 40 }
   0xc   : > { %v917_v0 = vld [vmem:[%s1072_s1] sm:$0xff]   ;;  %vm460_vm0 = vcmask 1041408   ;;  %s1082_s18 = smov (!%p273_p4, %s945_s18), 1  ;;  %v922_v2 = vld [vmem:[%s1072_s1 + $0x8] sm:$0xff]   ;;  %vm349_vm1 = vcmask 130048   ;;  %vm447_vm2 = vcmask 31744  }
   0xd   : > { %v312_v1 = vld [vmem:[%s1074_s3] sm:$0x3]  ;;  %890 = vmatprep.subr.bf16.mxu1 %v917_v0  ;;  %860 = vmatprep.subr.bf16.mxu0 %v917_v0  ;;  %s842_s28 = sshll.u32 %s1082_s18, 6  ;;  %s843_s29 = sshll.u32 %s1082_s18, 5  ;;  %vm675_vm3 = vcmask 60416  }
   0xe   : > { %891 = vmatpush3.bf16.msra.mxu1 %v917_v0  ;;  %861 = vmatpush3.bf16.msra.mxu0 %v917_v0  ;;  %s281_s7 = scalar_lea.vmem %s1071_s0, %s842_s28  ;;  %v462_v3 = vsel %vm460_vm0, %v312_v1, 0  ;;  %s291_s10 = scalar_lea.vmem %s1073_s2, %s843_s29  ;;  %v839_v28 = vld [vmem:[%s1075_s4] ss:$0 sm:$0xff] }
   0xf   : > { %892 = vmatprep.subr.msk.bf16.mxu1 %vm460_vm0, %v312_v1  ;;  %880 = vmatprep.subr.bf16.mxu0 %v922_v2  ;;  %v918_v4 = vld [vmem:[%s281_s7] ss:$8 sps:$4 sm:$0xff]   ;;  %v920_v6 = vld [vmem:[%s281_s7 + $0x10] ss:$8 sps:$4 sm:$0xff]   ;;  %v924_v9 = vld [vmem:[%s281_s7 + $0x4] ss:$8 sps:$4 sm:$0xff]   ;;  %s1044_s15 = scalar_lea.vmem %s1076_s5, %s843_s29 }
  0x10   : > { %v919_v5 = vld [vmem:[%s281_s7 + $0x20] ss:$8 sps:$4 sm:$0xff]   ;;  %862 = vmatprep.mubr.msk.bf16.mxu0 %vm349_vm1, %v918_v4  ;;  %v921_v7 = vld [vmem:[%s281_s7 + $0x30] ss:$8 sps:$4 sm:$0xff]   ;;  %v926_v11 = vld [vmem:[%s281_s7 + $0x14] ss:$8 sps:$4 sm:$0xff]  }
  0x11   : > { %866 = vmatprep.mubr.msk.bf16.mxu1 %vm349_vm1, %v919_v5  ;;  %863 = vmatmul.mubr.msk.bf16.vlgmr.msra.gmra.mxu0 %vm349_vm1, %v920_v6  ;;  %v923_v8 = vld [vmem:[%s291_s10] sm:$0xff]   ;;  %v925_v10 = vld [vmem:[%s291_s10 + $0x8] sm:$0xff]   ;;  %v927_v13 = vld [vmem:[%s291_s10 + $0x10] sm:$0xff]  }
  0x12   : > { %867 = vmatmul.mubr.msk.bf16.vlgmr.msra.gmra.mxu1 %vm349_vm1, %v921_v7  ;;  %881 = vmatpush3.bf16.msra.mxu0 %v922_v2  ;;  %v928_v12 = vld [vmem:[%s281_s7 + $0x24] ss:$8 sps:$4 sm:$0xff]   ;;  %v930_v14 = vld [vmem:[%s281_s7 + $0x34] ss:$8 sps:$4 sm:$0xff]  }
  0x13   : > { %871 = vmatpush3.bf16.msra.mxu1 %v462_v3  ;;  %872 = vmatprep.mubr.msk.bf16.mxu1 %vm447_vm2, %v923_v8  ;;  %v929_v15 = vld [vmem:[%s291_s10 + $0x18] sm:$0xff]  }
  0x14   : > { %882 = vmatprep.mubr.msk.bf16.mxu0 %vm349_vm1, %v924_v9 }
  0x19   : > { %883 = vmatmul.mubr.msk.bf16.vlgmr.msra.gmra.mxu0 %vm349_vm1, %v926_v11 }
  0x1a   : > { %873 = vmatmul.mubr.msk.bf16.vlgmr.msra.gmra.mxu1 %vm447_vm2, %v925_v10  ;;  %886 = vmatprep.mubr.msk.bf16.mxu0 %vm349_vm1, %v928_v12 }
  0x1b   : > { %876 = vmatprep.mubr.msk.bf16.mxu1 %vm447_vm2, %v927_v13 }
  0x21   : > { %887 = vmatmul.mubr.msk.bf16.gmra.mxu0 %vm349_vm1, %v930_v14 }
  0x22   : > { %877 = vmatmul.mubr.msk.bf16.gmra.mxu1 %vm447_vm2, %v929_v15 }
  0xd1   : > { %v864_v16 = vpop.f32.mrf.mxu0 }
  0xd2   : > { %v868_v17 = vpop.f32.mrf.mxu1 }
  0xd3   : > { %v396_v18 = vpop.f32.mrf.mxu0 }
  0xd4   : > { %v412_v19 = vpop.f32.mrf.mxu1 }
  0xd5   : > { %v865_v20 = vpop.f32.mrf.mxu0 }
  0xd6   : > { %v869_v21 = vpop.f32.mrf.mxu1 }
  0xd7   : > { %v399_v22 = vpop.f32.mrf.mxu0 }
  0xd8   : > { %v415_v23 = vpop.f32.mrf.mxu1 }
  0xd9   : > { %v884_v24 = vpop.f32.mrf.mxu0 }
  0xda   : > { %v874_v25 = vpop.f32.mrf.mxu1 }
  0xdb   : > { %v507_v26 = vadd.f32 %v874_v25, %v864_v16  ;;  %v613_v27 = vpop.f32.mrf.mxu0 }
  0xdc   : > { %v498_v29 = vpop.f32.mrf.mxu1 }
  0xdd   : > { %v646_v30 = vadd.f32 %v884_v24, %v507_v26  ;;  %v499_v31 = vadd.f32 %v498_v29, %v396_v18  ;;  %v885_v32 = vpop.f32.mrf.mxu0 }
  0xde   : > { %v875_v33 = vpop.f32.mrf.mxu1 }
  0xdf   : > { %v661_v34 = vadd.f32 %v839_v28, %v646_v30  ;;  %v644_v35 = vadd.f32 %v613_v27, %v499_v31  ;;  %v510_v36 = vadd.f32 %v875_v33, %v865_v20  ;;  %v616_v37 = vpop.f32.mrf.mxu0 }
  0xe0   : > { %v501_v38 = vpop.f32.mrf.mxu1 }
  0xe1   : > { %v669_v39 = vpack.c.bf16 %v661_v34, %v661_v34  ;;  %v659_v40 = vadd.f32 %v839_v28, %v644_v35  ;;  %v647_v41 = vadd.f32 %v885_v32, %v510_v36  ;;  %v502_v42 = vadd.f32 %v501_v38, %v399_v22  ;;  %v888_v43 = vpop.f32.mrf.mxu0 }
  0xe2   : > { %v878_v44 = vpop.f32.mrf.mxu1 }
  0xe3   : > { %678 = vst.msk [vmem:[%s1044_s15 + $0x8] sm:$0xf] %vm675_vm3, %v669_v39  ;;  %v667_v45 = vpack.c.bf16 %v659_v40, %v659_v40  ;;  %v662_v46 = vadd.f32 %v839_v28, %v647_v41  ;;  %v645_v47 = vadd.f32 %v616_v37, %v502_v42  ;;  %v523_v48 = vadd.f32 %v878_v44, %v868_v17  ;;  %v629_v49 = vpop.f32.mrf.mxu0 }
  0xe4   : > { %v514_v50 = vpop.f32.mrf.mxu1 }
  0xe5   : > { %676 = vst.msk [vmem:[%s1044_s15] sm:$0xf] %vm675_vm3, %v667_v45  ;;  %v670_v51 = vpack.c.bf16 %v662_v46, %v662_v46  ;;  %v660_v52 = vadd.f32 %v839_v28, %v645_v47  ;;  %v650_v53 = vadd.f32 %v888_v43, %v523_v48  ;;  %v515_v54 = vadd.f32 %v514_v50, %v412_v19  ;;  %v889_v56 = vpop.f32.mrf.mxu0 }
  0xe6   : > { %v879_v55 = vpop.f32.mrf.mxu1 }
  0xe7   : > { %679 = vst.msk [vmem:[%s1044_s15 + $0xc] sm:$0xf] %vm675_vm3, %v670_v51  ;;  %v668_v57 = vpack.c.bf16 %v660_v52, %v660_v52  ;;  %v665_v58 = vadd.f32 %v839_v28, %v650_v53  ;;  %v648_v59 = vadd.f32 %v629_v49, %v515_v54  ;;  %v526_v60 = vadd.f32 %v879_v55, %v869_v21  ;;  %v632_v2 = vpop.f32.mrf.mxu0 }
  0xe8   : > { %v517_v61 = vpop.f32.mrf.mxu1 }
  0xe9   : > { %677 = vst.msk [vmem:[%s1044_s15 + $0x4] sm:$0xf] %vm675_vm3, %v668_v57  ;;  %v673_v62 = vpack.c.bf16 %v665_v58, %v665_v58  ;;  %v663_v63 = vadd.f32 %v839_v28, %v648_v59  ;;  %v651_v0 = vadd.f32 %v889_v56, %v526_v60  ;;  %v518_v1 = vadd.f32 %v517_v61, %v415_v23 }
  0xeb   : > { %682 = vst.msk [vmem:[%s1044_s15 + $0x18] sm:$0xf] %vm675_vm3, %v673_v62  ;;  %v671_v3 = vpack.c.bf16 %v663_v63, %v663_v63  ;;  %v666_v4 = vadd.f32 %v839_v28, %v651_v0  ;;  %v649_v5 = vadd.f32 %v632_v2, %v518_v1 }
  0xed   : > { %680 = vst.msk [vmem:[%s1044_s15 + $0x10] sm:$0xf] %vm675_vm3, %v671_v3  ;;  %v674_v6 = vpack.c.bf16 %v666_v4, %v666_v4  ;;  %v664_v7 = vadd.f32 %v839_v28, %v649_v5 }
  0xef   : > { %683 = vst.msk [vmem:[%s1044_s15 + $0x1c] sm:$0xf] %vm675_vm3, %v674_v6  ;;  %v672_v8 = vpack.c.bf16 %v664_v7, %v664_v7 }
  0xf1   : > { %681 = vst.msk [vmem:[%s1044_s15 + $0x14] sm:$0xf] %vm675_vm3, %v672_v8 }
  0xf2 PF: > { %s15_s20 = sadd.s32 1, %s953_s20   ;;  %s1077_s18 = smov %s949_s19 }
  0xf3   : > { %p12_p5 = scmp.ge.s32.totalorder %s15_s20, 4   ;;  %s1078_s19 = smov %s1080_s21 }
  0xf5   :  { %14 = sbr.rel (!%p12_p5) target bundleno = 2 (0x2), region = 75 }

// kernel: ced_forward.6
= control target key start
LH: loop header
LB: loop body
LE: loop exit
PB: predicated region body
PF: predicated region fallthrough
CT: control target
= control target key end

     0   :  { %s1268_s18 = smov 0   ;;  %s1270_s19 = smov 0   ;;  %s1757_s0 = inlined_call_operand.vmem [shape: bf16[2,16,8,8], index: 0, kind: input, shape index: {}, may-alias: {0,1,2}]   ;;  %s1758_s1 = inlined_call_operand.vmem [shape: bf16[2,16,8,8], index: 1, kind: input, shape index: {}, may-alias: {0,1,2}]   ;;  %s1759_s2 = inlined_call_operand.vmem [shape: bf16[2,16,8,8], index: 2, kind: input, shape index: {}, may-alias: {0,1,2}]   ;;  %s1760_s3 = inlined_call_operand.vmem [shape: f32[3,3,4], index: 3, kind: input, shape index: {}]   ;;  %s1761_s4 = inlined_call_operand.vmem [shape: f32[1,4], index: 4, kind: input, shape index: {}]   ;;  %s1762_s5 = inlined_call_operand.vmem [shape: bf16[2,8,8,4], index: 5, kind: output, shape index: {}]  }
   0x1   :  { %s1272_s0 = smov 0  }
   0x2 LB: > { %s27_s2 = sadd.s32 1, %s1229_s19  ;;  %p1138_p0 = scmp.ge.s32.totalorder %s1233_s0, 1  ;;  %s1233_s0 = sphi %s1272_s0, %s15_s0   ;;  %s1229_s19 = sphi %s1270_s19, %s1776_s19   ;;  %s1225_s18 = sphi %s1268_s18, %s1775_s18  }
   0x3   : > { %p29_p1 = scmp.ge.s32.totalorder %s27_s2, 2  ;;  %p270_p2 = scmp.lt.s32.totalorder %s1233_s0, 3 }
   0x5   : > { %s1778_s2 = smov (%p29_p1, %s27_s2), 0  ;;  %p271_p3 = pnand %p1138_p0, %p270_p2 }
   0x6   : > { %p347_p4 = scmp.lt.s32.totalorder (!%p271_p3), %s1225_s18, 1  ;;  %s1236_s30 = smov (!%p271_p3), 4  }
   0x7   : > { %274 = sbr.rel (%p271_p3) target bundleno = 305 (0x131), region = 40  ;;  %s1237_s6 = smov (!%p271_p3), 124  }
   0xc   : > { %v657_v0 = vlaneseq  ;;  %v1235_v1 = vmov 0   ;;  %v1291_v3 = vld [vmem:[%s1760_s3] sm:$0x7]  ;;  %v1298_v5 = vld [vmem:[%s1760_s3 + $0x8] sm:$0x7]  ;;  %s1780_s18 = smov (!%p347_p4, %s1225_s18), 1 }
   0xd   : > { %v1145_v2 = vcombine.low %v1235_v1, %v1235_v1  ;;  %v1309_v10 = vld [vmem:[%s1760_s3 + $0x4] sm:$0x7]  ;;  %s1166_s26 = sshll.u32 %s1780_s18, 6  ;;  %vm629_vm0 = vcmask 1040384   ;;  %vm630_vm1 = vsmask.f32 256 }
   0xe   : > { %v1293_v4 = vshrl.u32 %v657_v0, 7  ;;  %s1317_s29 = scalar_lea.vmem %s1758_s1, %s1166_s26  ;;  %vm1556_vm2 = vmand %vm629_vm0, %vm630_vm1  ;;  %s1167_s9 = sshll.u32 %s1780_s18, 5  ;;  %vm1002_vm3 = vcmask 27648  }
   0xf   : > { %v460_v6 = vshrl.u32 %v1145_v2, 16  ;;  %v463_v7 = vshll.u32 %v1145_v2, 16  ;;  %v1325_v17 = vld [vmem:[%s1317_s29] sm:$0xf]  ;;  %v1328_v18 = vld [vmem:[%s1317_s29 + $0x4] sm:$0xf]  ;;  %s1730_s12 = scalar_lea.vmem %s1762_s5, %s1167_s9 }
  0x10   : > { %v1303_v8 = vsub.s32 1, %v1293_v4  ;;  %v805_v9 = vsub.s32 2, %v1293_v4  ;;  %v1331_v19 = vld [vmem:[%s1317_s29 + $0x8] sm:$0xf]  ;;  %v1146_v20 = vcombine.low %v1325_v17, %v1325_v17  ;;  %v1147_v21 = vcombine.low %v1328_v18, %v1328_v18  ;;  %v1340_v23 = vld [vmem:[%s1317_s29 + $0xc] sm:$0xf] }
  0x11   : > { %v462_v11 = vrot.slane %v460_v6, 7  ;;  %v1148_v22 = vcombine.low %v1331_v19, %v1331_v19  ;;  %v1343_v24 = vld [vmem:[%s1317_s29 + $0x10] sm:$0xf]  ;;  %v1149_v25 = vcombine.low %v1340_v23, %v1340_v23  ;;  %v1350_v31 = vld [vmem:[%s1317_s29 + $0x14] sm:$0xf] }
  0x12   : > { %v806_v12 = vrot.slane %v1291_v3, %v805_v9  ;;  %v918_v13 = vrot.slane %v1298_v5, %v805_v9  ;;  %v1321_v14 = vrot.slane %v1291_v3, %v1303_v8  ;;  %v862_v15 = vrot.slane %v1309_v10, %v805_v9  ;;  %v1353_v35 = vld [vmem:[%s1317_s29 + $0x18] sm:$0xf]  ;;  %v1359_v44 = vld [vmem:[%s1317_s29 + $0x1c] sm:$0xf]  ;;  %v1364_v49 = vld [vmem:[%s1317_s29 + $0x20] sm:$0xf] }
  0x13   : > { %v465_v16 = vor.u32 %v463_v7, %v462_v11  ;;  %v1150_v26 = vcombine.low %v1343_v24, %v1343_v24  ;;  %v467_v27 = vshrl.u32 %v1146_v20, 16  ;;  %v470_v28 = vshll.u32 %v1146_v20, 16  ;;  %v1367_v50 = vld [vmem:[%s1317_s29 + $0x24] sm:$0xf]  ;;  %v1378_v60 = vld [vmem:[%s1317_s29 + $0x28] sm:$0xf] }
  0x14   : > { %808 = vrot.lane.b32.xlu0 %v806_v12, %s1236_s30  ;;  %920 = vrot.lane.b32.xlu1 %v918_v13, %s1236_s30  ;;  %v474_v29 = vshrl.u32 %v1147_v21, 16  ;;  %v477_v30 = vshll.u32 %v1147_v21, 16  ;;  %v481_v32 = vshrl.u32 %v1148_v22, 16  ;;  %v484_v33 = vshll.u32 %v1148_v22, 16  ;;  %v1381_v63 = vld [vmem:[%s1317_s29 + $0x2c] sm:$0xf] }
  0x15   : > { %v488_v34 = vshrl.u32 %v1149_v25, 16  ;;  %v469_v36 = vrot.slane %v467_v27, 7  ;;  %v491_v38 = vshll.u32 %v1149_v25, 16  ;;  %v495_v39 = vshrl.u32 %v1150_v26, 16  ;;  %v1393_v20 = vld [vmem:[%s1317_s29 + $0x34] sm:$0xf] }
  0x16   : > { %v476_v37 = vrot.slane %v474_v29, 7  ;;  %v483_v40 = vrot.slane %v481_v32, 7  ;;  %v498_v42 = vshll.u32 %v1150_v26, 16  ;;  %v1151_v43 = vcombine.low %v1350_v31, %v1350_v31 }
  0x17   : > { %v490_v41 = vrot.slane %v488_v34, 7  ;;  %v472_v45 = vor.u32 %v470_v28, %v469_v36  ;;  %v497_v47 = vrot.slane %v495_v39, 7  ;;  %v1152_v48 = vcombine.low %v1353_v35, %v1353_v35  ;;  %v1402_v34 = vld [vmem:[%s1317_s29 + $0x38] sm:$0xf]  ;;  %v1405_v36 = vld [vmem:[%s1317_s29 + $0x3c] sm:$0xf] }
  0x18   : > { %864 = vrot.lane.b32.xlu0 %v862_v15, %s1236_s30  ;;  %578 = vrot.lane.b32.xlu1 %v465_v16, %s1237_s6  ;;  %v479_v46 = vor.u32 %v477_v30, %v476_v37  ;;  %v486_v51 = vor.u32 %v484_v33, %v483_v40  ;;  %v502_v52 = vshrl.u32 %v1151_v43, 16  ;;  %v505_v54 = vshll.u32 %v1151_v43, 16  ;;  %v1388_v15 = vld [vmem:[%s1317_s29 + $0x30] sm:$0xf] }
  0x19   : > { %v493_v53 = vor.u32 %v491_v38, %v490_v41  ;;  %v509_v55 = vshrl.u32 %v1152_v48, 16  ;;  %v1153_v56 = vcombine.low %v1359_v44, %v1359_v44  ;;  %v1154_v58 = vcombine.low %v1364_v49, %v1364_v49 }
  0x1a   : > { %v504_v57 = vrot.slane %v502_v52, 7  ;;  %v1155_v59 = vcombine.low %v1367_v50, %v1367_v50  ;;  %v500_v61 = vor.u32 %v498_v42, %v497_v47  ;;  %v512_v2 = vshll.u32 %v1152_v48, 16 }
  0x1b   : > { %v516_v62 = vshrl.u32 %v1153_v56, 16  ;;  %v511_v0 = vrot.slane %v509_v55, 7  ;;  %v523_v6 = vshrl.u32 %v1154_v58, 16  ;;  %v519_v12 = vshll.u32 %v1153_v56, 16 }
  0x1c   : > { %580 = vrot.lane.b32.xlu0 %v472_v45, %s1237_s6  ;;  %582 = vrot.lane.b32.xlu1 %v479_v46, %s1237_s6  ;;  %v530_v7 = vshrl.u32 %v1155_v59, 16  ;;  %v507_v9 = vor.u32 %v505_v54, %v504_v57  ;;  %v1156_v13 = vcombine.low %v1378_v60, %v1378_v60  ;;  %v1157_v16 = vcombine.low %v1381_v63, %v1381_v63 }
  0x1d   : > { %v518_v11 = vrot.slane %v516_v62, 7  ;;  %v525_v21 = vrot.slane %v523_v6, 7  ;;  %v526_v22 = vshll.u32 %v1154_v58, 16  ;;  %v533_v26 = vshll.u32 %v1155_v59, 16 }
  0x1e   : > { %v532_v25 = vrot.slane %v530_v7, 7  ;;  %v537_v27 = vshrl.u32 %v1156_v13, 16  ;;  %v1158_v28 = vcombine.low %v1388_v15, %v1388_v15  ;;  %v514_v29 = vor.u32 %v512_v2, %v511_v0 }
  0x1f   : > { %v521_v30 = vor.u32 %v519_v12, %v518_v11  ;;  %v544_v32 = vshrl.u32 %v1157_v16, 16  ;;  %v1159_v33 = vcombine.low %v1393_v20, %v1393_v20  ;;  %v528_v37 = vor.u32 %v526_v22, %v525_v21 }
  0x20   : > { %584 = vrot.lane.b32.xlu0 %v486_v51, %s1237_s6  ;;  %586 = vrot.lane.b32.xlu1 %v493_v53, %s1237_s6  ;;  %v540_v38 = vshll.u32 %v1156_v13, 16  ;;  %v535_v39 = vor.u32 %v533_v26, %v532_v25  ;;  %v539_v40 = vrot.slane %v537_v27, 7  ;;  %v547_v41 = vshll.u32 %v1157_v16, 16 }
  0x21   : > { %v551_v42 = vshrl.u32 %v1158_v28, 16  ;;  %v546_v43 = vrot.slane %v544_v32, 7  ;;  %v558_v45 = vshrl.u32 %v1159_v33, 16  ;;  %v1160_v46 = vcombine.low %v1402_v34, %v1402_v34 }
  0x22   : > { %v1161_v47 = vcombine.low %v1405_v36, %v1405_v36  ;;  %v542_v48 = vor.u32 %v540_v38, %v539_v40  ;;  %v554_v52 = vshll.u32 %v1158_v28, 16  ;;  %v561_v53 = vshll.u32 %v1159_v33, 16 }
  0x23   : > { %v553_v51 = vrot.slane %v551_v42, 7  ;;  %v549_v54 = vor.u32 %v547_v41, %v546_v43  ;;  %v560_v55 = vrot.slane %v558_v45, 7  ;;  %v565_v56 = vshrl.u32 %v1160_v46, 16 }
  0x24   : > { %588 = vrot.lane.b32.xlu0 %v500_v61, %s1237_s6  ;;  %590 = vrot.lane.b32.xlu1 %v507_v9, %s1237_s6  ;;  %v572_v57 = vshrl.u32 %v1161_v47, 16  ;;  %v568_v59 = vshll.u32 %v1160_v46, 16  ;;  %v575_v2 = vshll.u32 %v1161_v47, 16  ;;  %v659_v6 = vsub.s32 0, %v1293_v4 }
  0x25   : > { %v556_v58 = vor.u32 %v554_v52, %v553_v51  ;;  %v563_v61 = vor.u32 %v561_v53, %v560_v55  ;;  %v567_v62 = vrot.slane %v565_v56, 7  ;;  %v1431_v16 = vrot.slane %v1309_v10, %v1303_v8 }
  0x26   : > { %v574_v0 = vrot.slane %v572_v57, 7  ;;  %v1421_v11 = vrot.slane %v1291_v3, %v659_v6  ;;  %v1424_v12 = vrot.slane %v1309_v10, %v659_v6  ;;  %v1427_v13 = vrot.slane %v1298_v5, %v659_v6 }
  0x27   : > { %v570_v7 = vor.u32 %v568_v59, %v567_v62  ;;  %v1435_v4 = vrot.slane %v1298_v5, %v1303_v8  ;;  %v754_v3 = vunpack.c.l.bf16 %v1325_v17  ;;  %v756_v22 = vunpack.c.l.bf16 %v1343_v24 }
  0x28   : > { %592 = vrot.lane.b32.xlu0 %v514_v29, %s1237_s6  ;;  %594 = vrot.lane.b32.xlu1 %v521_v30, %s1237_s6  ;;  %v577_v9 = vor.u32 %v575_v2, %v574_v0  ;;  %v1447_v10 = vunpack.c.l.bf16 %v1350_v31  ;;  %v757_v8 = vunpack.c.l.bf16 %v1353_v35  ;;  %v1464_v27 = vunpack.c.l.bf16 %v1359_v44 }
  0x29   : > { %v1443_v21 = vmul.f32 %v1431_v16, %v754_v3  ;;  %v1452_v5 = vmul.f32 %v1431_v16, %v756_v22  ;;  %v1766_v28 = vunpack.c.l.bf16 %v1364_v49  ;;  %v1481_v32 = vunpack.c.l.bf16 %v1367_v50 }
  0x2a   : > { %v1457_v25 = vmul.f32 %v1321_v14, %v1447_v10  ;;  %v1461_v26 = vmul.f32 %v1435_v4, %v1447_v10  ;;  %v1469_v31 = vmul.f32 %v1431_v16, %v757_v8  ;;  %v1474_v29 = vmul.f32 %v1435_v4, %v1464_v27 }
  0x2b   : > { %v1478_v30 = vmul.f32 %v1321_v14, %v1464_v27  ;;  %v1486_v44 = vmul.f32 %v1431_v16, %v1766_v28  ;;  %v1767_v33 = vunpack.c.l.bf16 %v1378_v60  ;;  %v1495_v38 = vmul.f32 %v1435_v4, %v1481_v32 }
  0x2c   : > { %596 = vrot.lane.b32.xlu0 %v528_v37, %s1237_s6  ;;  %598 = vrot.lane.b32.xlu1 %v535_v39, %s1237_s6  ;;  %v1491_v37 = vmul.f32 %v1321_v14, %v1481_v32  ;;  %v1498_v39 = vunpack.c.l.bf16 %v1381_v63  ;;  %v1764_v40 = vunpack.c.l.bf16 %v1388_v15  ;;  %v1515_v43 = vunpack.c.l.bf16 %v1393_v20 }
  0x2d   : > { %v1503_v50 = vmul.f32 %v1431_v16, %v1767_v33  ;;  %v1765_v45 = vunpack.c.l.bf16 %v1402_v34  ;;  %v1543_v52 = vunpack.c.l.bf16 %v1328_v18  ;;  %v726_v53 = vunpack.c.l.bf16 %v1235_v1 }
  0x2e   : > { %v1508_v41 = vmul.f32 %v1435_v4, %v1498_v39  ;;  %v1512_v42 = vmul.f32 %v1321_v14, %v1498_v39  ;;  %v1520_v63 = vmul.f32 %v1431_v16, %v1764_v40  ;;  %v1525_v46 = vmul.f32 %v1321_v14, %v1515_v43 }
  0x2f   : > { %v1529_v47 = vmul.f32 %v1435_v4, %v1515_v43  ;;  %v1535_v20 = vmul.f32 %v1431_v16, %v1765_v45 }
  0x30   : > { %600 = vrot.lane.b32.xlu0 %v542_v48, %s1237_s6  ;;  %602 = vrot.lane.b32.xlu1 %v549_v54, %s1237_s6  ;;  %v1763_v48 = vunpack.c.l.bf16 %v1405_v36  ;;  %v1547_v54 = vunpack.c.l.bf16 %v1340_v23 }
  0x32   : > { %v1540_v51 = vmul.f32 %v1435_v4, %v1763_v48 }
  0x34   : > { %604 = vrot.lane.b32.xlu0 %v556_v58, %s1237_s6  ;;  %606 = vrot.lane.b32.xlu1 %v563_v61, %s1237_s6 }
  0x38   : > { %608 = vrot.lane.b32.xlu0 %v570_v7, %s1237_s6  ;;  %610 = vrot.lane.b32.xlu1 %v577_v9, %s1237_s6 }
  0x86   : > { %v809_v55 = vpop.permute.xlu0 %808  ;;  %v1549_v56 = vpop.permute.xlu1 %920 }
  0x87   : > { %v812_v57 = vmul.f32 %v809_v55, %v1543_v52  ;;  %v811_v58 = vmul.f32 %v809_v55, %v726_v53  ;;  %v814_v23 = vmul.f32 %v809_v55, %v1447_v10  ;;  %v813_v61 = vmul.f32 %v809_v55, %v1547_v54 }
  0x88   : > { %v816_v7 = vmul.f32 %v809_v55, %v1481_v32  ;;  %v815_v9 = vmul.f32 %v809_v55, %v1464_v27 }
  0x89   : > { %829 = vrot.lane.b32.xlu1 %v812_v57, %s1237_s6  ;;  %827 = vrot.lane.b32.xlu0 %v811_v58, %s1237_s6 }
  0x8a   : > { %v1554_v59 = vpop.permute.xlu0 %864  ;;  %v579_v1 = vpop.permute.xlu1 %578 }
  0x8b   : > { %v632_v62 = vsel %vm1556_vm2, 0, %v579_v1  ;;  %v755_v1 = vunpack.c.l.bf16 %v1331_v19 }
  0x8c   : > { %v649_v0 = vunpack.c.l.bf16 %v632_v62  ;;  %v738_v62 = vmul.f32 %v1321_v14, %v726_v53 }
  0x8d   : > { %833 = vrot.lane.b32.xlu1 %v814_v23, %s1237_s6  ;;  %831 = vrot.lane.b32.xlu0 %v813_v61, %s1237_s6 }
  0x8e   : > { %v581_v2 = vpop.permute.xlu0 %580  ;;  %v583_v6 = vpop.permute.xlu1 %582  ;;  %v661_v23 = vmul.f32 %v1421_v11, %v649_v0  ;;  %v817_v0 = vmul.f32 %v809_v55, %v1498_v39 }
  0x8f   : > { %v633_v57 = vsel %vm1556_vm2, 0, %v581_v2  ;;  %v634_v58 = vsel %vm1556_vm2, 0, %v583_v6  ;;  %v818_v6 = vmul.f32 %v809_v55, %v1515_v43  ;;  %v867_v55 = vmul.f32 %v1554_v59, %v754_v3 }
  0x90   : > { %v677_v48 = vunpack.c.l.bf16 %v633_v57  ;;  %v650_v61 = vunpack.c.l.bf16 %v634_v58  ;;  %v767_v3 = vmul.f32 %v1431_v16, %v755_v1  ;;  %v869_v16 = vmul.f32 %v1554_v59, %v756_v22 }
  0x91   : > { %837 = vrot.lane.b32.xlu1 %v816_v7, %s1237_s6  ;;  %835 = vrot.lane.b32.xlu0 %v815_v9, %s1237_s6 }
  0x92   : > { %v689_v40 = vmul.f32 %v1424_v12, %v677_v48  ;;  %v710_v45 = vmul.f32 %v1427_v13, %v650_v61  ;;  %v585_v2 = vpop.permute.xlu0 %584  ;;  %v587_v28 = vpop.permute.xlu1 %586  ;;  %v662_v19 = vmul.f32 %v1421_v11, %v650_v61  ;;  %v868_v48 = vmul.f32 %v1554_v59, %v755_v1 }
  0x93   : > { %v635_v57 = vsel %vm1556_vm2, 0, %v585_v2  ;;  %v636_v7 = vsel %vm1556_vm2, 0, %v587_v28  ;;  %v739_v61 = vmul.f32 %v1321_v14, %v1543_v52 }
  0x94   : > { %v697_v9 = vadd.f32 %v689_v40, %v661_v23  ;;  %v678_v53 = vunpack.c.l.bf16 %v635_v57  ;;  %v651_v58 = vunpack.c.l.bf16 %v636_v7 }
  0x95   : > { %841 = vrot.lane.b32.xlu1 %v818_v6, %s1237_s6  ;;  %839 = vrot.lane.b32.xlu0 %v817_v0, %s1237_s6 }
  0x96   : > { %v718_v33 = vadd.f32 %v710_v45, %v697_v9  ;;  %v690_v2 = vmul.f32 %v1424_v12, %v678_v53  ;;  %v711_v28 = vmul.f32 %v1427_v13, %v651_v58  ;;  %v589_v40 = vpop.permute.xlu0 %588  ;;  %v591_v23 = vpop.permute.xlu1 %590  ;;  %v663_v6 = vmul.f32 %v1421_v11, %v651_v58 }
  0x97   : > { %v637_v0 = vsel %vm1556_vm2, 0, %v589_v40  ;;  %v638_v17 = vsel %vm1556_vm2, 0, %v591_v23  ;;  %v870_v53 = vmul.f32 %v1554_v59, %v757_v8  ;;  %v787_v58 = vmul.f32 %v1435_v4, %v1543_v52 }
  0x98   : > { %v698_v45 = vadd.f32 %v690_v2, %v662_v19  ;;  %v679_v57 = vunpack.c.l.bf16 %v637_v0  ;;  %v652_v7 = vunpack.c.l.bf16 %v638_v17  ;;  %v746_v9 = vadd.f32 %v738_v62, %v718_v33 }
  0x99   : > { %885 = vrot.lane.b32.xlu1 %v868_v48, %s1237_s6  ;;  %883 = vrot.lane.b32.xlu0 %v867_v55, %s1237_s6  ;;  %v740_v40 = vmul.f32 %v1321_v14, %v1547_v54  ;;  %v1770_v23 = vunpack.c.l.bf16 %v1378_v60  ;;  %v788_v17 = vmul.f32 %v1435_v4, %v1547_v54 }
  0x9a   : > { %v719_v1 = vadd.f32 %v711_v28, %v698_v45  ;;  %v691_v33 = vmul.f32 %v1424_v12, %v679_v57  ;;  %v712_v62 = vmul.f32 %v1427_v13, %v652_v7  ;;  %v593_v19 = vpop.permute.xlu0 %592  ;;  %v595_v48 = vpop.permute.xlu1 %594  ;;  %v664_v35 = vmul.f32 %v1421_v11, %v652_v7 }
  0x9b   : > { %v639_v8 = vsel %vm1556_vm2, 0, %v593_v19  ;;  %v640_v55 = vsel %vm1556_vm2, 0, %v595_v48  ;;  %v774_v14 = vadd.f32 %v1443_v21, %v746_v9  ;;  %v872_v0 = vmul.f32 %v1554_v59, %v1770_v23 }
  0x9c   : > { %v699_v24 = vadd.f32 %v691_v33, %v663_v6  ;;  %v680_v2 = vunpack.c.l.bf16 %v639_v8  ;;  %v653_v22 = vunpack.c.l.bf16 %v640_v55  ;;  %v747_v28 = vadd.f32 %v739_v61, %v719_v1 }
  0x9d   : > { %889 = vrot.lane.b32.xlu1 %v870_v53, %s1237_s6  ;;  %887 = vrot.lane.b32.xlu0 %v869_v16, %s1237_s6  ;;  %v1629_v45 = vadd.f32 %v787_v58, %v774_v14  ;;  %v1771_v57 = vunpack.c.l.bf16 %v1364_v49  ;;  %v1773_v55 = vunpack.c.l.bf16 %v1388_v15 }
  0x9e   : > { %v720_v6 = vadd.f32 %v712_v62, %v699_v24  ;;  %v692_v61 = vmul.f32 %v1424_v12, %v680_v2  ;;  %v713_v7 = vmul.f32 %v1427_v13, %v653_v22  ;;  %v597_v9 = vpop.permute.xlu0 %596  ;;  %v599_v53 = vpop.permute.xlu1 %598  ;;  %v665_v60 = vmul.f32 %v1421_v11, %v653_v22 }
  0x9f   : > { %v871_v21 = vmul.f32 %v1554_v59, %v1771_v57  ;;  %v641_v16 = vsel %vm1556_vm2, 0, %v597_v9  ;;  %v642_v4 = vsel %vm1556_vm2, 0, %v599_v53  ;;  %v775_v58 = vadd.f32 %v767_v3, %v747_v28 }
  0xa0   : > { %v700_v1 = vadd.f32 %v692_v61, %v664_v35  ;;  %v681_v49 = vunpack.c.l.bf16 %v641_v16  ;;  %v654_v33 = vunpack.c.l.bf16 %v642_v4  ;;  %v748_v19 = vadd.f32 %v740_v40, %v720_v6 }
  0xa1   : > { %893 = vrot.lane.b32.xlu1 %v872_v0, %s1237_s6  ;;  %891 = vrot.lane.b32.xlu0 %v871_v21, %s1237_s6  ;;  %v1772_v62 = vunpack.c.l.bf16 %v1402_v34  ;;  %v1646_v8 = vadd.f32 %v788_v17, %v775_v58  ;;  %v873_v14 = vmul.f32 %v1554_v59, %v1773_v55  ;;  %v924_v57 = vmul.f32 %v1549_v56, %v1547_v54 }
  0xa2   : > { %v721_v24 = vadd.f32 %v713_v7, %v700_v1  ;;  %v693_v3 = vmul.f32 %v1424_v12, %v681_v49  ;;  %v714_v35 = vmul.f32 %v1427_v13, %v654_v33  ;;  %v601_v40 = vpop.permute.xlu0 %600  ;;  %v603_v2 = vpop.permute.xlu1 %602  ;;  %v666_v22 = vmul.f32 %v1421_v11, %v654_v33 }
  0xa3   : > { %v874_v48 = vmul.f32 %v1554_v59, %v1772_v62  ;;  %v643_v34 = vsel %vm1556_vm2, 0, %v601_v40  ;;  %v644_v28 = vsel %vm1556_vm2, 0, %v603_v2  ;;  %v776_v23 = vadd.f32 %v1452_v5, %v748_v19 }
  0xa4   : > { %v701_v15 = vadd.f32 %v693_v3, %v665_v60  ;;  %v682_v0 = vunpack.c.l.bf16 %v643_v34  ;;  %v655_v59 = vunpack.c.l.bf16 %v644_v28  ;;  %v749_v17 = vadd.f32 %v1457_v25, %v721_v24 }
  0xa5   : > { %897 = vrot.lane.b32.xlu1 %v874_v48, %s1237_s6  ;;  %895 = vrot.lane.b32.xlu0 %v873_v14, %s1237_s6  ;;  %v923_v21 = vmul.f32 %v1549_v56, %v1543_v52  ;;  %v1667_v6 = vadd.f32 %v1461_v26, %v776_v23  ;;  %v926_v1 = vmul.f32 %v1549_v56, %v1464_v27 }
  0xa6   : > { %v722_v61 = vadd.f32 %v714_v35, %v701_v15  ;;  %v694_v5 = vmul.f32 %v1424_v12, %v682_v0  ;;  %v715_v7 = vmul.f32 %v1427_v13, %v655_v59  ;;  %v605_v9 = vpop.permute.xlu0 %604  ;;  %v607_v25 = vpop.permute.xlu1 %606  ;;  %v667_v53 = vmul.f32 %v1421_v11, %v655_v59 }
  0xa7   : > { %v645_v60 = vsel %vm1556_vm2, 0, %v605_v9  ;;  %v646_v54 = vsel %vm1556_vm2, 0, %v607_v25  ;;  %v777_v52 = vadd.f32 %v1469_v31, %v749_v17  ;;  %v925_v33 = vmul.f32 %v1549_v56, %v1447_v10 }
  0xa8   : > { %v702_v16 = vadd.f32 %v694_v5, %v666_v22  ;;  %v683_v26 = vunpack.c.l.bf16 %v645_v60  ;;  %v656_v4 = vunpack.c.l.bf16 %v646_v54  ;;  %v750_v58 = vadd.f32 %v1478_v30, %v722_v61  ;;  %v1162_v54 = vld [vmem:[%s1761_s4] ss:$0 sm:$0xff] }
  0xa9   : > { %941 = vrot.lane.b32.xlu1 %v924_v57, %s1237_s6  ;;  %939 = vrot.lane.b32.xlu0 %v923_v21, %s1237_s6  ;;  %v798_v49 = vadd.f32 %v1474_v29, %v777_v52  ;;  %v927_v34 = vmul.f32 %v1549_v56, %v1481_v32 }
  0xaa   : > { %v723_v19 = vadd.f32 %v715_v7, %v702_v16  ;;  %v695_v31 = vmul.f32 %v1424_v12, %v683_v26  ;;  %v716_v62 = vmul.f32 %v1427_v13, %v656_v4  ;;  %v609_v48 = vpop.permute.xlu0 %608  ;;  %v611_v55 = vpop.permute.xlu1 %610  ;;  %v668_v30 = vmul.f32 %v1421_v11, %v656_v4 }
  0xab   : > { %v647_v14 = vsel %vm1556_vm2, 0, %v609_v48  ;;  %v648_v27 = vsel %vm1556_vm2, 0, %v611_v55  ;;  %v778_v29 = vadd.f32 %v1486_v44, %v750_v58  ;;  %v928_v44 = vmul.f32 %v1549_v56, %v1498_v39 }
  0xac   : > { %v703_v24 = vadd.f32 %v695_v31, %v667_v53  ;;  %v684_v3 = vunpack.c.l.bf16 %v647_v14  ;;  %v705_v10 = vunpack.c.l.bf16 %v648_v27  ;;  %v751_v35 = vadd.f32 %v1491_v37, %v723_v19 }
  0xad   : > { %945 = vrot.lane.b32.xlu1 %v926_v1, %s1237_s6  ;;  %943 = vrot.lane.b32.xlu0 %v925_v33, %s1237_s6  ;;  %v799_v40 = vadd.f32 %v1495_v38, %v778_v29  ;;  %v1774_v38 = vunpack.c.l.bf16 %v1405_v36  ;;  %v929_v39 = vmul.f32 %v1549_v56, %v1515_v43 }
  0xae   : > { %v724_v11 = vadd.f32 %v716_v62, %v703_v24  ;;  %v696_v2 = vmul.f32 %v1424_v12, %v684_v3  ;;  %v717_v22 = vmul.f32 %v1427_v13, %v705_v10  ;;  %v779_v18 = vadd.f32 %v1503_v50, %v751_v35 }
  0xaf   : > { %v930_v50 = vmul.f32 %v1549_v56, %v1774_v38 }
  0xb0   : > { %v704_v37 = vadd.f32 %v696_v2, %v668_v30  ;;  %v800_v28 = vadd.f32 %v1508_v41, %v779_v18  ;;  %v752_v23 = vadd.f32 %v1512_v42, %v724_v11 }
  0xb1   : > { %949 = vrot.lane.b32.xlu1 %v928_v44, %s1237_s6  ;;  %947 = vrot.lane.b32.xlu0 %v927_v34, %s1237_s6 }
  0xb2   : > { %v725_v12 = vadd.f32 %v717_v22, %v704_v37  ;;  %v780_v13 = vadd.f32 %v1520_v63, %v752_v23 }
  0xb4   : > { %v753_v32 = vadd.f32 %v1525_v46, %v725_v12  ;;  %v801_v41 = vadd.f32 %v1529_v47, %v780_v13 }
  0xb5   : > { %953 = vrot.lane.b32.xlu1 %v930_v50, %s1237_s6  ;;  %951 = vrot.lane.b32.xlu0 %v929_v39, %s1237_s6 }
  0xb6   : > { %v781_v42 = vadd.f32 %v1535_v20, %v753_v32 }
  0xb8   : > { %v802_v15 = vadd.f32 %v1540_v51, %v781_v42 }
  0xfb   : > { %v830_v63 = vpop.permute.xlu1 %829  ;;  %v828_v0 = vpop.permute.xlu0 %827 }
  0xfc   : > { %v852_v20 = vadd.f32 %v830_v63, %v1646_v8  ;;  %v851_v51 = vadd.f32 %v828_v0, %v1629_v45 }
  0xff   : > { %v834_v36 = vpop.permute.xlu1 %833  ;;  %v832_v59 = vpop.permute.xlu0 %831 }
 0x100   : > { %v854_v26 = vadd.f32 %v834_v36, %v798_v49  ;;  %v853_v4 = vadd.f32 %v832_v59, %v1667_v6 }
 0x103   : > { %v838_v17 = vpop.permute.xlu1 %837  ;;  %v836_v57 = vpop.permute.xlu0 %835 }
 0x104   : > { %v856_v62 = vadd.f32 %v838_v17, %v800_v28  ;;  %v855_v45 = vadd.f32 %v836_v57, %v799_v40 }
 0x107   : > { %v842_v21 = vpop.permute.xlu1 %841  ;;  %v840_v43 = vpop.permute.xlu0 %839 }
 0x108   : > { %v858_v40 = vadd.f32 %v842_v21, %v802_v15  ;;  %v857_v11 = vadd.f32 %v840_v43, %v801_v41 }
 0x10b   : > { %v886_v56 = vpop.permute.xlu1 %885  ;;  %v884_v46 = vpop.permute.xlu0 %883 }
 0x10c   : > { %v908_v53 = vadd.f32 %v886_v56, %v852_v20  ;;  %v907_v60 = vadd.f32 %v884_v46, %v851_v51 }
 0x10f   : > { %v890_v61 = vpop.permute.xlu1 %889  ;;  %v888_v47 = vpop.permute.xlu0 %887 }
 0x110   : > { %v910_v33 = vadd.f32 %v890_v61, %v854_v26  ;;  %v909_v19 = vadd.f32 %v888_v47, %v853_v4 }
 0x113   : > { %v894_v5 = vpop.permute.xlu1 %893  ;;  %v892_v7 = vpop.permute.xlu0 %891 }
 0x114   : > { %v912_v24 = vadd.f32 %v894_v5, %v856_v62  ;;  %v911_v3 = vadd.f32 %v892_v7, %v855_v45 }
 0x117   : > { %v898_v9 = vpop.permute.xlu1 %897  ;;  %v896_v25 = vpop.permute.xlu0 %895 }
 0x118   : > { %v914_v28 = vadd.f32 %v898_v9, %v858_v40  ;;  %v913_v23 = vadd.f32 %v896_v25, %v857_v11 }
 0x11b   : > { %v942_v52 = vpop.permute.xlu1 %941  ;;  %v940_v16 = vpop.permute.xlu0 %939 }
 0x11c   : > { %v964_v58 = vadd.f32 %v942_v52, %v908_v53  ;;  %v963_v1 = vadd.f32 %v940_v16, %v907_v60 }
 0x11e   : > { %v979_v31 = vadd.f32 %v1162_v54, %v964_v58  ;;  %v978_v8 = vadd.f32 %v1162_v54, %v963_v1 }
 0x11f   : > { %v946_v48 = vpop.permute.xlu1 %945  ;;  %v944_v55 = vpop.permute.xlu0 %943 }
 0x120   : > { %v987_v30 = vmax.f32 %v979_v31, 0.0  ;;  %v986_v14 = vmax.f32 %v978_v8, 0.0  ;;  %v966_v27 = vadd.f32 %v946_v48, %v910_v33  ;;  %v965_v29 = vadd.f32 %v944_v55, %v909_v19 }
 0x122   : > { %v995_v6 = vpack.c.bf16 %v987_v30, %v987_v30  ;;  %v994_v49 = vpack.c.bf16 %v986_v14, %v986_v14  ;;  %v981_v10 = vadd.f32 %v1162_v54, %v966_v27  ;;  %v980_v35 = vadd.f32 %v1162_v54, %v965_v29 }
 0x123   : > { %v950_v2 = vpop.permute.xlu1 %949  ;;  %v948_v22 = vpop.permute.xlu0 %947 }
 0x124   : > { %1004 = vst.msk [vmem:[%s1730_s12 + $0x4] sm:$0xf] %vm1002_vm3, %v995_v6  ;;  %1003 = vst.msk [vmem:[%s1730_s12] sm:$0xf] %vm1002_vm3, %v994_v49  ;;  %v989_v18 = vmax.f32 %v981_v10, 0.0  ;;  %v988_v44 = vmax.f32 %v980_v35, 0.0  ;;  %v968_v34 = vadd.f32 %v950_v2, %v912_v24  ;;  %v967_v37 = vadd.f32 %v948_v22, %v911_v3 }
 0x126   : > { %v997_v12 = vpack.c.bf16 %v989_v18, %v989_v18  ;;  %v996_v13 = vpack.c.bf16 %v988_v44, %v988_v44  ;;  %v983_v38 = vadd.f32 %v1162_v54, %v968_v34  ;;  %v982_v50 = vadd.f32 %v1162_v54, %v967_v37 }
 0x127   : > { %v954_v39 = vpop.permute.xlu1 %953  ;;  %v952_v32 = vpop.permute.xlu0 %951 }
 0x128   : > { %1006 = vst.msk [vmem:[%s1730_s12 + $0xc] sm:$0xf] %vm1002_vm3, %v997_v12  ;;  %1005 = vst.msk [vmem:[%s1730_s12 + $0x8] sm:$0xf] %vm1002_vm3, %v996_v13  ;;  %v991_v41 = vmax.f32 %v983_v38, 0.0  ;;  %v990_v42 = vmax.f32 %v982_v50, 0.0  ;;  %v970_v15 = vadd.f32 %v954_v39, %v914_v28  ;;  %v969_v63 = vadd.f32 %v952_v32, %v913_v23 }
 0x12a   : > { %v999_v0 = vpack.c.bf16 %v991_v41, %v991_v41  ;;  %v998_v36 = vpack.c.bf16 %v990_v42, %v990_v42  ;;  %v985_v59 = vadd.f32 %v1162_v54, %v970_v15  ;;  %v984_v17 = vadd.f32 %v1162_v54, %v969_v63 }
 0x12c   : > { %1008 = vst.msk [vmem:[%s1730_s12 + $0x14] sm:$0xf] %vm1002_vm3, %v999_v0  ;;  %1007 = vst.msk [vmem:[%s1730_s12 + $0x10] sm:$0xf] %vm1002_vm3, %v998_v36  ;;  %v993_v57 = vmax.f32 %v985_v59, 0.0  ;;  %v992_v21 = vmax.f32 %v984_v17, 0.0 }
 0x12e   : > { %v1001_v43 = vpack.c.bf16 %v993_v57, %v993_v57  ;;  %v1000_v56 = vpack.c.bf16 %v992_v21, %v992_v21 }
 0x130   : > { %1010 = vst.msk [vmem:[%s1730_s12 + $0x1c] sm:$0xf] %vm1002_vm3, %v1001_v43  ;;  %1009 = vst.msk [vmem:[%s1730_s12 + $0x18] sm:$0xf] %vm1002_vm3, %v1000_v56 }
 0x131 PF: > { %s15_s0 = sadd.s32 1, %s1233_s0   ;;  %s1775_s18 = smov %s1229_s19 }
 0x132   : > { %p12_p5 = scmp.ge.s32.totalorder %s15_s0, 4   ;;  %s1776_s19 = smov %s1778_s2 }
 0x134   :  { %14 = sbr.rel (!%p12_p5) target bundleno = 2 (0x2), region = 76 }

</bundles_post_ra>
